<compile_context>
chip_gen: v6e
topology: v6e:2x2x1
jax: 0.10.0
libtpu: 0.0.40
codegen_flags: <defaults>
</compile_context>

<pallas_src>
import functools

import numpy as np
import jax
import jax.numpy as jnp
from jax import lax
from jax.experimental import pallas as pl
from jax.experimental.pallas import tpu as pltpu

H = W = 16
HW = H * W
C_IN = 4
C_HID = 32
C_OUT = 4
KSIZE = 7
# TODO(synk): torchvision v2.GaussianBlur samples sigma ~ U(0.1, 2.0) per call;
# fixed deterministically to 1.0 here so the kernel is deterministic.
SIGMA = 1.0
# Images per grid step.  16 keeps the conv2 im2col scratch (~4.7 MB) + temps
# well inside every generation's scoped-VMEM budget (incl. v7x's 64 MiB VMEM)
# while making the lane width 4096 and the blur matmul M-dim 64.
TB_MAX = 16
TAPS = tuple((dy, dx) for dy in (-1, 0, 1) for dx in (-1, 0, 1))


# --------------------------- compile-time constants --------------------------

def gaussian_kernel1d(ksize, sigma):
    # Same formula as torchvision's _get_gaussian_kernel1d.
    half = (ksize - 1) * 0.5
    xs = np.linspace(-half, half, ksize)
    pdf = np.exp(-0.5 * (xs / sigma) ** 2)
    return pdf / pdf.sum()


def _reflect(p, n):
    # torch / numpy 'reflect' (edge not repeated); single reflection suffices
    # while KSIZE//2 < H, W (3 < 16 here).
    if p < 0:
        return -p
    if p >= n:
        return 2 * (n - 1) - p
    return p


def _blur_matrix(h, w, ksize, sigma):
    """(h*w, h*w) matrix G with blur(y)[c].flatten() == y[c].flatten() @ G."""
    k = gaussian_kernel1d(ksize, sigma)
    r = ksize // 2
    bv = np.zeros((h, h), np.float64)          # vertical taps, reflect folded in
    for i in range(h):
        for t in range(-r, r + 1):
            bv[i, _reflect(i + t, h)] += k[t + r]
    bh = np.zeros((w, w), np.float64)          # horizontal taps, reflect folded in
    for j in range(w):
        for s in range(-r, r + 1):
            bh[_reflect(j + s, w), j] += k[s + r]
    # G[i2*w + j2, i*w + j] = bv[i, i2] * bh[j2, j]
    return np.kron(bv.T, bh).astype(np.float32)


def _shift_masks(h, w):
    """(9, 1, h*w) 0/1 masks: validity of zero-padded 3x3 shifts in flat layout."""
    m = np.zeros((9, 1, h * w), np.float32)
    for idx, (dy, dx) in enumerate(TAPS):
        for i in range(h):
            for j in range(w):
                if 0 <= i + dy < h and 0 <= j + dx < w:
                    m[idx, 0, i * w + j] = 1.0
    return m


# -------------------------------- fused kernel --------------------------------

def _pbnn_kernel(x_ref, w1_ref, b1_ref, w2_ref, b2_ref, m_ref, g_ref,
                 o_ref, s2_ref, yt_ref, *, tb, positive_definite):
    """TB images: conv3x3+ReLU -> conv3x3(+exp) -> 7x7 reflect gaussian blur."""
    nb = tb * HW

    x = x_ref[...]                                       # (C_IN, nb)
    w1 = w1_ref[...]                                     # (9, C_HID, C_IN), one load

    # ---- conv1: 9 taps, mask the cheap (input) side, accumulate in f32 ------
    acc = None
    for k, (dy, dx) in enumerate(TAPS):
        d = dy * W + dx
        shifted = x if d == 0 else pltpu.roll(x, shift=(-d) % nb, axis=1)
        xm = shifted * m_ref[k]                          # (C_IN,nb) * (1,nb)
        contrib = jnp.dot(w1[k], xm, preferred_element_type=jnp.float32)
        acc = contrib if acc is None else acc + contrib
    h1 = jnp.maximum(acc + b1_ref[...], 0.0)             # (C_HID, nb)

    # ---- conv2: fold the 9 taps into the contraction dim (im2col scratch) ---
    for k, (dy, dx) in enumerate(TAPS):
        d = dy * W + dx
        shifted = h1 if d == 0 else pltpu.roll(h1, shift=(-d) % nb, axis=1)
        s2_ref[pl.ds(k * C_HID, C_HID), :] = shifted * m_ref[k]
    y2 = jnp.dot(w2_ref[...], s2_ref[...],
                 preferred_element_type=jnp.float32) + b2_ref[...]   # (C_OUT, nb)
    if positive_definite:
        y2 = jnp.exp(y2)                                 # EUP, fused

    # ---- relayout (C_OUT, tb*HW) -> (tb*C_OUT, HW), rows ordered (image, ch) -
    for t in range(tb):
        yt_ref[pl.ds(t * C_OUT, C_OUT), :] = y2[:, t * HW:(t + 1) * HW]

    # ---- blur: reflect-pad folded into G; ONE (tb*C_OUT,256)@(256,256) matmul
    o_ref[...] = jnp.dot(yt_ref[...], g_ref[...],
                         preferred_element_type=jnp.float32)


# ---------------------------------- wrappers ----------------------------------

def _pick_tb(b):
    if b <= 2:
        return b                                   # single grid step, full blocks
    # even (so tb*C_OUT % 8 == 0), ~b/2 (so the grid has >= 2 steps), <= TB_MAX
    return max(2, min(TB_MAX, (b // 2) // 2 * 2))


def pbnn_forward_batched(x_bchw, params, positive_definite=True, tb=None):
    """Batched TorchPBNN.forward (function_space=None): (B,C_IN,H,W)->(B,C_OUT,H,W)."""
    b = x_bchw.shape[0]
    if tb is None:
        tb = _pick_tb(b)
    steps = pl.cdiv(b, tb)
    b_pad = steps * tb
    if steps > 1 and (tb * C_OUT) % 8 != 0:
        raise ValueError("tb*C_OUT must be a multiple of 8 when grid > 1 step")
    nb = tb * HW

    x = x_bchw
    if b_pad != b:
        x = jnp.pad(x, ((0, b_pad - b), (0, 0), (0, 0), (0, 0)))

    # lane-batched input slab: (C_IN, b_pad*HW), columns ordered (image, pixel)
    xf = jnp.transpose(x, (1, 0, 2, 3)).reshape(C_IN, b_pad * HW)
    # conv weights in tap-major order (tap k = (dy+1)*3 + (dx+1))
    w1r = jnp.transpose(params["w1"], (0, 1, 3, 2)).reshape(9, C_HID, C_IN)
    w2c = jnp.transpose(params["w2"], (3, 0, 1, 2)).reshape(C_OUT, 9 * C_HID)
    b1c = params["b1"].reshape(C_HID, 1)
    b2c = params["b2"].reshape(C_OUT, 1)
    # per-tap 0/1 masks, tiled tb times along lanes (zero every wrapped column,
    # including the image-to-image wraps introduced by rolling the whole slab)
    masks = jnp.asarray(np.tile(_shift_masks(H, W), (1, 1, tb)))   # (9,1,nb)
    g = jnp.asarray(_blur_matrix(H, W, KSIZE, SIGMA))              # (HW,HW)

    flops = b_pad * (2 * 9 * C_HID * C_IN * HW
                     + 2 * 9 * C_OUT * C_HID * HW
                     + 2 * C_OUT * HW * HW)
    transc = b_pad * C_OUT * HW if positive_definite else 0
    bytes_accessed = 4 * (xf.size + w1r.size + b1c.size + w2c.size + b2c.size
                          + masks.size + g.size + b_pad * C_OUT * HW)

    out = pl.pallas_call(
        functools.partial(_pbnn_kernel, tb=tb,
                          positive_definite=positive_definite),
        out_shape=jax.ShapeDtypeStruct((b_pad * C_OUT, HW), jnp.float32),
        grid=(steps,),
        in_specs=[
            pl.BlockSpec((C_IN, nb), lambda i: (0, i)),
            pl.BlockSpec((9, C_HID, C_IN), lambda i: (0, 0, 0)),
            pl.BlockSpec((C_HID, 1), lambda i: (0, 0)),
            pl.BlockSpec((C_OUT, 9 * C_HID), lambda i: (0, 0)),
            pl.BlockSpec((C_OUT, 1), lambda i: (0, 0)),
            pl.BlockSpec((9, 1, nb), lambda i: (0, 0, 0)),
            pl.BlockSpec((HW, HW), lambda i: (0, 0)),
        ],
        out_specs=pl.BlockSpec((tb * C_OUT, HW), lambda i: (i, 0)),
        scratch_shapes=[
            pltpu.VMEM((9 * C_HID, nb), jnp.float32),    # conv2 im2col slab
            pltpu.VMEM((tb * C_OUT, HW), jnp.float32),   # blur-LHS relayout
        ],
        compiler_params=pltpu.CompilerParams(
            dimension_semantics=("parallel",),
            vmem_limit_bytes=32 * 1024 * 1024),
        cost_estimate=pl.CostEstimate(flops=flops, transcendentals=transc,
                                      bytes_accessed=bytes_accessed),
    )(xf, w1r, b1c, w2c, b2c, masks, g)
    # rows are ordered (image, channel) -> direct reshape to (B, C_OUT, H, W)
    return out.reshape(b_pad, C_OUT, H, W)[:b]


def pbnn_forward(x_chw, params, positive_definite=True):
    """TorchPBNN.forward with function_space=None: (C_IN,H,W) -> (C_OUT,H,W)."""
    return pbnn_forward_batched(x_chw[None], params, positive_definite)[0]


# ------------------------------ pure-JAX reference ----------------------------

def pbnn_reference(x_chw, params, positive_definite=True):
    x = jnp.transpose(x_chw, (1, 2, 0))[None]             # NHWC
    dn = ("NHWC", "HWIO", "NHWC")
    y = lax.conv_general_dilated(x, params["w1"], (1, 1), "SAME",
                                 dimension_numbers=dn)
    y = jnp.maximum(y + params["b1"], 0.0)
    y = lax.conv_general_dilated(y, params["w2"], (1, 1), "SAME",
                                 dimension_numbers=dn)
    y = y + params["b2"]
    if positive_definite:
        y = jnp.exp(y)
    k1d = gaussian_kernel1d(KSIZE, SIGMA)
    k2d = jnp.asarray(np.outer(k1d, k1d), jnp.float32)
    c = y.shape[-1]
    kern = jnp.tile(k2d[:, :, None, None], (1, 1, 1, c))  # depthwise HWIO
    pad = KSIZE // 2
    yp = jnp.pad(y, ((0, 0), (pad, pad), (pad, pad), (0, 0)), mode="reflect")
    yb = lax.conv_general_dilated(yp, kern, (1, 1), "VALID",
                                  dimension_numbers=dn, feature_group_count=c)
    return jnp.transpose(yb[0], (2, 0, 1))


# ---------------------------------- params ------------------------------------

def init_params(key):
    k1, k2, k3, k4 = jax.random.split(key, 4)
    # weights stored HWIO: (3, 3, Cin, Cout)
    w1 = 0.1 * jax.random.normal(k1, (3, 3, C_IN, C_HID), jnp.float32)
    b1 = 0.05 * jax.random.normal(k2, (C_HID,), jnp.float32)
    w2 = 0.1 * jax.random.normal(k3, (3, 3, C_HID, C_OUT), jnp.float32)
    b2 = 0.05 * jax.random.normal(k4, (C_OUT,), jnp.float32)
    return dict(w1=w1, b1=b1, w2=w2, b2=b2)


# TODO(synk): multichannel_img_to_dofs / function_space branch is an external
# FEM helper not defined in the source; only the function_space=None path
# (return the blurred image) is implemented.

if __name__ == "__main__":
    key = jax.random.PRNGKey(0)
    kx, kp = jax.random.split(key)
    params = init_params(kp)

    B = 8
    x = jax.random.normal(kx, (B, C_IN, H, W), jnp.float32)   # batch of CHW inputs

    fwd = jax.jit(pbnn_forward_batched)

    # batched fused kernel (tb=4 -> grid=(2,), lane-batched slabs)
    y = jax.block_until_ready(fwd(x, params))
    assert y.shape == (B, C_OUT, H, W)
    for i in range(B):
        y_ref = pbnn_reference(x[i], params)
        np.testing.assert_allclose(np.asarray(y[i]), np.asarray(y_ref),
                                   rtol=1e-4, atol=1e-4)

    # odd batch exercises zero-padding of the last grid step
    y3 = jax.block_until_ready(fwd(x[:3], params))
    np.testing.assert_allclose(np.asarray(y3), np.asarray(y[:3]),
                               rtol=1e-5, atol=1e-5)

    # module-faithful single-image path (TorchPBNN.forward gets CHW, adds batch)
    y0 = jax.block_until_ready(jax.jit(pbnn_forward)(x[0], params))
    np.testing.assert_allclose(np.asarray(y0), np.asarray(y[0]),
                               rtol=1e-5, atol=1e-5)

    print("KERNEL_OK")
</pallas_src>

<mosaic_0001>
module attributes {stable_mosaic.version = 11 : i64} {
  func.func @_pbnn_kernel(%arg0: i32, %arg1: memref<4x1024xf32, #tpu.memory_space<vmem>>, %arg2: memref<9x32x4xf32, #tpu.memory_space<vmem>>, %arg3: memref<32x1xf32, #tpu.memory_space<vmem>>, %arg4: memref<4x288xf32, #tpu.memory_space<vmem>>, %arg5: memref<4x1xf32, #tpu.memory_space<vmem>>, %arg6: memref<9x1x1024xf32, #tpu.memory_space<vmem>>, %arg7: memref<256x256xf32, #tpu.memory_space<vmem>>, %arg8: memref<16x256xf32, #tpu.memory_space<vmem>>, %arg9: memref<288x1024xf32, #tpu.memory_space<vmem>>, %arg10: memref<16x256xf32, #tpu.memory_space<vmem>>) attributes {dimension_semantics = [#tpu.dimension_semantics<parallel>], iteration_bounds = array<i64: 2>, scalar_prefetch = 0 : i64, scratch_operands = 2 : i64, tpu.core_type = #tpu.core_type<tc>, window_params = [{transform_indices = @transform_0, window_bounds = array<i64: 4, 1024>}, {pipeline_mode = #tpu.pipeline_mode<synchronous>, transform_indices = @transform_1, window_bounds = array<i64: 9, 32, 4>}, {pipeline_mode = #tpu.pipeline_mode<synchronous>, transform_indices = @transform_2, window_bounds = array<i64: 32, 1>}, {pipeline_mode = #tpu.pipeline_mode<synchronous>, transform_indices = @transform_3, window_bounds = array<i64: 4, 288>}, {pipeline_mode = #tpu.pipeline_mode<synchronous>, transform_indices = @transform_4, window_bounds = array<i64: 4, 1>}, {pipeline_mode = #tpu.pipeline_mode<synchronous>, transform_indices = @transform_5, window_bounds = array<i64: 9, 1, 1024>}, {pipeline_mode = #tpu.pipeline_mode<synchronous>, transform_indices = @transform_6, window_bounds = array<i64: 256, 256>}, {transform_indices = @transform_7, window_bounds = array<i64: 16, 256>}]} {
    %c0 = arith.constant 0 : index
    %c0_0 = arith.constant 0 : index
    %0 = vector.load %arg1[%c0, %c0_0] : memref<4x1024xf32, #tpu.memory_space<vmem>>, vector<4x1024xf32>
    %c0_1 = arith.constant 0 : index
    %c0_2 = arith.constant 0 : index
    %c0_3 = arith.constant 0 : index
    %1 = vector.load %arg2[%c0_1, %c0_2, %c0_3] : memref<9x32x4xf32, #tpu.memory_space<vmem>>, vector<9x32x4xf32>
    %c17_i32 = arith.constant 17 : i32
    %2 = tpu.dynamic_rotate %0 by %c17_i32 dim 1 : vector<4x1024xf32>, i32 -> vector<4x1024xf32>
    %c0_4 = arith.constant 0 : index
    %c0_5 = arith.constant 0 : index
    %c0_6 = arith.constant 0 : index
    %3 = vector.load %arg6[%c0_4, %c0_5, %c0_6] : memref<9x1x1024xf32, #tpu.memory_space<vmem>>, vector<1x1x1024xf32>
    %4 = vector.shape_cast %3 : vector<1x1x1024xf32> to vector<1x1024xf32>
    %5 = vector.broadcast %4 : vector<1x1024xf32> to vector<4x1024xf32>
    %6 = arith.mulf %2, %5 : vector<4x1024xf32>
    %7 = vector.extract_strided_slice %1 {offsets = [0, 0, 0], sizes = [1, 32, 4], strides = [1, 1, 1]} : vector<9x32x4xf32> to vector<1x32x4xf32>
    %8 = vector.shape_cast %7 : vector<1x32x4xf32> to vector<32x4xf32>
    %cst = arith.constant dense<0.000000e+00> : vector<32x1024xf32>
    %9 = tpu.matmul %8, %6, %cst {dimension_numbers = #tpu.dot_dimension_numbers<[1], [0], [0], [1], [0, 0, 1, 1], [], []>} : vector<32x4xf32>, vector<4x1024xf32>, vector<32x1024xf32> -> vector<32x1024xf32>
    %c16_i32 = arith.constant 16 : i32
    %10 = tpu.dynamic_rotate %0 by %c16_i32 dim 1 : vector<4x1024xf32>, i32 -> vector<4x1024xf32>
    %c1 = arith.constant 1 : index
    %c0_7 = arith.constant 0 : index
    %c0_8 = arith.constant 0 : index
    %11 = vector.load %arg6[%c1, %c0_7, %c0_8] : memref<9x1x1024xf32, #tpu.memory_space<vmem>>, vector<1x1x1024xf32>
    %12 = vector.shape_cast %11 : vector<1x1x1024xf32> to vector<1x1024xf32>
    %13 = vector.broadcast %12 : vector<1x1024xf32> to vector<4x1024xf32>
    %14 = arith.mulf %10, %13 : vector<4x1024xf32>
    %15 = vector.extract_strided_slice %1 {offsets = [1, 0, 0], sizes = [1, 32, 4], strides = [1, 1, 1]} : vector<9x32x4xf32> to vector<1x32x4xf32>
    %16 = vector.shape_cast %15 : vector<1x32x4xf32> to vector<32x4xf32>
    %cst_9 = arith.constant dense<0.000000e+00> : vector<32x1024xf32>
    %17 = tpu.matmul %16, %14, %cst_9 {dimension_numbers = #tpu.dot_dimension_numbers<[1], [0], [0], [1], [0, 0, 1, 1], [], []>} : vector<32x4xf32>, vector<4x1024xf32>, vector<32x1024xf32> -> vector<32x1024xf32>
    %18 = arith.addf %9, %17 : vector<32x1024xf32>
    %c15_i32 = arith.constant 15 : i32
    %19 = tpu.dynamic_rotate %0 by %c15_i32 dim 1 : vector<4x1024xf32>, i32 -> vector<4x1024xf32>
    %c2 = arith.constant 2 : index
    %c0_10 = arith.constant 0 : index
    %c0_11 = arith.constant 0 : index
    %20 = vector.load %arg6[%c2, %c0_10, %c0_11] : memref<9x1x1024xf32, #tpu.memory_space<vmem>>, vector<1x1x1024xf32>
    %21 = vector.shape_cast %20 : vector<1x1x1024xf32> to vector<1x1024xf32>
    %22 = vector.broadcast %21 : vector<1x1024xf32> to vector<4x1024xf32>
    %23 = arith.mulf %19, %22 : vector<4x1024xf32>
    %24 = vector.extract_strided_slice %1 {offsets = [2, 0, 0], sizes = [1, 32, 4], strides = [1, 1, 1]} : vector<9x32x4xf32> to vector<1x32x4xf32>
    %25 = vector.shape_cast %24 : vector<1x32x4xf32> to vector<32x4xf32>
    %cst_12 = arith.constant dense<0.000000e+00> : vector<32x1024xf32>
    %26 = tpu.matmul %25, %23, %cst_12 {dimension_numbers = #tpu.dot_dimension_numbers<[1], [0], [0], [1], [0, 0, 1, 1], [], []>} : vector<32x4xf32>, vector<4x1024xf32>, vector<32x1024xf32> -> vector<32x1024xf32>
    %27 = arith.addf %18, %26 : vector<32x1024xf32>
    %c1_i32 = arith.constant 1 : i32
    %28 = tpu.dynamic_rotate %0 by %c1_i32 dim 1 : vector<4x1024xf32>, i32 -> vector<4x1024xf32>
    %c3 = arith.constant 3 : index
    %c0_13 = arith.constant 0 : index
    %c0_14 = arith.constant 0 : index
    %29 = vector.load %arg6[%c3, %c0_13, %c0_14] : memref<9x1x1024xf32, #tpu.memory_space<vmem>>, vector<1x1x1024xf32>
    %30 = vector.shape_cast %29 : vector<1x1x1024xf32> to vector<1x1024xf32>
    %31 = vector.broadcast %30 : vector<1x1024xf32> to vector<4x1024xf32>
    %32 = arith.mulf %28, %31 : vector<4x1024xf32>
    %33 = vector.extract_strided_slice %1 {offsets = [3, 0, 0], sizes = [1, 32, 4], strides = [1, 1, 1]} : vector<9x32x4xf32> to vector<1x32x4xf32>
    %34 = vector.shape_cast %33 : vector<1x32x4xf32> to vector<32x4xf32>
    %cst_15 = arith.constant dense<0.000000e+00> : vector<32x1024xf32>
    %35 = tpu.matmul %34, %32, %cst_15 {dimension_numbers = #tpu.dot_dimension_numbers<[1], [0], [0], [1], [0, 0, 1, 1], [], []>} : vector<32x4xf32>, vector<4x1024xf32>, vector<32x1024xf32> -> vector<32x1024xf32>
    %36 = arith.addf %27, %35 : vector<32x1024xf32>
    %c4 = arith.constant 4 : index
    %c0_16 = arith.constant 0 : index
    %c0_17 = arith.constant 0 : index
    %37 = vector.load %arg6[%c4, %c0_16, %c0_17] : memref<9x1x1024xf32, #tpu.memory_space<vmem>>, vector<1x1x1024xf32>
    %38 = vector.shape_cast %37 : vector<1x1x1024xf32> to vector<1x1024xf32>
    %39 = vector.broadcast %38 : vector<1x1024xf32> to vector<4x1024xf32>
    %40 = arith.mulf %0, %39 : vector<4x1024xf32>
    %41 = vector.extract_strided_slice %1 {offsets = [4, 0, 0], sizes = [1, 32, 4], strides = [1, 1, 1]} : vector<9x32x4xf32> to vector<1x32x4xf32>
    %42 = vector.shape_cast %41 : vector<1x32x4xf32> to vector<32x4xf32>
    %cst_18 = arith.constant dense<0.000000e+00> : vector<32x1024xf32>
    %43 = tpu.matmul %42, %40, %cst_18 {dimension_numbers = #tpu.dot_dimension_numbers<[1], [0], [0], [1], [0, 0, 1, 1], [], []>} : vector<32x4xf32>, vector<4x1024xf32>, vector<32x1024xf32> -> vector<32x1024xf32>
    %44 = arith.addf %36, %43 : vector<32x1024xf32>
    %c1023_i32 = arith.constant 1023 : i32
    %45 = tpu.dynamic_rotate %0 by %c1023_i32 dim 1 : vector<4x1024xf32>, i32 -> vector<4x1024xf32>
    %c5 = arith.constant 5 : index
    %c0_19 = arith.constant 0 : index
    %c0_20 = arith.constant 0 : index
    %46 = vector.load %arg6[%c5, %c0_19, %c0_20] : memref<9x1x1024xf32, #tpu.memory_space<vmem>>, vector<1x1x1024xf32>
    %47 = vector.shape_cast %46 : vector<1x1x1024xf32> to vector<1x1024xf32>
    %48 = vector.broadcast %47 : vector<1x1024xf32> to vector<4x1024xf32>
    %49 = arith.mulf %45, %48 : vector<4x1024xf32>
    %50 = vector.extract_strided_slice %1 {offsets = [5, 0, 0], sizes = [1, 32, 4], strides = [1, 1, 1]} : vector<9x32x4xf32> to vector<1x32x4xf32>
    %51 = vector.shape_cast %50 : vector<1x32x4xf32> to vector<32x4xf32>
    %cst_21 = arith.constant dense<0.000000e+00> : vector<32x1024xf32>
    %52 = tpu.matmul %51, %49, %cst_21 {dimension_numbers = #tpu.dot_dimension_numbers<[1], [0], [0], [1], [0, 0, 1, 1], [], []>} : vector<32x4xf32>, vector<4x1024xf32>, vector<32x1024xf32> -> vector<32x1024xf32>
    %53 = arith.addf %44, %52 : vector<32x1024xf32>
    %c1009_i32 = arith.constant 1009 : i32
    %54 = tpu.dynamic_rotate %0 by %c1009_i32 dim 1 : vector<4x1024xf32>, i32 -> vector<4x1024xf32>
    %c6 = arith.constant 6 : index
    %c0_22 = arith.constant 0 : index
    %c0_23 = arith.constant 0 : index
    %55 = vector.load %arg6[%c6, %c0_22, %c0_23] : memref<9x1x1024xf32, #tpu.memory_space<vmem>>, vector<1x1x1024xf32>
    %56 = vector.shape_cast %55 : vector<1x1x1024xf32> to vector<1x1024xf32>
    %57 = vector.broadcast %56 : vector<1x1024xf32> to vector<4x1024xf32>
    %58 = arith.mulf %54, %57 : vector<4x1024xf32>
    %59 = vector.extract_strided_slice %1 {offsets = [6, 0, 0], sizes = [1, 32, 4], strides = [1, 1, 1]} : vector<9x32x4xf32> to vector<1x32x4xf32>
    %60 = vector.shape_cast %59 : vector<1x32x4xf32> to vector<32x4xf32>
    %cst_24 = arith.constant dense<0.000000e+00> : vector<32x1024xf32>
    %61 = tpu.matmul %60, %58, %cst_24 {dimension_numbers = #tpu.dot_dimension_numbers<[1], [0], [0], [1], [0, 0, 1, 1], [], []>} : vector<32x4xf32>, vector<4x1024xf32>, vector<32x1024xf32> -> vector<32x1024xf32>
    %62 = arith.addf %53, %61 : vector<32x1024xf32>
    %c1008_i32 = arith.constant 1008 : i32
    %63 = tpu.dynamic_rotate %0 by %c1008_i32 dim 1 : vector<4x1024xf32>, i32 -> vector<4x1024xf32>
    %c7 = arith.constant 7 : index
    %c0_25 = arith.constant 0 : index
    %c0_26 = arith.constant 0 : index
    %64 = vector.load %arg6[%c7, %c0_25, %c0_26] : memref<9x1x1024xf32, #tpu.memory_space<vmem>>, vector<1x1x1024xf32>
    %65 = vector.shape_cast %64 : vector<1x1x1024xf32> to vector<1x1024xf32>
    %66 = vector.broadcast %65 : vector<1x1024xf32> to vector<4x1024xf32>
    %67 = arith.mulf %63, %66 : vector<4x1024xf32>
    %68 = vector.extract_strided_slice %1 {offsets = [7, 0, 0], sizes = [1, 32, 4], strides = [1, 1, 1]} : vector<9x32x4xf32> to vector<1x32x4xf32>
    %69 = vector.shape_cast %68 : vector<1x32x4xf32> to vector<32x4xf32>
    %cst_27 = arith.constant dense<0.000000e+00> : vector<32x1024xf32>
    %70 = tpu.matmul %69, %67, %cst_27 {dimension_numbers = #tpu.dot_dimension_numbers<[1], [0], [0], [1], [0, 0, 1, 1], [], []>} : vector<32x4xf32>, vector<4x1024xf32>, vector<32x1024xf32> -> vector<32x1024xf32>
    %71 = arith.addf %62, %70 : vector<32x1024xf32>
    %c1007_i32 = arith.constant 1007 : i32
    %72 = tpu.dynamic_rotate %0 by %c1007_i32 dim 1 : vector<4x1024xf32>, i32 -> vector<4x1024xf32>
    %c8 = arith.constant 8 : index
    %c0_28 = arith.constant 0 : index
    %c0_29 = arith.constant 0 : index
    %73 = vector.load %arg6[%c8, %c0_28, %c0_29] : memref<9x1x1024xf32, #tpu.memory_space<vmem>>, vector<1x1x1024xf32>
    %74 = vector.shape_cast %73 : vector<1x1x1024xf32> to vector<1x1024xf32>
    %75 = vector.broadcast %74 : vector<1x1024xf32> to vector<4x1024xf32>
    %76 = arith.mulf %72, %75 : vector<4x1024xf32>
    %77 = vector.extract_strided_slice %1 {offsets = [8, 0, 0], sizes = [1, 32, 4], strides = [1, 1, 1]} : vector<9x32x4xf32> to vector<1x32x4xf32>
    %78 = vector.shape_cast %77 : vector<1x32x4xf32> to vector<32x4xf32>
    %cst_30 = arith.constant dense<0.000000e+00> : vector<32x1024xf32>
    %79 = tpu.matmul %78, %76, %cst_30 {dimension_numbers = #tpu.dot_dimension_numbers<[1], [0], [0], [1], [0, 0, 1, 1], [], []>} : vector<32x4xf32>, vector<4x1024xf32>, vector<32x1024xf32> -> vector<32x1024xf32>
    %80 = arith.addf %71, %79 : vector<32x1024xf32>
    %c0_31 = arith.constant 0 : index
    %c0_32 = arith.constant 0 : index
    %81 = vector.load %arg3[%c0_31, %c0_32] : memref<32x1xf32, #tpu.memory_space<vmem>>, vector<32x1xf32>
    %82 = vector.broadcast %81 : vector<32x1xf32> to vector<32x1024xf32>
    %83 = arith.addf %80, %82 : vector<32x1024xf32>
    %cst_33 = arith.constant 0.000000e+00 : f32
    %84 = vector.broadcast %cst_33 : f32 to vector<32x1024xf32>
    %85 = arith.maximumf %83, %84 : vector<32x1024xf32>
    %c17_i32_34 = arith.constant 17 : i32
    %86 = tpu.dynamic_rotate %85 by %c17_i32_34 dim 1 : vector<32x1024xf32>, i32 -> vector<32x1024xf32>
    %c0_35 = arith.constant 0 : index
    %c0_36 = arith.constant 0 : index
    %c0_37 = arith.constant 0 : index
    %87 = vector.load %arg6[%c0_35, %c0_36, %c0_37] : memref<9x1x1024xf32, #tpu.memory_space<vmem>>, vector<1x1x1024xf32>
    %88 = vector.shape_cast %87 : vector<1x1x1024xf32> to vector<1x1024xf32>
    %89 = vector.broadcast %88 : vector<1x1024xf32> to vector<32x1024xf32>
    %90 = arith.mulf %86, %89 : vector<32x1024xf32>
    %c0_38 = arith.constant 0 : index
    %c0_39 = arith.constant 0 : index
    %91 = vector.load %arg9[%c0_38, %c0_39] : memref<288x1024xf32, #tpu.memory_space<vmem>>, vector<32x1024xf32>
    tpu.vector_store %arg9[%c0_38, %c0_39], %90 {strides = array<i32>} : memref<288x1024xf32, #tpu.memory_space<vmem>>, vector<32x1024xf32>,
    %c16_i32_40 = arith.constant 16 : i32
    %92 = tpu.dynamic_rotate %85 by %c16_i32_40 dim 1 : vector<32x1024xf32>, i32 -> vector<32x1024xf32>
    %c1_41 = arith.constant 1 : index
    %c0_42 = arith.constant 0 : index
    %c0_43 = arith.constant 0 : index
    %93 = vector.load %arg6[%c1_41, %c0_42, %c0_43] : memref<9x1x1024xf32, #tpu.memory_space<vmem>>, vector<1x1x1024xf32>
    %94 = vector.shape_cast %93 : vector<1x1x1024xf32> to vector<1x1024xf32>
    %95 = vector.broadcast %94 : vector<1x1024xf32> to vector<32x1024xf32>
    %96 = arith.mulf %92, %95 : vector<32x1024xf32>
    %c32 = arith.constant 32 : index
    %c0_44 = arith.constant 0 : index
    %97 = vector.load %arg9[%c32, %c0_44] : memref<288x1024xf32, #tpu.memory_space<vmem>>, vector<32x1024xf32>
    tpu.vector_store %arg9[%c32, %c0_44], %96 {strides = array<i32>} : memref<288x1024xf32, #tpu.memory_space<vmem>>, vector<32x1024xf32>,
    %c15_i32_45 = arith.constant 15 : i32
    %98 = tpu.dynamic_rotate %85 by %c15_i32_45 dim 1 : vector<32x1024xf32>, i32 -> vector<32x1024xf32>
    %c2_46 = arith.constant 2 : index
    %c0_47 = arith.constant 0 : index
    %c0_48 = arith.constant 0 : index
    %99 = vector.load %arg6[%c2_46, %c0_47, %c0_48] : memref<9x1x1024xf32, #tpu.memory_space<vmem>>, vector<1x1x1024xf32>
    %100 = vector.shape_cast %99 : vector<1x1x1024xf32> to vector<1x1024xf32>
    %101 = vector.broadcast %100 : vector<1x1024xf32> to vector<32x1024xf32>
    %102 = arith.mulf %98, %101 : vector<32x1024xf32>
    %c64 = arith.constant 64 : index
    %c0_49 = arith.constant 0 : index
    %103 = vector.load %arg9[%c64, %c0_49] : memref<288x1024xf32, #tpu.memory_space<vmem>>, vector<32x1024xf32>
    tpu.vector_store %arg9[%c64, %c0_49], %102 {strides = array<i32>} : memref<288x1024xf32, #tpu.memory_space<vmem>>, vector<32x1024xf32>,
    %c1_i32_50 = arith.constant 1 : i32
    %104 = tpu.dynamic_rotate %85 by %c1_i32_50 dim 1 : vector<32x1024xf32>, i32 -> vector<32x1024xf32>
    %c3_51 = arith.constant 3 : index
    %c0_52 = arith.constant 0 : index
    %c0_53 = arith.constant 0 : index
    %105 = vector.load %arg6[%c3_51, %c0_52, %c0_53] : memref<9x1x1024xf32, #tpu.memory_space<vmem>>, vector<1x1x1024xf32>
    %106 = vector.shape_cast %105 : vector<1x1x1024xf32> to vector<1x1024xf32>
    %107 = vector.broadcast %106 : vector<1x1024xf32> to vector<32x1024xf32>
    %108 = arith.mulf %104, %107 : vector<32x1024xf32>
    %c96 = arith.constant 96 : index
    %c0_54 = arith.constant 0 : index
    %109 = vector.load %arg9[%c96, %c0_54] : memref<288x1024xf32, #tpu.memory_space<vmem>>, vector<32x1024xf32>
    tpu.vector_store %arg9[%c96, %c0_54], %108 {strides = array<i32>} : memref<288x1024xf32, #tpu.memory_space<vmem>>, vector<32x1024xf32>,
    %c4_55 = arith.constant 4 : index
    %c0_56 = arith.constant 0 : index
    %c0_57 = arith.constant 0 : index
    %110 = vector.load %arg6[%c4_55, %c0_56, %c0_57] : memref<9x1x1024xf32, #tpu.memory_space<vmem>>, vector<1x1x1024xf32>
    %111 = vector.shape_cast %110 : vector<1x1x1024xf32> to vector<1x1024xf32>
    %112 = vector.broadcast %111 : vector<1x1024xf32> to vector<32x1024xf32>
    %113 = arith.mulf %85, %112 : vector<32x1024xf32>
    %c128 = arith.constant 128 : index
    %c0_58 = arith.constant 0 : index
    %114 = vector.load %arg9[%c128, %c0_58] : memref<288x1024xf32, #tpu.memory_space<vmem>>, vector<32x1024xf32>
    tpu.vector_store %arg9[%c128, %c0_58], %113 {strides = array<i32>} : memref<288x1024xf32, #tpu.memory_space<vmem>>, vector<32x1024xf32>,
    %c1023_i32_59 = arith.constant 1023 : i32
    %115 = tpu.dynamic_rotate %85 by %c1023_i32_59 dim 1 : vector<32x1024xf32>, i32 -> vector<32x1024xf32>
    %c5_60 = arith.constant 5 : index
    %c0_61 = arith.constant 0 : index
    %c0_62 = arith.constant 0 : index
    %116 = vector.load %arg6[%c5_60, %c0_61, %c0_62] : memref<9x1x1024xf32, #tpu.memory_space<vmem>>, vector<1x1x1024xf32>
    %117 = vector.shape_cast %116 : vector<1x1x1024xf32> to vector<1x1024xf32>
    %118 = vector.broadcast %117 : vector<1x1024xf32> to vector<32x1024xf32>
    %119 = arith.mulf %115, %118 : vector<32x1024xf32>
    %c160 = arith.constant 160 : index
    %c0_63 = arith.constant 0 : index
    %120 = vector.load %arg9[%c160, %c0_63] : memref<288x1024xf32, #tpu.memory_space<vmem>>, vector<32x1024xf32>
    tpu.vector_store %arg9[%c160, %c0_63], %119 {strides = array<i32>} : memref<288x1024xf32, #tpu.memory_space<vmem>>, vector<32x1024xf32>,
    %c1009_i32_64 = arith.constant 1009 : i32
    %121 = tpu.dynamic_rotate %85 by %c1009_i32_64 dim 1 : vector<32x1024xf32>, i32 -> vector<32x1024xf32>
    %c6_65 = arith.constant 6 : index
    %c0_66 = arith.constant 0 : index
    %c0_67 = arith.constant 0 : index
    %122 = vector.load %arg6[%c6_65, %c0_66, %c0_67] : memref<9x1x1024xf32, #tpu.memory_space<vmem>>, vector<1x1x1024xf32>
    %123 = vector.shape_cast %122 : vector<1x1x1024xf32> to vector<1x1024xf32>
    %124 = vector.broadcast %123 : vector<1x1024xf32> to vector<32x1024xf32>
    %125 = arith.mulf %121, %124 : vector<32x1024xf32>
    %c192 = arith.constant 192 : index
    %c0_68 = arith.constant 0 : index
    %126 = vector.load %arg9[%c192, %c0_68] : memref<288x1024xf32, #tpu.memory_space<vmem>>, vector<32x1024xf32>
    tpu.vector_store %arg9[%c192, %c0_68], %125 {strides = array<i32>} : memref<288x1024xf32, #tpu.memory_space<vmem>>, vector<32x1024xf32>,
    %c1008_i32_69 = arith.constant 1008 : i32
    %127 = tpu.dynamic_rotate %85 by %c1008_i32_69 dim 1 : vector<32x1024xf32>, i32 -> vector<32x1024xf32>
    %c7_70 = arith.constant 7 : index
    %c0_71 = arith.constant 0 : index
    %c0_72 = arith.constant 0 : index
    %128 = vector.load %arg6[%c7_70, %c0_71, %c0_72] : memref<9x1x1024xf32, #tpu.memory_space<vmem>>, vector<1x1x1024xf32>
    %129 = vector.shape_cast %128 : vector<1x1x1024xf32> to vector<1x1024xf32>
    %130 = vector.broadcast %129 : vector<1x1024xf32> to vector<32x1024xf32>
    %131 = arith.mulf %127, %130 : vector<32x1024xf32>
    %c224 = arith.constant 224 : index
    %c0_73 = arith.constant 0 : index
    %132 = vector.load %arg9[%c224, %c0_73] : memref<288x1024xf32, #tpu.memory_space<vmem>>, vector<32x1024xf32>
    tpu.vector_store %arg9[%c224, %c0_73], %131 {strides = array<i32>} : memref<288x1024xf32, #tpu.memory_space<vmem>>, vector<32x1024xf32>,
    %c1007_i32_74 = arith.constant 1007 : i32
    %133 = tpu.dynamic_rotate %85 by %c1007_i32_74 dim 1 : vector<32x1024xf32>, i32 -> vector<32x1024xf32>
    %c8_75 = arith.constant 8 : index
    %c0_76 = arith.constant 0 : index
    %c0_77 = arith.constant 0 : index
    %134 = vector.load %arg6[%c8_75, %c0_76, %c0_77] : memref<9x1x1024xf32, #tpu.memory_space<vmem>>, vector<1x1x1024xf32>
    %135 = vector.shape_cast %134 : vector<1x1x1024xf32> to vector<1x1024xf32>
    %136 = vector.broadcast %135 : vector<1x1024xf32> to vector<32x1024xf32>
    %137 = arith.mulf %133, %136 : vector<32x1024xf32>
    %c256 = arith.constant 256 : index
    %c0_78 = arith.constant 0 : index
    %138 = vector.load %arg9[%c256, %c0_78] : memref<288x1024xf32, #tpu.memory_space<vmem>>, vector<32x1024xf32>
    tpu.vector_store %arg9[%c256, %c0_78], %137 {strides = array<i32>} : memref<288x1024xf32, #tpu.memory_space<vmem>>, vector<32x1024xf32>,
    %c0_79 = arith.constant 0 : index
    %c0_80 = arith.constant 0 : index
    %139 = vector.load %arg4[%c0_79, %c0_80] : memref<4x288xf32, #tpu.memory_space<vmem>>, vector<4x288xf32>
    %c0_81 = arith.constant 0 : index
    %c0_82 = arith.constant 0 : index
    %140 = vector.load %arg9[%c0_81, %c0_82] : memref<288x1024xf32, #tpu.memory_space<vmem>>, vector<288x1024xf32>
    %cst_83 = arith.constant dense<0.000000e+00> : vector<4x1024xf32>
    %141 = tpu.matmul %139, %140, %cst_83 {dimension_numbers = #tpu.dot_dimension_numbers<[1], [0], [0], [1], [0, 0, 1, 1], [], []>} : vector<4x288xf32>, vector<288x1024xf32>, vector<4x1024xf32> -> vector<4x1024xf32>
    %c0_84 = arith.constant 0 : index
    %c0_85 = arith.constant 0 : index
    %142 = vector.load %arg5[%c0_84, %c0_85] : memref<4x1xf32, #tpu.memory_space<vmem>>, vector<4x1xf32>
    %143 = vector.broadcast %142 : vector<4x1xf32> to vector<4x1024xf32>
    %144 = arith.addf %141, %143 : vector<4x1024xf32>
    %145 = math.exp %144 : vector<4x1024xf32>
    %146 = vector.extract_strided_slice %145 {offsets = [0, 0], sizes = [4, 256], strides = [1, 1]} : vector<4x1024xf32> to vector<4x256xf32>
    %c0_86 = arith.constant 0 : index
    %c0_87 = arith.constant 0 : index
    %147 = vector.load %arg10[%c0_86, %c0_87] : memref<16x256xf32, #tpu.memory_space<vmem>>, vector<4x256xf32>
    tpu.vector_store %arg10[%c0_86, %c0_87], %146 {strides = array<i32>} : memref<16x256xf32, #tpu.memory_space<vmem>>, vector<4x256xf32>,
    %148 = vector.extract_strided_slice %145 {offsets = [0, 256], sizes = [4, 256], strides = [1, 1]} : vector<4x1024xf32> to vector<4x256xf32>
    %c4_88 = arith.constant 4 : index
    %c0_89 = arith.constant 0 : index
    %149 = vector.load %arg10[%c4_88, %c0_89] : memref<16x256xf32, #tpu.memory_space<vmem>>, vector<4x256xf32>
    tpu.vector_store %arg10[%c4_88, %c0_89], %148 {strides = array<i32>} : memref<16x256xf32, #tpu.memory_space<vmem>>, vector<4x256xf32>,
    %150 = vector.extract_strided_slice %145 {offsets = [0, 512], sizes = [4, 256], strides = [1, 1]} : vector<4x1024xf32> to vector<4x256xf32>
    %c8_90 = arith.constant 8 : index
    %c0_91 = arith.constant 0 : index
    %151 = vector.load %arg10[%c8_90, %c0_91] : memref<16x256xf32, #tpu.memory_space<vmem>>, vector<4x256xf32>
    tpu.vector_store %arg10[%c8_90, %c0_91], %150 {strides = array<i32>} : memref<16x256xf32, #tpu.memory_space<vmem>>, vector<4x256xf32>,
    %152 = vector.extract_strided_slice %145 {offsets = [0, 768], sizes = [4, 256], strides = [1, 1]} : vector<4x1024xf32> to vector<4x256xf32>
    %c12 = arith.constant 12 : index
    %c0_92 = arith.constant 0 : index
    %153 = vector.load %arg10[%c12, %c0_92] : memref<16x256xf32, #tpu.memory_space<vmem>>, vector<4x256xf32>
    tpu.vector_store %arg10[%c12, %c0_92], %152 {strides = array<i32>} : memref<16x256xf32, #tpu.memory_space<vmem>>, vector<4x256xf32>,
    %c0_93 = arith.constant 0 : index
    %c0_94 = arith.constant 0 : index
    %154 = vector.load %arg10[%c0_93, %c0_94] : memref<16x256xf32, #tpu.memory_space<vmem>>, vector<16x256xf32>
    %c0_95 = arith.constant 0 : index
    %c0_96 = arith.constant 0 : index
    %155 = vector.load %arg7[%c0_95, %c0_96] : memref<256x256xf32, #tpu.memory_space<vmem>>, vector<256x256xf32>
    %cst_97 = arith.constant dense<0.000000e+00> : vector<16x256xf32>
    %156 = tpu.matmul %154, %155, %cst_97 {dimension_numbers = #tpu.dot_dimension_numbers<[1], [0], [0], [1], [0, 0, 1, 1], [], []>} : vector<16x256xf32>, vector<256x256xf32>, vector<16x256xf32> -> vector<16x256xf32>
    %c0_98 = arith.constant 0 : index
    %c0_99 = arith.constant 0 : index
    %157 = vector.load %arg8[%c0_98, %c0_99] : memref<16x256xf32, #tpu.memory_space<vmem>>, vector<16x256xf32>
    tpu.vector_store %arg8[%c0_98, %c0_99], %156 {strides = array<i32>} : memref<16x256xf32, #tpu.memory_space<vmem>>, vector<16x256xf32>,
    return
  }
  func.func @transform_0(%arg0: i32) -> (i32, i32) {
    %c0_i32 = arith.constant 0 : i32
    %c0_i32_0 = arith.constant 0 : i32
    return %c0_i32, %arg0 : i32, i32
  }
  func.func @transform_1(%arg0: i32) -> (i32, i32, i32) {
    %c0_i32 = arith.constant 0 : i32
    %c0_i32_0 = arith.constant 0 : i32
    %c0_i32_1 = arith.constant 0 : i32
    %c0_i32_2 = arith.constant 0 : i32
    return %c0_i32, %c0_i32_0, %c0_i32_1 : i32, i32, i32
  }
  func.func @transform_2(%arg0: i32) -> (i32, i32) {
    %c0_i32 = arith.constant 0 : i32
    %c0_i32_0 = arith.constant 0 : i32
    %c0_i32_1 = arith.constant 0 : i32
    return %c0_i32, %c0_i32_0 : i32, i32
  }
  func.func @transform_3(%arg0: i32) -> (i32, i32) {
    %c0_i32 = arith.constant 0 : i32
    %c0_i32_0 = arith.constant 0 : i32
    %c0_i32_1 = arith.constant 0 : i32
    return %c0_i32, %c0_i32_0 : i32, i32
  }
  func.func @transform_4(%arg0: i32) -> (i32, i32) {
    %c0_i32 = arith.constant 0 : i32
    %c0_i32_0 = arith.constant 0 : i32
    %c0_i32_1 = arith.constant 0 : i32
    return %c0_i32, %c0_i32_0 : i32, i32
  }
  func.func @transform_5(%arg0: i32) -> (i32, i32, i32) {
    %c0_i32 = arith.constant 0 : i32
    %c0_i32_0 = arith.constant 0 : i32
    %c0_i32_1 = arith.constant 0 : i32
    %c0_i32_2 = arith.constant 0 : i32
    return %c0_i32, %c0_i32_0, %c0_i32_1 : i32, i32, i32
  }
  func.func @transform_6(%arg0: i32) -> (i32, i32) {
    %c0_i32 = arith.constant 0 : i32
    %c0_i32_0 = arith.constant 0 : i32
    %c0_i32_1 = arith.constant 0 : i32
    return %c0_i32, %c0_i32_0 : i32, i32
  }
  func.func @transform_7(%arg0: i32) -> (i32, i32) {
    %c0_i32 = arith.constant 0 : i32
    %c0_i32_0 = arith.constant 0 : i32
    return %arg0, %c0_i32 : i32, i32
  }
}

</mosaic_0001>

<bundles_post_ra>
// kernel: pbnn_forward_batched.1
= control target key start
LH: loop header
LB: loop body
LE: loop exit
PB: predicated region body
PF: predicated region fallthrough
CT: control target
= control target key end

     0   :  { %s7986_s24 = smov 0   ;;  %s12806_s0 = inlined_call_operand.vmem [shape: f32[4,2048], index: 0, kind: input, shape index: {}]   ;;  %s12807_s1 = inlined_call_operand.vmem [shape: f32[9,32,4], index: 1, kind: input, shape index: {}]   ;;  %s12808_s2 = inlined_call_operand.vmem [shape: f32[32,1], index: 2, kind: input, shape index: {}]   ;;  %s12809_s3 = inlined_call_operand.vmem [shape: f32[4,288], index: 3, kind: input, shape index: {}]   ;;  %s12810_s4 = inlined_call_operand.vmem [shape: f32[4,1], index: 4, kind: input, shape index: {}]   ;;  %s12811_s5 = inlined_call_operand.vmem [shape: f32[9,1,1024], index: 5, kind: input, shape index: {}]   ;;  %s12812_s6 = inlined_call_operand.vmem [shape: f32[256,256], index: 6, kind: input, shape index: {}]   ;;  %s12813_s7 = inlined_call_operand.vmem [shape: f32[32,256], index: 7, kind: output, shape index: {}]  }
   0x1 LB: > { %s7628_s25 = sadd.s32 4294967295, %s7934_s24   ;;  %p7632_p0 = scmp.ge.s32.totalorder %s7934_s24, 1  ;;  %s7934_s24 = sphi %s7986_s24, %s17_s24  }
   0x2   : > { %p238_p1 = scmp.lt.s32.totalorder %s7934_s24, 3 }
   0x4   : > { %p239_p2 = pnand %p7632_p0, %p238_p1 }
   0x6   : > { %242 = sbr.rel (%p239_p2) target bundleno = 1647 (0x66f), region = 48 }
   0xb   : > { %s7633_s26 = sshll.u32 %s7628_s25, 3  ;;  %v12822_v0 = vmov 0.0   ;;  %s7937_s8 = smov 16   ;;  %v352_v9 = vlaneseq  ;;  %v8152_v15 = vld [vmem:[%s12811_s5 + $0x8] sm:$0xff]  ;;  %vm502_vm1 = vcmask 1043456   ;;  %v8190_v30 = vld [vmem:[%s12807_s1 + $0x20] sm:$0xff] }
   0xc   : > { %p272_p3 = scmp.lt.s32.totalorder %s7633_s26, 15  ;;  %591 = vmatprep.mubr.f32.mxu1 %v12822_v0  ;;  %983 = vmatprep.mubr.f32.mxu0 %v12822_v0  ;;  %s7938_s9 = smov 17   ;;  %vm489_vm2 = vcmask 31744   ;;  %v8210_v38 = vld [vmem:[%s12807_s1 + $0x28] sm:$0xff]  ;;  %v8229_v43 = vld [vmem:[%s12807_s1 + $0x30] sm:$0xff]  ;;  %v8247_v48 = vld [vmem:[%s12811_s5] sm:$0xff] }
   0xd   : > { %s7939_s10 = smov 15   ;;  %s7940_s11 = smov 1   ;;  %v8135_v10 = vshrl.u32 %v352_v9, 7  ;;  %v8139_v11 = vand.u32 127, %v352_v9  ;;  %v8253_v49 = vld [vmem:[%s12807_s1 + $0x38] sm:$0xff]  ;;  %vm6814_vm10 = vcmask 261120  }
   0xe   : > { %s13626_s26 = smov (!%p272_p3, %s7633_s26), 15  ;;  %s7941_s12 = smov 127  }
   0xf   : > { %s7634_s27 = sshll.u32 %s13626_s26, 2  ;;  %s7942_s13 = smov 113   ;;  %v8142_v12 = vsub.s32 1, %v8135_v10  ;;  %v8147_v13 = vsub.s32 0, %v8135_v10  ;;  %vm429_vm0 = vcmp.lt.s32.totalorder %v8139_v11, 16  ;;  %v8162_v18 = vsub.s32 3, %v8135_v10 }
  0x10   : > { %s275_s30 = scalar_lea.vmem %s12806_s0, %s7634_s27  ;;  %s7943_s14 = smov 112   ;;  %v8167_v19 = vsub.s32 2, %v8135_v10  ;;  %v8181_v27 = vsub.s32 5, %v8135_v10  ;;  %v8235_v45 = vsub.s32 4, %v8135_v10  ;;  %v8238_v46 = vsub.s32 7, %v8135_v10 }
  0x11   : > { %v8001_v1 = vld [vmem:[%s275_s30] sm:$0xff]  ;;  %v8003_v2 = vld [vmem:[%s275_s30 + $0x18] sm:$0xff]  ;;  %v8015_v5 = vld [vmem:[%s275_s30 + $0x8] sm:$0xff]  ;;  %13063 = vst [vmem:[#allocation4_spill] sm:$0xff] %v8142_v12  ;;  %s7944_s15 = smov 111   ;;  %v448_v17 = vrot.slane %v8152_v15, %v8142_v12  ;;  %v444_v20 = vrot.slane %v8152_v15, %v8147_v13  ;;  %v456_v26 = vrot.slane %v8152_v15, %v8162_v18  ;;  %v8259_v51 = vrot.slane %v8247_v48, %v8142_v12 }
  0x12   : > { %413 = vrot.lane.b32.xlu0 %v8001_v1, %s7937_s8  ;;  %v8009_v3 = vcombine.high %v8003_v2, %v8003_v2  ;;  %v8013_v4 = vcombine.high %v8001_v1, %v8001_v1  ;;  %v8023_v6 = vcombine.high %v8015_v5, %v8015_v5  ;;  %v8025_v7 = vld [vmem:[%s275_s30 + $0x10] sm:$0xff]  ;;  %13064 = vst [vmem:[#allocation5_spill] sm:$0xff] %v8147_v13  ;;  %13065 = vst [vmem:[#allocation6_spill] sm:$0xff] %v8162_v18 }
  0x13   : > { %v8033_v8 = vcombine.high %v8025_v7, %v8025_v7  ;;  %13066 = vst [vmem:[#allocation7_spill] sm:$0xff] %v8167_v19  ;;  %13067 = vst [vmem:[#allocation8_spill] sm:$0xff] %v8181_v27  ;;  %v452_v28 = vrot.slane %v8152_v15, %v8167_v19  ;;  %v464_v36 = vrot.slane %v8152_v15, %v8181_v27  ;;  %vm354_vm3 = vcmp.lt.s32.totalorder %v8139_v11, 17 }
  0x14   : > { %427 = vrot.lane.b32.xlu1 %v8009_v3, %s7937_s8  ;;  %13068 = vst [vmem:[#allocation9_spill] sm:$0xff] %v8235_v45  ;;  %13069 = vst [vmem:[#allocation10_spill] sm:$0xff] %v8238_v46  ;;  %v460_v52 = vrot.slane %v8152_v15, %v8235_v45  ;;  %v472_v54 = vrot.slane %v8152_v15, %v8238_v46  ;;  %v8272_v56 = vrot.slane %v8247_v48, %v8147_v13 }
  0x15   : > { %13070 = vst [vmem:[#allocation11_spill] sm:$0xff] %v8259_v51  ;;  %v8307_v9 = vrot.slane %v8247_v48, %v8235_v45  ;;  %vm1291_vm4 = vcmp.lt.s32.totalorder %v8139_v11, 15  ;;  %vm1791_vm5 = vcmp.lt.s32.totalorder %v8139_v11, 1  ;;  %vm2762_vm6 = vcmp.lt.s32.totalorder %v8139_v11, 127 }
  0x16   : > { %415 = vrot.lane.b32.xlu0 %v8013_v4, %s7937_s8  ;;  %13071 = vst [vmem:[#allocation12_spill] sm:$0xff] %v8272_v56  ;;  %vm3262_vm7 = vcmp.lt.s32.totalorder %v8139_v11, 113  ;;  %vm3762_vm8 = vcmp.lt.s32.totalorder %v8139_v11, 112  ;;  %vm4262_vm9 = vcmp.lt.s32.totalorder %v8139_v11, 111  ;;  %v7456_v11 = vld [vmem:[%s12812_s6 + $0xf8] sm:$0xff] }
  0x17   : > { %13072 = vst [vmem:[#allocation13_spill] sm:$0xff] %v8307_v9 }
  0x18   : > { %417 = vrot.lane.b32.xlu1 %v8015_v5, %s7937_s8 }
  0x1a   : > { %419 = vrot.lane.b32.xlu0 %v8023_v6, %s7937_s8 }
  0x1c   : > { %421 = vrot.lane.b32.xlu1 %v8025_v7, %s7937_s8 }
  0x1e   : > { %423 = vrot.lane.b32.xlu0 %v8033_v8, %s7937_s8 }
  0x20   : > { %425 = vrot.lane.b32.xlu1 %v8003_v2, %s7937_s8 }
  0x22   : > { %340 = vrot.lane.b32.xlu0 %v8015_v5, %s7938_s9 }
  0x24   : > { %342 = vrot.lane.b32.xlu1 %v8023_v6, %s7938_s9 }
  0x26   : > { %338 = vrot.lane.b32.xlu0 %v8013_v4, %s7938_s9 }
  0x28   : > { %336 = vrot.lane.b32.xlu1 %v8001_v1, %s7938_s9 }
  0x2a   : > { %350 = vrot.lane.b32.xlu0 %v8009_v3, %s7938_s9 }
  0x2c   : > { %348 = vrot.lane.b32.xlu1 %v8003_v2, %s7938_s9 }
  0x2e   : > { %346 = vrot.lane.b32.xlu0 %v8033_v8, %s7938_s9 }
  0x30   : > { %344 = vrot.lane.b32.xlu1 %v8025_v7, %s7938_s9 }
  0x32   : > { %1279 = vrot.lane.b32.xlu0 %v8015_v5, %s7939_s10 }
  0x34   : > { %1281 = vrot.lane.b32.xlu1 %v8023_v6, %s7939_s10 }
  0x36   : > { %1277 = vrot.lane.b32.xlu0 %v8013_v4, %s7939_s10 }
  0x38   : > { %1275 = vrot.lane.b32.xlu1 %v8001_v1, %s7939_s10 }
  0x3a   : > { %1289 = vrot.lane.b32.xlu0 %v8009_v3, %s7939_s10 }
  0x3c   : > { %1287 = vrot.lane.b32.xlu1 %v8003_v2, %s7939_s10 }
  0x3e   : > { %1285 = vrot.lane.b32.xlu0 %v8033_v8, %s7939_s10 }
  0x40   : > { %1283 = vrot.lane.b32.xlu1 %v8025_v7, %s7939_s10 }
  0x42   : > { %1779 = vrot.lane.b32.xlu0 %v8015_v5, %s7940_s11 }
  0x44   : > { %1781 = vrot.lane.b32.xlu1 %v8023_v6, %s7940_s11 }
  0x46   : > { %1777 = vrot.lane.b32.xlu0 %v8013_v4, %s7940_s11 }
  0x48   : > { %1775 = vrot.lane.b32.xlu1 %v8001_v1, %s7940_s11 }
  0x4a   : > { %1789 = vrot.lane.b32.xlu0 %v8009_v3, %s7940_s11 }
  0x4c   : > { %1787 = vrot.lane.b32.xlu1 %v8003_v2, %s7940_s11 }
  0x4e   : > { %1785 = vrot.lane.b32.xlu0 %v8033_v8, %s7940_s11 }
  0x50   : > { %1783 = vrot.lane.b32.xlu1 %v8025_v7, %s7940_s11 }
  0x52   : > { %2752 = vrot.lane.b32.xlu0 %v8023_v6, %s7941_s12 }
  0x54   : > { %2754 = vrot.lane.b32.xlu1 %v8025_v7, %s7941_s12 }
  0x56   : > { %2750 = vrot.lane.b32.xlu0 %v8015_v5, %s7941_s12 }
  0x58   : > { %2748 = vrot.lane.b32.xlu1 %v8013_v4, %s7941_s12 }
  0x5a   : > { %2746 = vrot.lane.b32.xlu0 %v8001_v1, %s7941_s12 }
  0x5c   : > { %2760 = vrot.lane.b32.xlu1 %v8009_v3, %s7941_s12 }
  0x5e   : > { %2758 = vrot.lane.b32.xlu0 %v8003_v2, %s7941_s12 }
  0x60   : > { %2756 = vrot.lane.b32.xlu1 %v8033_v8, %s7941_s12 }
  0x62   : > { %3252 = vrot.lane.b32.xlu0 %v8023_v6, %s7942_s13 }
  0x64   : > { %3254 = vrot.lane.b32.xlu1 %v8025_v7, %s7942_s13 }
  0x66   : > { %3250 = vrot.lane.b32.xlu0 %v8015_v5, %s7942_s13 }
  0x68   : > { %3248 = vrot.lane.b32.xlu1 %v8013_v4, %s7942_s13 }
  0x6a   : > { %3246 = vrot.lane.b32.xlu0 %v8001_v1, %s7942_s13 }
  0x6c   : > { %3260 = vrot.lane.b32.xlu1 %v8009_v3, %s7942_s13 }
  0x6e   : > { %3258 = vrot.lane.b32.xlu0 %v8003_v2, %s7942_s13 }
  0x70   : > { %3256 = vrot.lane.b32.xlu1 %v8033_v8, %s7942_s13 }
  0x72   : > { %3752 = vrot.lane.b32.xlu0 %v8023_v6, %s7943_s14 }
  0x74   : > { %3754 = vrot.lane.b32.xlu1 %v8025_v7, %s7943_s14 }
  0x76   : > { %3750 = vrot.lane.b32.xlu0 %v8015_v5, %s7943_s14 }
  0x78   : > { %3748 = vrot.lane.b32.xlu1 %v8013_v4, %s7943_s14 }
  0x7a   : > { %3746 = vrot.lane.b32.xlu0 %v8001_v1, %s7943_s14 }
  0x7c   : > { %3760 = vrot.lane.b32.xlu1 %v8009_v3, %s7943_s14 }
  0x7e   : > { %3758 = vrot.lane.b32.xlu0 %v8003_v2, %s7943_s14 }
  0x80   : > { %3756 = vrot.lane.b32.xlu1 %v8033_v8, %s7943_s14 }
  0x82   : > { %4252 = vrot.lane.b32.xlu0 %v8023_v6, %s7944_s15  ;;  %v8297_v6 = vld [vmem:[%s12807_s1] sm:$0xff] }
  0x84   : > { %v414_v14 = vpop.permute.xlu0 %413  ;;  %4254 = vrot.lane.b32.xlu1 %v8025_v7, %s7944_s15 }
  0x86   : > { %v8157_v16 = vpop.permute.xlu1 %427  ;;  %4250 = vrot.lane.b32.xlu0 %v8015_v5, %s7944_s15 }
  0x87   : > { %v437_v21 = vsel %vm429_vm0, %v8157_v16, %v414_v14 }
  0x88   : > { %v416_v22 = vpop.permute.xlu0 %415  ;;  %4248 = vrot.lane.b32.xlu1 %v8013_v4, %s7944_s15  ;;  %v481_v29 = vmul.f32 %v444_v20, %v437_v21 }
  0x89   : > { %v436_v23 = vsel %vm429_vm0, %v414_v14, %v416_v22  ;;  %v8311_v14 = vrot.slane %v8247_v48, %v8181_v27 }
  0x8a   : > { %v418_v24 = vpop.permute.xlu1 %417  ;;  %v482_v25 = vmul.f32 %v448_v17, %v436_v23  ;;  %4246 = vrot.lane.b32.xlu0 %v8001_v1, %s7944_s15  ;;  %v8321_v17 = vld [vmem:[%s12807_s1 + $0x8] sm:$0xff] }
  0x8b   : > { %v435_v31 = vsel %vm429_vm0, %v416_v22, %v418_v24  ;;  %13073 = vst [vmem:[#allocation14_spill] sm:$0xff] %v8311_v14 }
  0x8c   : > { %7639 = vmatprep.subr.msk.mxu1 %vm502_vm1, %v482_v25  ;;  %v420_v32 = vpop.permute.xlu0 %419  ;;  %4260 = vrot.lane.b32.xlu1 %v8009_v3, %s7944_s15  ;;  %v483_v37 = vmul.f32 %v452_v28, %v435_v31  ;;  %v8335_v25 = vsub.s32 6, %v8135_v10  ;;  %v8347_v28 = vld [vmem:[%s12807_s1 + $0x10] sm:$0xff] }
  0x8d   : > { %v434_v33 = vsel %vm429_vm0, %v418_v24, %v420_v32  ;;  %7640 = vmatpush1.msk.msra.mxu1 %vm502_vm1, %v481_v29  ;;  %v8353_v10 = vld [vmem:[%s12811_s5 + $0x10] sm:$0xff] }
  0x8e   : > { %v484_v34 = vmul.f32 %v456_v26, %v434_v33  ;;  %v422_v35 = vpop.permute.xlu1 %421  ;;  %7641 = vmatmul.mubr.msk.f32.vlgmr.msra.gmra.mxu1 %vm489_vm2, %v8190_v30  ;;  %4258 = vrot.lane.b32.xlu0 %v8003_v2, %s7944_s15  ;;  %13074 = vst [vmem:[#allocation15_spill] sm:$0xff] %v8335_v25  ;;  %v1310_v29 = vrot.slane %v8353_v10, %v8142_v12 }
  0x8f   : > { %597 = vmatprep.mubr.f32.mxu1 %v12822_v0  ;;  %v433_v53 = vsel %vm429_vm0, %v420_v32, %v422_v35  ;;  %v468_v32 = vrot.slane %v8152_v15, %v8335_v25  ;;  %v8380_v15 = vld [vmem:[%s12807_s1 + $0x18] sm:$0xff] }
  0x90   : > { %7645 = vmatprep.subr.msk.mxu1 %vm502_vm1, %v484_v34  ;;  %v8213_v39 = vpop.permute.xlu0 %423  ;;  %4256 = vrot.lane.b32.xlu1 %v8033_v8, %s7944_s15  ;;  %v485_v61 = vmul.f32 %v460_v52, %v433_v53  ;;  %v8372_v34 = vrot.slane %v8247_v48, %v8162_v18 }
  0x91   : > { %v432_v40 = vsel %vm429_vm0, %v422_v35, %v8213_v39  ;;  %7646 = vmatpush1.msk.msra.mxu1 %vm502_vm1, %v483_v37 }
  0x92   : > { %v486_v41 = vmul.f32 %v464_v36, %v432_v40  ;;  %v8221_v42 = vpop.permute.xlu1 %425  ;;  %7642 = vmatmul.mubr.msk.f32.gmra.mxu1 %vm489_vm2, %v8210_v38  ;;  %13075 = vst [vmem:[#allocation16_spill] sm:$0xff] %v8372_v34 }
  0x93   : > { %603 = vmatprep.mubr.f32.mxu1 %v12822_v0  ;;  %v430_v57 = vsel %vm429_vm0, %v8221_v42, %v8157_v16  ;;  %v431_v33 = vsel %vm429_vm0, %v8213_v39, %v8221_v42  ;;  %v1306_v39 = vrot.slane %v8353_v10, %v8147_v13 }
  0x94   : > { %7651 = vmatprep.subr.msk.mxu1 %vm502_vm1, %v486_v41  ;;  %v8232_v44 = vpop.permute.xlu0 %340  ;;  %v488_v63 = vmul.f32 %v472_v54, %v430_v57  ;;  %v487_v42 = vmul.f32 %v468_v32, %v431_v33 }
  0x96   : > { %v8240_v47 = vpop.permute.xlu1 %342  ;;  %7643 = vmatmul.mubr.msk.f32.gmra.mxu1 %vm489_vm2, %v8229_v43 }
  0x97   : > { %609 = vmatprep.mubr.f32.mxu1 %v12822_v0  ;;  %v359_v36 = vsel %vm354_vm3, %v8232_v44, %v8240_v47 }
  0x98   : > { %v8255_v50 = vpop.permute.xlu0 %338  ;;  %v408_v52 = vmul.f32 %v8372_v34, %v359_v36  ;;  %v8484_v36 = vld [vmem:[%s12807_s1 + $0x40] sm:$0xff] }
  0x9a   : > { %v337_v55 = vpop.permute.xlu1 %336  ;;  %7644 = vmatmul.mubr.msk.f32.gmra.mxu1 %vm489_vm2, %v8253_v49 }
  0x9b   : > { %680 = vmatprep.mubr.f32.mxu1 %v12822_v0  ;;  %v361_v58 = vsel %vm354_vm3, %v337_v55, %v8255_v50 }
  0x9c   : > { %v8282_v59 = vpop.permute.xlu0 %350  ;;  %v406_v60 = vmul.f32 %v8259_v51, %v361_v58 }
  0x9d   : > { %v362_v62 = vsel %vm354_vm3, %v8282_v59, %v337_v55  ;;  %v1326_v55 = vrot.slane %v8353_v10, %v8181_v27 }
  0x9e   : > { %v8288_v3 = vpop.permute.xlu1 %348  ;;  %7647 = vmatmul.mubr.msk.f32.vlgmr.msra.gmra.mxu1 %vm489_vm2, %v8190_v30  ;;  %7663 = vmatprep.subr.msk.mxu0 %vm502_vm1, %v406_v60  ;;  %v405_v4 = vmul.f32 %v8272_v56, %v362_v62 }
  0x9f   : > { %7652 = vmatpush1.msk.msra.mxu1 %vm502_vm1, %v485_v61  ;;  %686 = vmatprep.mubr.f32.mxu1 %v12822_v0 }
  0xa0   : > { %7657 = vmatprep.subr.msk.mxu1 %vm502_vm1, %v488_v63  ;;  %7664 = vmatpush1.msk.msra.mxu0 %vm502_vm1, %v405_v4  ;;  %v8303_v8 = vpop.permute.xlu0 %346  ;;  %v8436_v4 = vrot.slane %v8247_v48, %v8167_v19 }
  0xa1   : > { %7665 = vmatmul.mubr.msk.f32.vlgmr.msra.gmra.mxu0 %vm489_vm2, %v8297_v6 }
  0xa2   : > { %v345_v16 = vpop.permute.xlu1 %344  ;;  %7648 = vmatmul.mubr.msk.f32.gmra.mxu1 %vm489_vm2, %v8210_v38  ;;  %989 = vmatprep.mubr.f32.mxu0 %v12822_v0  ;;  %13076 = vst [vmem:[#allocation17_spill] sm:$0xff] %v8436_v4 }
  0xa3   : > { %v357_v20 = vsel %vm354_vm3, %v345_v16, %v8303_v8  ;;  %v358_v21 = vsel %vm354_vm3, %v8240_v47, %v345_v16  ;;  %692 = vmatprep.mubr.f32.mxu1 %v12822_v0  ;;  %v360_v16 = vsel %vm354_vm3, %v8255_v50, %v8232_v44  ;;  %v8459_v44 = vld [vmem:[%s12811_s5 + $0x18] sm:$0xff]  ;;  %v1322_v50 = vrot.slane %v8353_v10, %v8235_v45 }
  0xa4   : > { %v409_v22 = vmul.f32 %v8307_v9, %v358_v21  ;;  %v410_v23 = vmul.f32 %v8311_v14, %v357_v20  ;;  %v8332_v24 = vpop.permute.xlu0 %1279  ;;  %v8446_v20 = vrot.slane %v8247_v48, %v8238_v46  ;;  %v355_v21 = vsel %vm354_vm3, %v8288_v3, %v8282_v59 }
  0xa5   : > { %7666 = vmatmul.mubr.msk.f32.gmra.mxu0 %vm489_vm2, %v8321_v17  ;;  %v407_v59 = vmul.f32 %v8436_v4, %v360_v16 }
  0xa6   : > { %v8339_v26 = vpop.permute.xlu1 %1281  ;;  %7649 = vmatmul.mubr.msk.f32.gmra.mxu1 %vm489_vm2, %v8229_v43  ;;  %7675 = vmatprep.subr.msk.mxu0 %vm502_vm1, %v410_v23  ;;  %13077 = vst [vmem:[#allocation18_spill] sm:$0xff] %v8446_v20  ;;  %v1810_v23 = vrot.slane %v8459_v44, %v8142_v12 }
  0xa7   : > { %7676 = vmatpush1.msk.msra.mxu0 %vm502_vm1, %v409_v22  ;;  %995 = vmatprep.mubr.f32.mxu0 %v12822_v0 }
  0xa8   : > { %698 = vmatprep.mubr.f32.mxu1 %v12822_v0  ;;  %v8359_v31 = vpop.permute.xlu0 %1277 }
  0xa9   : > { %7667 = vmatmul.mubr.msk.f32.gmra.mxu0 %vm489_vm2, %v8347_v28 }
  0xaa   : > { %v1276_v35 = vpop.permute.xlu1 %1275  ;;  %7650 = vmatmul.mubr.msk.f32.gmra.mxu1 %vm489_vm2, %v8253_v49  ;;  %1001 = vmatprep.mubr.f32.mxu0 %v12822_v0 }
  0xab   : > { %v1298_v37 = vsel %vm1291_vm4, %v1276_v35, %v8359_v31  ;;  %769 = vmatprep.mubr.f32.mxu1 %v12822_v0 }
  0xac   : > { %v1344_v40 = vmul.f32 %v1310_v29, %v1298_v37  ;;  %v8392_v41 = vpop.permute.xlu0 %1289 }
  0xad   : > { %7668 = vmatmul.mubr.msk.f32.gmra.mxu0 %vm489_vm2, %v8380_v15  ;;  %v1299_v47 = vsel %vm1291_vm4, %v8392_v41, %v1276_v35  ;;  %v412_v35 = vmul.f32 %v8446_v20, %v355_v21 }
  0xae   : > { %v8400_v53 = vpop.permute.xlu1 %1287  ;;  %7653 = vmatmul.mubr.msk.f32.vlgmr.msra.gmra.mxu1 %vm489_vm2, %v8190_v30  ;;  %1161 = vmatprep.mubr.f32.mxu0 %v12822_v0  ;;  %v1343_v54 = vmul.f32 %v1306_v39, %v1299_v47  ;;  %v8519_v47 = vrot.slane %v8247_v48, %v8335_v25  ;;  %v8535_v48 = vld [vmem:[%s12807_s1 + $0x58] sm:$0xff] }
  0xaf   : > { %7658 = vmatpush1.msk.msra.mxu1 %vm502_vm1, %v487_v42  ;;  %775 = vmatprep.mubr.f32.mxu1 %v12822_v0 }
  0xb0   : > { %7669 = vmatprep.subr.msk.mxu1 %vm502_vm1, %v408_v52  ;;  %7688 = vmatprep.subr.msk.mxu0 %vm502_vm1, %v1344_v40  ;;  %v8411_v57 = vpop.permute.xlu0 %1285  ;;  %13078 = vst [vmem:[#allocation19_spill] sm:$0xff] %v8519_v47  ;;  %v1318_v52 = vrot.slane %v8353_v10, %v8162_v18 }
  0xb1   : > { %7677 = vmatmul.mubr.msk.f32.vlgmr.msra.gmra.mxu0 %vm489_vm2, %v8297_v6 }
  0xb2   : > { %v1284_v58 = vpop.permute.xlu1 %1283  ;;  %7654 = vmatmul.mubr.msk.f32.gmra.mxu1 %vm489_vm2, %v8210_v38  ;;  %1167 = vmatprep.mubr.f32.mxu0 %v12822_v0 }
  0xb3   : > { %781 = vmatprep.mubr.f32.mxu1 %v12822_v0  ;;  %7689 = vmatpush1.msk.msra.mxu0 %vm502_vm1, %v1343_v54  ;;  %v1294_v60 = vsel %vm1291_vm4, %v1284_v58, %v8411_v57  ;;  %v1295_v32 = vsel %vm1291_vm4, %v8339_v26, %v1284_v58  ;;  %v1826_v58 = vrot.slane %v8459_v44, %v8181_v27 }
  0xb4   : > { %v1348_v61 = vmul.f32 %v1326_v55, %v1294_v60  ;;  %v8430_v63 = vpop.permute.xlu0 %1779  ;;  %v1347_v37 = vmul.f32 %v1322_v50, %v1295_v32  ;;  %v8568_v50 = vld [vmem:[%s12811_s5 + $0x20] sm:$0xff]  ;;  %v1314_v32 = vrot.slane %v8353_v10, %v8167_v19 }
  0xb5   : > { %7678 = vmatmul.mubr.msk.f32.gmra.mxu0 %vm489_vm2, %v8321_v17 }
  0xb6   : > { %7655 = vmatmul.mubr.msk.f32.gmra.mxu1 %vm489_vm2, %v8229_v43  ;;  %1173 = vmatprep.mubr.f32.mxu0 %v12822_v0  ;;  %v8428_v62 = vpop.permute.xlu1 %1781 }
  0xb7   : > { %787 = vmatprep.mubr.f32.mxu1 %v12822_v0  ;;  %7700 = vmatprep.subr.msk.mxu0 %vm502_vm1, %v1348_v61 }
  0xb8   : > { %v8466_v29 = vpop.permute.xlu0 %1777 }
  0xb9   : > { %7679 = vmatmul.mubr.msk.f32.gmra.mxu0 %vm489_vm2, %v8347_v28 }
  0xba   : > { %7656 = vmatmul.mubr.msk.f32.gmra.mxu1 %vm489_vm2, %v8253_v49  ;;  %1179 = vmatprep.mubr.f32.mxu0 %v12822_v0  ;;  %v1776_v22 = vpop.permute.xlu1 %1775 }
  0xbb   : > { %858 = vmatprep.mubr.f32.mxu1 %v12822_v0  ;;  %v1798_v33 = vsel %vm1791_vm5, %v1776_v22, %v8466_v29 }
  0xbc   : > { %v1844_v39 = vmul.f32 %v1810_v23, %v1798_v33  ;;  %v8501_v40 = vpop.permute.xlu0 %1789  ;;  %v2285_v23 = vrot.slane %v8568_v50, %v8142_v12  ;;  %v1297_v33 = vsel %vm1291_vm4, %v8359_v31, %v8332_v24 }
  0xbd   : > { %7680 = vmatmul.mubr.msk.f32.gmra.mxu0 %vm489_vm2, %v8380_v15  ;;  %v1799_v55 = vsel %vm1791_vm5, %v8501_v40, %v1776_v22  ;;  %v2281_v22 = vrot.slane %v8568_v50, %v8147_v13  ;;  %v1345_v31 = vmul.f32 %v1314_v32, %v1297_v33 }
  0xbe   : > { %7659 = vmatmul.mubr.msk.f32.vlgmr.msra.gmra.mxu1 %vm489_vm2, %v8190_v30  ;;  %1451 = vmatprep.mubr.f32.mxu0 %v12822_v0  ;;  %v8497_v30 = vld [vmem:[%s12807_s1 + $0x48] sm:$0xff]  ;;  %v8514_v42 = vpop.permute.xlu1 %1787 }
  0xbf   : > { %7670 = vmatpush1.msk.msra.mxu1 %vm502_vm1, %v407_v59  ;;  %864 = vmatprep.mubr.f32.mxu1 %v12822_v0  ;;  %v2310_v59 = vcombine.low %v2281_v22, %v2285_v23  ;;  %v1834_v22 = vrot.slane %v8459_v44, %v8238_v46  ;;  %v1792_v23 = vsel %vm1791_vm5, %v8514_v42, %v8501_v40 }
  0xc0   : > { %7681 = vmatprep.subr.msk.mxu1 %vm502_vm1, %v412_v35  ;;  %v8537_v54 = vpop.permute.xlu0 %1785  ;;  %v1334_v35 = vrot.slane %v8353_v10, %v8238_v46 }
  0xc1   : > { %7690 = vmatmul.mubr.msk.f32.vlgmr.msra.gmra.mxu0 %vm489_vm2, %v8484_v36 }
  0xc2   : > { %7701 = vmatpush1.msk.msra.mxu0 %vm502_vm1, %v1347_v37  ;;  %7660 = vmatmul.mubr.msk.f32.gmra.mxu1 %vm489_vm2, %v8210_v38  ;;  %v8512_v38 = vld [vmem:[%s12807_s1 + $0x50] sm:$0xff]  ;;  %v1292_v37 = vsel %vm1291_vm4, %v8400_v53, %v8392_v41  ;;  %v8618_v41 = vld [vmem:[%s12807_s1 + $0x60] sm:$0xff] }
  0xc3   : > { %1457 = vmatprep.mubr.f32.mxu0 %v12822_v0  ;;  %870 = vmatprep.mubr.f32.mxu1 %v12822_v0 }
  0xc4   : > { %7713 = vmatprep.subr.msk.mxu0 %vm502_vm1, %v1844_v39  ;;  %v1822_v39 = vrot.slane %v8459_v44, %v8235_v45 }
  0xc5   : > { %7691 = vmatmul.mubr.msk.f32.gmra.mxu0 %vm489_vm2, %v8497_v30 }
  0xc6   : > { %7661 = vmatmul.mubr.msk.f32.gmra.mxu1 %vm489_vm2, %v8229_v43  ;;  %1463 = vmatprep.mubr.f32.mxu0 %v12822_v0  ;;  %v356_v43 = vsel %vm354_vm3, %v8303_v8, %v8288_v3  ;;  %v1296_v3 = vsel %vm1291_vm4, %v8332_v24, %v8339_v26  ;;  %v1806_v8 = vrot.slane %v8459_v44, %v8147_v13 }
  0xc7   : > { %876 = vmatprep.mubr.f32.mxu1 %v12822_v0  ;;  %v411_v60 = vmul.f32 %v8519_v47, %v356_v43  ;;  %v1346_v61 = vmul.f32 %v1318_v52, %v1296_v3  ;;  %v2318_v24 = vmul.f32 %v2310_v59, %v8001_v1  ;;  %v1350_v52 = vmul.f32 %v1334_v35, %v1292_v37  ;;  %v8722_v59 = vld [vmem:[%s12811_s5 + $0x28] sm:$0xff]  ;;  %v8740_v37 = vld [vmem:[%s12807_s1 + $0x80] sm:$0xff] }
  0xc8   : > { %v1843_v16 = vmul.f32 %v1806_v8, %v1799_v55  ;;  %v2297_v8 = vrot.slane %v8568_v50, %v8235_v45  ;;  %v1850_v35 = vmul.f32 %v1834_v22, %v1792_v23 }
  0xc9   : > { %7692 = vmatmul.mubr.msk.f32.gmra.mxu0 %vm489_vm2, %v8512_v38  ;;  %v2326_v3 = vcombine.high %v2318_v24, %v2318_v24 }
  0xca   : > { %7662 = vmatmul.mubr.msk.f32.gmra.mxu1 %vm489_vm2, %v8253_v49  ;;  %1469 = vmatprep.mubr.f32.mxu0 %v12822_v0  ;;  %v1784_v49 = vpop.permute.xlu1 %1783 }
  0xcb   : > { %1072 = vmatprep.mubr.f32.mxu1 %v12822_v0  ;;  %v1794_v26 = vsel %vm1791_vm5, %v1784_v49, %v8537_v54  ;;  %v1795_v43 = vsel %vm1791_vm5, %v8428_v62, %v1784_v49  ;;  %v2301_v49 = vrot.slane %v8568_v50, %v8181_v27 }
  0xcc   : > { %v1848_v21 = vmul.f32 %v1826_v58, %v1794_v26  ;;  %v1847_v1 = vmul.f32 %v1822_v39, %v1795_v43  ;;  %v1330_v58 = vrot.slane %v8353_v10, %v8335_v25  ;;  %v8667_v10 = vld [vmem:[%s12807_s1 + $0x78] sm:$0xff]  ;;  %v1796_v26 = vsel %vm1791_vm5, %v8430_v63, %v8428_v62 }
  0xcd   : > { %7693 = vmatmul.mubr.msk.f32.gmra.mxu0 %vm489_vm2, %v8535_v48  ;;  %v2312_v55 = vcombine.low %v2297_v8, %v2301_v49  ;;  %v1830_v8 = vrot.slane %v8459_v44, %v8335_v25 }
  0xce   : > { %7671 = vmatmul.mubr.msk.f32.vlgmr.msra.gmra.mxu1 %vm489_vm2, %v8297_v6  ;;  %1629 = vmatprep.mubr.f32.mxu0 %v12822_v0 }
  0xcf   : > { %7682 = vmatpush1.msk.msra.mxu1 %vm502_vm1, %v411_v60  ;;  %1078 = vmatprep.mubr.f32.mxu1 %v12822_v0  ;;  %v1818_v60 = vrot.slane %v8459_v44, %v8162_v18 }
  0xd0   : > { %7694 = vmatprep.subr.msk.mxu1 %vm502_vm1, %v1346_v61  ;;  %v8698_v61 = vpop.permute.xlu0 %2752 }
  0xd1   : > { %7702 = vmatmul.mubr.msk.f32.vlgmr.msra.gmra.mxu0 %vm489_vm2, %v8484_v36 }
  0xd2   : > { %7672 = vmatmul.mubr.msk.f32.gmra.mxu1 %vm489_vm2, %v8321_v17  ;;  %1635 = vmatprep.mubr.f32.mxu0 %v12822_v0 }
  0xd3   : > { %1084 = vmatprep.mubr.f32.mxu1 %v12822_v0  ;;  %7714 = vmatpush1.msk.msra.mxu0 %vm502_vm1, %v1843_v16  ;;  %v1814_v16 = vrot.slane %v8459_v44, %v8167_v19  ;;  %v2777_v44 = vrot.slane %v8722_v59, %v8147_v13 }
  0xd4   : > { %7725 = vmatprep.subr.msk.mxu0 %vm502_vm1, %v1848_v21  ;;  %v1797_v21 = vsel %vm1791_vm5, %v8466_v29, %v8430_v63  ;;  %v2781_v29 = vrot.slane %v8722_v59, %v8142_v12  ;;  %v8727_v32 = vpop.permute.xlu0 %2750 }
  0xd5   : > { %7703 = vmatmul.mubr.msk.f32.gmra.mxu0 %vm489_vm2, %v8497_v30  ;;  %v1845_v33 = vmul.f32 %v1814_v16, %v1797_v21  ;;  %v8847_v21 = vld [vmem:[%s12811_s5 + $0x30] sm:$0xff] }
  0xd6   : > { %7673 = vmatmul.mubr.msk.f32.gmra.mxu1 %vm489_vm2, %v8347_v28  ;;  %1641 = vmatprep.mubr.f32.mxu0 %v12822_v0  ;;  %v3281_v23 = vrot.slane %v8847_v21, %v8142_v12 }
  0xd7   : > { %1090 = vmatprep.mubr.f32.mxu1 %v12822_v0 }
  0xd8   : > { %v8761_v43 = vpop.permute.xlu0 %2746 }
  0xd9   : > { %7704 = vmatmul.mubr.msk.f32.gmra.mxu0 %vm489_vm2, %v8512_v38 }
  0xda   : > { %7674 = vmatmul.mubr.msk.f32.gmra.mxu1 %vm489_vm2, %v8380_v15  ;;  %1647 = vmatprep.mubr.f32.mxu0 %v12822_v0 }
  0xdb   : > { %1250 = vmatprep.mubr.f32.mxu1 %v12822_v0 }
  0xdc   : > { %v8794_v49 = vpop.permute.xlu0 %2758 }
  0xdd   : > { %7705 = vmatmul.mubr.msk.f32.gmra.mxu0 %vm489_vm2, %v8535_v48 }
  0xde   : > { %7683 = vmatmul.mubr.msk.f32.vlgmr.msra.gmra.mxu1 %vm489_vm2, %v8297_v6  ;;  %1951 = vmatprep.mubr.f32.mxu0 %v12822_v0  ;;  %v8631_v6 = vld [vmem:[%s12807_s1 + $0x68] sm:$0xff] }
  0xdf   : > { %7695 = vmatpush1.msk.msra.mxu1 %vm502_vm1, %v1345_v31  ;;  %1256 = vmatprep.mubr.f32.mxu1 %v12822_v0  ;;  %v8757_v31 = vld [vmem:[%s12807_s1 + $0x88] sm:$0xff] }
  0xe0   : > { %7706 = vmatprep.subr.msk.mxu1 %vm502_vm1, %v1350_v52 }
  0xe1   : > { %7715 = vmatmul.mubr.msk.f32.vlgmr.msra.gmra.mxu0 %vm489_vm2, %v8618_v41 }
  0xe2   : > { %7726 = vmatpush1.msk.msra.mxu0 %vm502_vm1, %v1847_v1  ;;  %7684 = vmatmul.mubr.msk.f32.gmra.mxu1 %vm489_vm2, %v8321_v17  ;;  %v8648_v17 = vld [vmem:[%s12807_s1 + $0x70] sm:$0xff] }
  0xe3   : > { %1957 = vmatprep.mubr.f32.mxu0 %v12822_v0  ;;  %1262 = vmatprep.mubr.f32.mxu1 %v12822_v0 }
  0xe4   : > { %7738 = vmatprep.subr.msk.mxu0 %vm502_vm1, %v2326_v3 }
  0xe5   : > { %7716 = vmatmul.mubr.msk.f32.gmra.mxu0 %vm489_vm2, %v8631_v6 }
  0xe6   : > { %7685 = vmatmul.mubr.msk.f32.gmra.mxu1 %vm489_vm2, %v8347_v28  ;;  %1963 = vmatprep.mubr.f32.mxu0 %v12822_v0  ;;  %v1293_v28 = vsel %vm1291_vm4, %v8411_v57, %v8400_v53  ;;  %v2320_v53 = vmul.f32 %v2312_v55, %v8025_v7  ;;  %v8696_v7 = vpop.permute.xlu1 %2754 }
  0xe7   : > { %1268 = vmatprep.mubr.f32.mxu1 %v12822_v0  ;;  %v1349_v57 = vmul.f32 %v1330_v58, %v1293_v28 }
  0xe8   : > { %v2328_v62 = vcombine.high %v2320_v53, %v2320_v53 }
  0xe9   : > { %7717 = vmatmul.mubr.msk.f32.gmra.mxu0 %vm489_vm2, %v8648_v17 }
  0xea   : > { %7686 = vmatmul.mubr.msk.f32.gmra.mxu1 %vm489_vm2, %v8380_v15  ;;  %1969 = vmatprep.mubr.f32.mxu0 %v12822_v0  ;;  %v1846_v15 = vmul.f32 %v1818_v60, %v1796_v26  ;;  %v2749_v63 = vpop.permute.xlu1 %2748 }
  0xeb   : > { %1540 = vmatprep.mubr.f32.mxu1 %v12822_v0  ;;  %v2768_v40 = vsel %vm2762_vm6, %v2749_v63, %v8727_v32 }
  0xec   : > { %v2815_v39 = vmul.f32 %v2781_v29, %v2768_v40 }
  0xed   : > { %7718 = vmatmul.mubr.msk.f32.gmra.mxu0 %vm489_vm2, %v8667_v10 }
  0xee   : > { %7696 = vmatmul.mubr.msk.f32.vlgmr.msra.gmra.mxu1 %vm489_vm2, %v8484_v36  ;;  %2129 = vmatprep.mubr.f32.mxu0 %v12822_v0  ;;  %v8774_v1 = vpop.permute.xlu1 %2760 }
  0xef   : > { %7707 = vmatpush1.msk.msra.mxu1 %vm502_vm1, %v1349_v57  ;;  %1546 = vmatprep.mubr.f32.mxu1 %v12822_v0  ;;  %v2309_v57 = vrot.slane %v8568_v50, %v8238_v46 }
  0xf0   : > { %7719 = vmatprep.subr.msk.mxu1 %vm502_vm1, %v1846_v15 }
  0xf1   : > { %7727 = vmatmul.mubr.msk.f32.vlgmr.msra.gmra.mxu0 %vm489_vm2, %v8618_v41 }
  0xf2   : > { %7697 = vmatmul.mubr.msk.f32.gmra.mxu1 %vm489_vm2, %v8497_v30  ;;  %2135 = vmatprep.mubr.f32.mxu0 %v12822_v0  ;;  %v2757_v55 = vpop.permute.xlu1 %2756 }
  0xf3   : > { %1552 = vmatprep.mubr.f32.mxu1 %v12822_v0  ;;  %7739 = vmatpush1.msk.msra.mxu0 %vm502_vm1, %v2318_v24  ;;  %v2289_v24 = vrot.slane %v8568_v50, %v8167_v19  ;;  %v2764_v28 = vsel %vm2762_vm6, %v2757_v55, %v8794_v49 }
  0xf4   : > { %7750 = vmatprep.subr.msk.mxu0 %vm502_vm1, %v2328_v62  ;;  %v8834_v62 = vpop.permute.xlu0 %3252 }
  0xf5   : > { %7728 = vmatmul.mubr.msk.f32.gmra.mxu0 %vm489_vm2, %v8631_v6 }
  0xf6   : > { %7698 = vmatmul.mubr.msk.f32.gmra.mxu1 %vm489_vm2, %v8512_v38  ;;  %2141 = vmatprep.mubr.f32.mxu0 %v12822_v0 }
  0xf7   : > { %1558 = vmatprep.mubr.f32.mxu1 %v12822_v0 }
  0xf9   : > { %7729 = vmatmul.mubr.msk.f32.gmra.mxu0 %vm489_vm2, %v8648_v17 }
  0xfa   : > { %7699 = vmatmul.mubr.msk.f32.gmra.mxu1 %vm489_vm2, %v8535_v48  ;;  %2147 = vmatprep.mubr.f32.mxu0 %v12822_v0 }
  0xfb   : > { %1718 = vmatprep.mubr.f32.mxu1 %v12822_v0 }
  0xfd   : > { %7730 = vmatmul.mubr.msk.f32.gmra.mxu0 %vm489_vm2, %v8667_v10 }
  0xfe   : > { %7708 = vmatmul.mubr.msk.f32.vlgmr.msra.gmra.mxu1 %vm489_vm2, %v8484_v36  ;;  %2422 = vmatprep.mubr.f32.mxu0 %v12822_v0  ;;  %v2293_v36 = vrot.slane %v8568_v50, %v8162_v18 }
  0xff   : > { %7720 = vmatpush1.msk.msra.mxu1 %vm502_vm1, %v1845_v33  ;;  %1724 = vmatprep.mubr.f32.mxu1 %v12822_v0  ;;  %v2765_v33 = vsel %vm2762_vm6, %v8696_v7, %v2757_v55 }
 0x100   : > { %7731 = vmatprep.subr.msk.mxu1 %vm502_vm1, %v1850_v35  ;;  %v2311_v52 = vcombine.low %v2289_v24, %v2293_v36  ;;  %v8870_v35 = vld [vmem:[%s12807_s1 + $0xa0] sm:$0xff] }
 0x101   : > { %7740 = vmatmul.mubr.msk.f32.vlgmr.msra.gmra.mxu0 %vm489_vm2, %v8740_v37 }
 0x102   : > { %7709 = vmatmul.mubr.msk.f32.gmra.mxu1 %vm489_vm2, %v8497_v30  ;;  %2428 = vmatprep.mubr.f32.mxu0 %v12822_v0  ;;  %v8772_v30 = vld [vmem:[%s12807_s1 + $0x90] sm:$0xff]  ;;  %v2319_v3 = vmul.f32 %v2311_v52, %v8015_v5  ;;  %v8792_v5 = vld [vmem:[%s12807_s1 + $0x98] sm:$0xff] }
 0x103   : > { %1730 = vmatprep.mubr.f32.mxu1 %v12822_v0  ;;  %7751 = vmatpush1.msk.msra.mxu0 %vm502_vm1, %v2320_v53  ;;  %v2305_v53 = vrot.slane %v8568_v50, %v8335_v25  ;;  %v8832_v50 = vpop.permute.xlu1 %3254 }
 0x104   : > { %7763 = vmatprep.subr.msk.mxu0 %vm502_vm1, %v2815_v39 }
 0x105   : > { %7741 = vmatmul.mubr.msk.f32.gmra.mxu0 %vm489_vm2, %v8757_v31  ;;  %v2313_v15 = vcombine.low %v2305_v53, %v2309_v57  ;;  %v2767_v53 = vsel %vm2762_vm6, %v8727_v32, %v8698_v61  ;;  %v2805_v57 = vrot.slane %v8722_v59, %v8238_v46 }
 0x106   : > { %7710 = vmatmul.mubr.msk.f32.gmra.mxu1 %vm489_vm2, %v8512_v38  ;;  %2434 = vmatprep.mubr.f32.mxu0 %v12822_v0  ;;  %v1793_v38 = vsel %vm1791_vm5, %v8537_v54, %v8514_v42  ;;  %v2769_v42 = vsel %vm2762_vm6, %v8761_v43, %v2749_v63  ;;  %v2327_v54 = vcombine.high %v2319_v3, %v2319_v3  ;;  %v8854_v63 = vpop.permute.xlu0 %3250 }
 0x107   : > { %1736 = vmatprep.mubr.f32.mxu1 %v12822_v0  ;;  %v1849_v58 = vmul.f32 %v1830_v8, %v1793_v38  ;;  %v2814_v60 = vmul.f32 %v2777_v44, %v2769_v42  ;;  %v2321_v16 = vmul.f32 %v2313_v15, %v8003_v2  ;;  %v2793_v2 = vrot.slane %v8722_v59, %v8235_v45  ;;  %v3249_v22 = vpop.permute.xlu1 %3248 }
 0x108   : > { %v3268_v40 = vsel %vm3262_vm7, %v3249_v22, %v8854_v63  ;;  %v2766_v38 = vsel %vm2762_vm6, %v8698_v61, %v8696_v7  ;;  %v3277_v44 = vrot.slane %v8847_v21, %v8147_v13  ;;  %v3297_v42 = vrot.slane %v8847_v21, %v8181_v27 }
 0x109   : > { %7742 = vmatmul.mubr.msk.f32.gmra.mxu0 %vm489_vm2, %v8772_v30  ;;  %v2329_v29 = vcombine.high %v2321_v16, %v2321_v16  ;;  %v2818_v39 = vmul.f32 %v2793_v2, %v2765_v33  ;;  %v3315_v24 = vmul.f32 %v3281_v23, %v3268_v40  ;;  %v2770_v15 = vsel %vm2762_vm6, %v8774_v1, %v8761_v43  ;;  %v9002_v40 = vld [vmem:[%s12807_s1 + $0xc0] sm:$0xff] }
 0x10a   : > { %7711 = vmatmul.mubr.msk.f32.gmra.mxu1 %vm489_vm2, %v8535_v48  ;;  %2440 = vmatprep.mubr.f32.mxu0 %v12822_v0  ;;  %v2797_v48 = vrot.slane %v8722_v59, %v8181_v27  ;;  %v8887_v36 = vpop.permute.xlu0 %3246  ;;  %v3293_v61 = vrot.slane %v8847_v21, %v8235_v45  ;;  %v2821_v33 = vmul.f32 %v2805_v57, %v2770_v15 }
 0x10b   : > { %2040 = vmatprep.mubr.f32.mxu1 %v12822_v0  ;;  %v8900_v52 = vpop.permute.xlu1 %3260  ;;  %v3269_v55 = vsel %vm3262_vm7, %v8887_v36, %v3249_v22 }
 0x10c   : > { %v2819_v26 = vmul.f32 %v2797_v48, %v2764_v28 }
 0x10d   : > { %7743 = vmatmul.mubr.msk.f32.gmra.mxu0 %vm489_vm2, %v8792_v5 }
 0x10e   : > { %7721 = vmatmul.mubr.msk.f32.vlgmr.msra.gmra.mxu1 %vm489_vm2, %v8618_v41  ;;  %2600 = vmatprep.mubr.f32.mxu0 %v12822_v0  ;;  %v8915_v8 = vpop.permute.xlu0 %3258 }
 0x10f   : > { %7732 = vmatpush1.msk.msra.mxu1 %vm502_vm1, %v1849_v58  ;;  %2046 = vmatprep.mubr.f32.mxu1 %v12822_v0 }
 0x110   : > { %7744 = vmatprep.subr.msk.mxu1 %vm502_vm1, %v2327_v54  ;;  %v3314_v54 = vmul.f32 %v3277_v44, %v3269_v55 }
 0x111   : > { %7752 = vmatmul.mubr.msk.f32.vlgmr.msra.gmra.mxu0 %vm489_vm2, %v8740_v37 }
 0x112   : > { %7722 = vmatmul.mubr.msk.f32.gmra.mxu1 %vm489_vm2, %v8631_v6  ;;  %2606 = vmatprep.mubr.f32.mxu0 %v12822_v0 }
 0x113   : > { %2052 = vmatprep.mubr.f32.mxu1 %v12822_v0  ;;  %7764 = vmatpush1.msk.msra.mxu0 %vm502_vm1, %v2814_v60  ;;  %v8955_v60 = vpop.permute.xlu0 %3752 }
 0x114   : > { %7775 = vmatprep.subr.msk.mxu0 %vm502_vm1, %v2819_v26  ;;  %v2785_v26 = vrot.slane %v8722_v59, %v8167_v19 }
 0x115   : > { %7753 = vmatmul.mubr.msk.f32.gmra.mxu0 %vm489_vm2, %v8757_v31 }
 0x116   : > { %7723 = vmatmul.mubr.msk.f32.gmra.mxu1 %vm489_vm2, %v8648_v17  ;;  %2612 = vmatprep.mubr.f32.mxu0 %v12822_v0  ;;  %v2816_v23 = vmul.f32 %v2785_v26, %v2767_v53  ;;  %v4747_v53 = vld [vmem:[%s12808_s2 + $0x8] sm:$0xff] }
 0x117   : > { %2058 = vmatprep.mubr.f32.mxu1 %v12822_v0  ;;  %v8986_v22 = vpop.permute.xlu0 %3750 }
 0x119   : > { %7754 = vmatmul.mubr.msk.f32.gmra.mxu0 %vm489_vm2, %v8772_v30 }
 0x11a   : > { %7724 = vmatmul.mubr.msk.f32.gmra.mxu1 %vm489_vm2, %v8667_v10  ;;  %2618 = vmatprep.mubr.f32.mxu0 %v12822_v0 }
 0x11b   : > { %2218 = vmatprep.mubr.f32.mxu1 %v12822_v0  ;;  %v9022_v44 = vpop.permute.xlu0 %3746 }
 0x11d   : > { %7755 = vmatmul.mubr.msk.f32.gmra.mxu0 %vm489_vm2, %v8792_v5 }
 0x11e   : > { %7733 = vmatmul.mubr.msk.f32.vlgmr.msra.gmra.mxu1 %vm489_vm2, %v8618_v41  ;;  %2922 = vmatprep.mubr.f32.mxu0 %v12822_v0  ;;  %v8883_v41 = vld [vmem:[%s12807_s1 + $0xa8] sm:$0xff] }
 0x11f   : > { %2224 = vmatprep.mubr.f32.mxu1 %v12822_v0  ;;  %7745 = vmatpush1.msk.msra.mxu1 %vm502_vm1, %v2319_v3  ;;  %v2789_v3 = vrot.slane %v8722_v59, %v8162_v18 }
 0x120   : > { %7756 = vmatprep.subr.msk.mxu1 %vm502_vm1, %v2329_v29 }
 0x121   : > { %7765 = vmatmul.mubr.msk.f32.vlgmr.msra.gmra.mxu0 %vm489_vm2, %v8870_v35  ;;  %v2817_v48 = vmul.f32 %v2789_v3, %v2766_v38  ;;  %v7945_v3 = vmov 0   ;;  %v9018_v38 = vld [vmem:[%s12807_s1 + $0xc8] sm:$0xff] }
 0x122   : > { %7776 = vmatpush1.msk.msra.mxu0 %vm502_vm1, %v2818_v39  ;;  %7734 = vmatmul.mubr.msk.f32.gmra.mxu1 %vm489_vm2, %v8631_v6  ;;  %v8898_v6 = vld [vmem:[%s12807_s1 + $0xb0] sm:$0xff] }
 0x123   : > { %2928 = vmatprep.mubr.f32.mxu0 %v12822_v0  ;;  %2230 = vmatprep.mubr.f32.mxu1 %v12822_v0 }
 0x124   : > { %7788 = vmatprep.subr.msk.mxu0 %vm502_vm1, %v3315_v24  ;;  %7895 = vset.pattern.permute.xlu0 %v7945_v3 }
 0x125   : > { %7766 = vmatmul.mubr.msk.f32.gmra.mxu0 %vm489_vm2, %v8883_v41  ;;  %7896 = vset.pattern.permute.xlu1 %v7945_v3 }
 0x126   : > { %7735 = vmatmul.mubr.msk.f32.gmra.mxu1 %vm489_vm2, %v8648_v17  ;;  %2934 = vmatprep.mubr.f32.mxu0 %v12822_v0  ;;  %v8913_v17 = vld [vmem:[%s12807_s1 + $0xb8] sm:$0xff] }
 0x127   : > { %2236 = vmatprep.mubr.f32.mxu1 %v12822_v0 }
 0x129   : > { %7767 = vmatmul.mubr.msk.f32.gmra.mxu0 %vm489_vm2, %v8898_v6 }
 0x12a   : > { %7736 = vmatmul.mubr.msk.f32.gmra.mxu1 %vm489_vm2, %v8667_v10  ;;  %2940 = vmatprep.mubr.f32.mxu0 %v12822_v0  ;;  %v3257_v10 = vpop.permute.xlu1 %3256 }
 0x12b   : > { %2511 = vmatprep.mubr.f32.mxu1 %v12822_v0  ;;  %v3264_v7 = vsel %vm3262_vm7, %v3257_v10, %v8915_v8  ;;  %v3265_v43 = vsel %vm3262_vm7, %v8832_v50, %v3257_v10  ;;  %v4746_v10 = vld [vmem:[%s12808_s2] sm:$0xff] }
 0x12c   : > { %v3319_v58 = vmul.f32 %v3297_v42, %v3264_v7  ;;  %v3318_v39 = vmul.f32 %v3293_v61, %v3265_v43  ;;  %v4748_v42 = vld [vmem:[%s12808_s2 + $0x10] sm:$0xff]  ;;  %v2801_v7 = vrot.slane %v8722_v59, %v8335_v25  ;;  %v9060_v59 = vld [vmem:[%s12807_s1 + $0xd8] sm:$0xff] }
 0x12d   : > { %7768 = vmatmul.mubr.msk.f32.gmra.mxu0 %vm489_vm2, %v8913_v17  ;;  %4762 = vperm.xlu1 %7896, %v4748_v42   ;;  %v3305_v42 = vrot.slane %v8847_v21, %v8238_v46 }
 0x12e   : > { %7746 = vmatmul.mubr.msk.f32.vlgmr.msra.gmra.mxu1 %vm489_vm2, %v8740_v37  ;;  %3100 = vmatprep.mubr.f32.mxu0 %v12822_v0  ;;  %v8953_v28 = vpop.permute.xlu1 %3754 }
 0x12f   : > { %7757 = vmatpush1.msk.msra.mxu1 %vm502_vm1, %v2321_v16  ;;  %2517 = vmatprep.mubr.f32.mxu1 %v12822_v0  ;;  %v8979_v16 = vld [vmem:[%s12811_s5 + $0x38] sm:$0xff] }
 0x130   : > { %7769 = vmatprep.subr.msk.mxu1 %vm502_vm1, %v2817_v48  ;;  %v3781_v2 = vrot.slane %v8979_v16, %v8142_v12  ;;  %v3289_v48 = vrot.slane %v8847_v21, %v8162_v18  ;;  %v3797_v26 = vrot.slane %v8979_v16, %v8181_v27 }
 0x131   : > { %7777 = vmatmul.mubr.msk.f32.vlgmr.msra.gmra.mxu0 %vm489_vm2, %v8870_v35  ;;  %4757 = vperm.xlu1 %7896, %v4747_v53  }
 0x132   : > { %7747 = vmatmul.mubr.msk.f32.gmra.mxu1 %vm489_vm2, %v8757_v31  ;;  %3106 = vmatprep.mubr.f32.mxu0 %v12822_v0  ;;  %v3749_v32 = vpop.permute.xlu1 %3748 }
 0x133   : > { %2523 = vmatprep.mubr.f32.mxu1 %v12822_v0  ;;  %7789 = vmatpush1.msk.msra.mxu0 %vm502_vm1, %v3314_v54  ;;  %v3768_v29 = vsel %vm3762_vm8, %v3749_v32, %v8986_v22  ;;  %v9062_v54 = vpop.permute.xlu0 %3758 }
 0x134   : > { %7800 = vmatprep.subr.msk.mxu0 %vm502_vm1, %v3319_v58  ;;  %v3815_v24 = vmul.f32 %v3781_v2, %v3768_v29  ;;  %v3769_v58 = vsel %vm3762_vm8, %v9022_v44, %v3749_v32 }
 0x135   : > { %7778 = vmatmul.mubr.msk.f32.gmra.mxu0 %vm489_vm2, %v8883_v41 }
 0x136   : > { %7748 = vmatmul.mubr.msk.f32.gmra.mxu1 %vm489_vm2, %v8772_v30  ;;  %3112 = vmatprep.mubr.f32.mxu0 %v12822_v0  ;;  %v9038_v55 = vpop.permute.xlu1 %3760 }
 0x137   : > { %2529 = vmatprep.mubr.f32.mxu1 %v12822_v0 }
 0x139   : > { %7779 = vmatmul.mubr.msk.f32.gmra.mxu0 %vm489_vm2, %v8898_v6 }
 0x13a   : > { %7749 = vmatmul.mubr.msk.f32.gmra.mxu1 %vm489_vm2, %v8792_v5  ;;  %3118 = vmatprep.mubr.f32.mxu0 %v12822_v0 }
 0x13b   : > { %2689 = vmatprep.mubr.f32.mxu1 %v12822_v0 }
 0x13d   : > { %7780 = vmatmul.mubr.msk.f32.gmra.mxu0 %vm489_vm2, %v8913_v17 }
 0x13e   : > { %7758 = vmatmul.mubr.msk.f32.vlgmr.msra.gmra.mxu1 %vm489_vm2, %v8740_v37  ;;  %3422 = vmatprep.mubr.f32.mxu0 %v12822_v0  ;;  %v4749_v37 = vld [vmem:[%s12808_s2 + $0x18] sm:$0xff] }
 0x13f   : > { %7770 = vmatpush1.msk.msra.mxu1 %vm502_vm1, %v2816_v23  ;;  %2695 = vmatprep.mubr.f32.mxu1 %v12822_v0 }
 0x140   : > { %7781 = vmatprep.subr.msk.mxu1 %vm502_vm1, %v2821_v33  ;;  %4767 = vperm.xlu0 %7895, %v4749_v37   ;;  %v9102_v33 = vpop.permute.xlu0 %4252  ;;  %v3285_v37 = vrot.slane %v8847_v21, %v8167_v19 }
 0x141   : > { %7790 = vmatmul.mubr.msk.f32.vlgmr.msra.gmra.mxu0 %vm489_vm2, %v9002_v40 }
 0x142   : > { %7801 = vmatpush1.msk.msra.mxu0 %vm502_vm1, %v3318_v39  ;;  %7759 = vmatmul.mubr.msk.f32.gmra.mxu1 %vm489_vm2, %v8757_v31  ;;  %v9036_v31 = vld [vmem:[%s12807_s1 + $0xd0] sm:$0xff] }
 0x143   : > { %3428 = vmatprep.mubr.f32.mxu0 %v12822_v0  ;;  %2701 = vmatprep.mubr.f32.mxu1 %v12822_v0 }
 0x144   : > { %7813 = vmatprep.subr.msk.mxu0 %vm502_vm1, %v3815_v24  ;;  %4752 = vperm.xlu0 %7895, %v4746_v10   ;;  %v3267_v10 = vsel %vm3262_vm7, %v8854_v63, %v8834_v62  ;;  %v9139_v63 = vpop.permute.xlu0 %4250 }
 0x145   : > { %7791 = vmatmul.mubr.msk.f32.gmra.mxu0 %vm489_vm2, %v9018_v38 }
 0x146   : > { %7760 = vmatmul.mubr.msk.f32.gmra.mxu1 %vm489_vm2, %v8772_v30  ;;  %3434 = vmatprep.mubr.f32.mxu0 %v12822_v0  ;;  %v2763_v30 = vsel %vm2762_vm6, %v8794_v49, %v8774_v1  ;;  %v3266_v1 = vsel %vm3262_vm7, %v8834_v62, %v8832_v50  ;;  %v3777_v49 = vrot.slane %v8979_v16, %v8147_v13  ;;  %v9137_v62 = vld [vmem:[%s12811_s5 + $0x40] sm:$0xff] }
 0x147   : > { %2707 = vmatprep.mubr.f32.mxu1 %v12822_v0  ;;  %v2820_v57 = vmul.f32 %v2801_v7, %v2763_v30  ;;  %v3317_v15 = vmul.f32 %v3289_v48, %v3266_v1  ;;  %v3270_v30 = vsel %vm3262_vm7, %v8900_v52, %v8887_v36  ;;  %v3793_v48 = vrot.slane %v8979_v16, %v8235_v45 }
 0x148   : > { %v3814_v32 = vmul.f32 %v3777_v49, %v3769_v58  ;;  %v4281_v36 = vrot.slane %v9137_v62, %v8142_v12  ;;  %v3316_v58 = vmul.f32 %v3285_v37, %v3267_v10  ;;  %v4297_v47 = vrot.slane %v9137_v62, %v8181_v27 }
 0x149   : > { %7792 = vmatmul.mubr.msk.f32.gmra.mxu0 %vm489_vm2, %v9036_v31 }
 0x14a   : > { %7761 = vmatmul.mubr.msk.f32.gmra.mxu1 %vm489_vm2, %v8792_v5  ;;  %3440 = vmatprep.mubr.f32.mxu0 %v12822_v0  ;;  %v3757_v5 = vpop.permute.xlu1 %3756 }
 0x14b   : > { %3011 = vmatprep.mubr.f32.mxu1 %v12822_v0  ;;  %v3764_v50 = vsel %vm3762_vm8, %v3757_v5, %v9062_v54 }
 0x14c   : > { %v3819_v23 = vmul.f32 %v3797_v26, %v3764_v50  ;;  %v3765_v26 = vsel %vm3762_vm8, %v8953_v28, %v3757_v5 }
 0x14d   : > { %7793 = vmatmul.mubr.msk.f32.gmra.mxu0 %vm489_vm2, %v9060_v59  ;;  %v3818_v5 = vmul.f32 %v3793_v48, %v3765_v26 }
 0x14e   : > { %v593_v61 = vpop.f32.mrf.mxu1  ;;  %7771 = vmatmul.mubr.msk.f32.vlgmr.msra.gmra.mxu1 %vm489_vm2, %v8870_v35  ;;  %3600 = vmatprep.mubr.f32.mxu0 %v12822_v0  ;;  %v9109_v24 = vpop.permute.xlu1 %4254 }
 0x14f   : > { %7782 = vmatpush1.msk.msra.mxu1 %vm502_vm1, %v2820_v57  ;;  %3017 = vmatprep.mubr.f32.mxu1 %v12822_v0  ;;  %v3321_v57 = vmul.f32 %v3305_v42, %v3270_v30  ;;  %v9183_v42 = vld [vmem:[%s12807_s1 + $0xe8] sm:$0xff] }
 0x150   : > { %7794 = vmatprep.subr.msk.mxu1 %vm502_vm1, %v3317_v15  ;;  %v595_v2 = vpop.f32.mrf.mxu1  ;;  %v9164_v15 = vld [vmem:[%s12807_s1 + $0xe0] sm:$0xff] }
 0x151   : > { %7802 = vmatmul.mubr.msk.f32.vlgmr.msra.gmra.mxu0 %vm489_vm2, %v9002_v40 }
 0x152   : > { %v599_v43 = vpop.f32.mrf.mxu1  ;;  %7772 = vmatmul.mubr.msk.f32.gmra.mxu1 %vm489_vm2, %v8883_v41  ;;  %3606 = vmatprep.mubr.f32.mxu0 %v12822_v0  ;;  %v4249_v49 = vpop.permute.xlu1 %4248 }
 0x153   : > { %3023 = vmatprep.mubr.f32.mxu1 %v12822_v0  ;;  %7814 = vmatpush1.msk.msra.mxu0 %vm502_vm1, %v3814_v32  ;;  %v4268_v53 = vsel %vm4262_vm9, %v4249_v49, %v9139_v63 }
 0x154   : > { %v9097_v29 = vpop.f32.mrf.mxu1  ;;  %7825 = vmatprep.subr.msk.mxu0 %vm502_vm1, %v3819_v23  ;;  %v4315_v23 = vmul.f32 %v4281_v36, %v4268_v53  ;;  %v9191_v36 = vpop.permute.xlu0 %4246 }
 0x155   : > { %7803 = vmatmul.mubr.msk.f32.gmra.mxu0 %vm489_vm2, %v9018_v38  ;;  %v4269_v14 = vsel %vm4262_vm9, %v9191_v36, %v4249_v49  ;;  %v13079_v49 = vmov 0.0  }
 0x156   : > { %v9104_v39 = vpop.f32.mrf.mxu1  ;;  %7773 = vmatmul.mubr.msk.f32.gmra.mxu1 %vm489_vm2, %v8898_v6  ;;  %3612 = vmatprep.mubr.f32.mxu0 %v12822_v0  ;;  %v9208_v53 = vpop.permute.xlu1 %4260 }
 0x157   : > { %3029 = vmatprep.mubr.f32.mxu1 %v12822_v0 }
 0x158   : > { %v9112_v3 = vpop.f32.mrf.mxu1 }
 0x159   : > { %7804 = vmatmul.mubr.msk.f32.gmra.mxu0 %vm489_vm2, %v9036_v31 }
 0x15a   : > { %v9124_v7 = vpop.f32.mrf.mxu1  ;;  %7774 = vmatmul.mubr.msk.f32.gmra.mxu1 %vm489_vm2, %v8913_v17  ;;  %3618 = vmatprep.mubr.f32.mxu0 %v12822_v0  ;;  %v4257_v9 = vpop.permute.xlu1 %4256 }
 0x15b   : > { %3189 = vmatprep.mubr.f32.mxu1 %v12822_v0 }
 0x15c   : > { %v9144_v1 = vpop.f32.mrf.mxu1 }
 0x15d   : > { %7805 = vmatmul.mubr.msk.f32.gmra.mxu0 %vm489_vm2, %v9060_v59 }
 0x15e   : > { %v9156_v50 = vpop.f32.mrf.mxu1  ;;  %7783 = vmatmul.mubr.msk.f32.vlgmr.msra.gmra.mxu1 %vm489_vm2, %v8870_v35  ;;  %3922 = vmatprep.mubr.f32.mxu0 %v12822_v0 }
 0x15f   : > { %7795 = vmatpush1.msk.msra.mxu1 %vm502_vm1, %v3316_v58  ;;  %3195 = vmatprep.mubr.f32.mxu1 %v12822_v0 }
 0x160   : > { %7806 = vmatprep.subr.msk.mxu1 %vm502_vm1, %v3321_v57  ;;  %v9169_v32 = vpop.f32.mrf.mxu1 }
 0x161   : > { %v985_v37 = vpop.f32.mrf.mxu0  ;;  %7815 = vmatmul.mubr.msk.f32.vlgmr.msra.gmra.mxu0 %vm489_vm2, %v9164_v15 }
 0x162   : > { %v9173_v35 = vadd.f32 %v985_v37, %v593_v61  ;;  %7826 = vmatpush1.msk.msra.mxu0 %vm502_vm1, %v3818_v5  ;;  %v9176_v10 = vpop.f32.mrf.mxu1  ;;  %7784 = vmatmul.mubr.msk.f32.gmra.mxu1 %vm489_vm2, %v8883_v41  ;;  %v3263_v37 = vsel %vm3262_vm7, %v8915_v8, %v8900_v52  ;;  %v3766_v52 = vsel %vm3762_vm8, %v8955_v60, %v8953_v28 }
 0x163   : > { %v987_v30 = vpop.f32.mrf.mxu0  ;;  %3928 = vmatprep.mubr.f32.mxu0 %v12822_v0  ;;  %3201 = vmatprep.mubr.f32.mxu1 %v12822_v0 }
 0x164   : > { %v9187_v48 = vadd.f32 %v987_v30, %v595_v2  ;;  %v9189_v61 = vpop.f32.mrf.mxu1  ;;  %7838 = vmatprep.subr.msk.mxu0 %vm502_vm1, %v4315_v23  ;;  %v9206_v2 = vld [vmem:[%s12807_s1 + $0xf0] sm:$0xff]  ;;  %v3789_v30 = vrot.slane %v8979_v16, %v8162_v18 }
 0x165   : > { %v991_v58 = vpop.f32.mrf.mxu0  ;;  %7816 = vmatmul.mubr.msk.f32.gmra.mxu0 %vm489_vm2, %v9183_v42 }
 0x166   : > { %v9196_v41 = vadd.f32 %v991_v58, %v599_v43  ;;  %v9198_v26 = vpop.f32.mrf.mxu1  ;;  %7785 = vmatmul.mubr.msk.f32.gmra.mxu1 %vm489_vm2, %v8898_v6  ;;  %3934 = vmatprep.mubr.f32.mxu0 %v12822_v0  ;;  %v3301_v6 = vrot.slane %v8847_v21, %v8335_v25  ;;  %v9237_v21 = vld [vmem:[%s12807_s1 + $0xf8] sm:$0xff] }
 0x167   : > { %v993_v57 = vpop.f32.mrf.mxu0  ;;  %3207 = vmatprep.mubr.f32.mxu1 %v12822_v0 }
 0x168   : > { %v9212_v43 = vadd.f32 %v993_v57, %v9097_v29  ;;  %v9214_v5 = vpop.f32.mrf.mxu1  ;;  %v9239_v57 = vpop.permute.xlu0 %4258  ;;  %v3320_v28 = vmul.f32 %v3301_v6, %v3263_v37 }
 0x169   : > { %v997_v23 = vpop.f32.mrf.mxu0  ;;  %7817 = vmatmul.mubr.msk.f32.gmra.mxu0 %vm489_vm2, %v9206_v2 }
 0x16a   : > { %v9227_v29 = vadd.f32 %v997_v23, %v9104_v39  ;;  %v9229_v58 = vpop.f32.mrf.mxu1  ;;  %7786 = vmatmul.mubr.msk.f32.gmra.mxu1 %vm489_vm2, %v8913_v17  ;;  %3940 = vmatprep.mubr.f32.mxu0 %v12822_v0  ;;  %v4277_v17 = vrot.slane %v9137_v62, %v8147_v13 }
 0x16b   : > { %v999_v8 = vpop.f32.mrf.mxu0  ;;  %3511 = vmatprep.mubr.f32.mxu1 %v12822_v0 }
 0x16c   : > { %v9249_v39 = vadd.f32 %v999_v8, %v9112_v3  ;;  %v9251_v23 = vpop.f32.mrf.mxu1  ;;  %v4264_v3 = vsel %vm4262_vm9, %v4257_v9, %v9239_v57  ;;  %v3817_v8 = vmul.f32 %v3789_v30, %v3766_v52  ;;  %v4314_v37 = vmul.f32 %v4277_v17, %v4269_v14 }
 0x16d   : > { %v1003_v20 = vpop.f32.mrf.mxu0  ;;  %7818 = vmatmul.mubr.msk.f32.gmra.mxu0 %vm489_vm2, %v9237_v21 }
 0x16e   : > { %v9264_v0 = vadd.f32 %v1003_v20, %v9124_v7  ;;  %v771_v56 = vpop.f32.mrf.mxu1  ;;  %7796 = vmatmul.mubr.msk.f32.vlgmr.msra.gmra.mxu1 %vm489_vm2, %v9002_v40  ;;  %4100 = vmatprep.mubr.f32.mxu0 %v13079_v49  ;;  %v4319_v20 = vmul.f32 %v4297_v47, %v4264_v3 }
 0x16f   : > { %7807 = vmatpush1.msk.msra.mxu1 %vm502_vm1, %v3320_v28  ;;  %v1005_v6 = vpop.f32.mrf.mxu0  ;;  %3517 = vmatprep.mubr.f32.mxu1 %v13079_v49 }
 0x170   : > { %v9272_v27 = vadd.f32 %v1005_v6, %v9144_v1  ;;  %7819 = vmatprep.subr.msk.mxu1 %vm502_vm1, %v3817_v8  ;;  %v773_v30 = vpop.f32.mrf.mxu1 }
 0x171   : > { %v1163_v7 = vpop.f32.mrf.mxu0  ;;  %7827 = vmatmul.mubr.msk.f32.vlgmr.msra.gmra.mxu0 %vm489_vm2, %v9164_v15 }
 0x172   : > { %v9277_v52 = vadd.f32 %v1163_v7, %v771_v56  ;;  %v777_v4 = vpop.f32.mrf.mxu1  ;;  %7797 = vmatmul.mubr.msk.f32.gmra.mxu1 %vm489_vm2, %v9018_v38  ;;  %4106 = vmatprep.mubr.f32.mxu0 %v13079_v49 }
 0x173   : > { %v1165_v14 = vpop.f32.mrf.mxu0  ;;  %3523 = vmatprep.mubr.f32.mxu1 %v13079_v49  ;;  %7839 = vmatpush1.msk.msra.mxu0 %vm502_vm1, %v4314_v37  ;;  %v3785_v37 = vrot.slane %v8979_v16, %v8167_v19 }
 0x174   : > { %v9284_v1 = vadd.f32 %v1165_v14, %v773_v30  ;;  %v779_v47 = vpop.f32.mrf.mxu1  ;;  %7850 = vmatprep.subr.msk.mxu0 %vm502_vm1, %v4319_v20  ;;  %v3805_v20 = vrot.slane %v8979_v16, %v8238_v46 }
 0x175   : > { %v1169_v17 = vpop.f32.mrf.mxu0  ;;  %7828 = vmatmul.mubr.msk.f32.gmra.mxu0 %vm489_vm2, %v9183_v42 }
 0x176   : > { %v9289_v56 = vadd.f32 %v1169_v17, %v777_v4  ;;  %v783_v28 = vpop.f32.mrf.mxu1  ;;  %7798 = vmatmul.mubr.msk.f32.gmra.mxu1 %vm489_vm2, %v9036_v31  ;;  %4112 = vmatprep.mubr.f32.mxu0 %v13079_v49  ;;  %v3767_v4 = vsel %vm3762_vm8, %v8986_v22, %v8955_v60  ;;  %v4293_v60 = vrot.slane %v9137_v62, %v8235_v45 }
 0x177   : > { %v1171_v3 = vpop.f32.mrf.mxu0  ;;  %3529 = vmatprep.mubr.f32.mxu1 %v13079_v49 }
 0x178   : > { %v9295_v8 = vadd.f32 %v1171_v3, %v779_v47  ;;  %v785_v6 = vpop.f32.mrf.mxu1  ;;  %v3770_v47 = vsel %vm3762_vm8, %v9038_v55, %v9022_v44  ;;  %v3816_v3 = vmul.f32 %v3785_v37, %v3767_v4 }
 0x179   : > { %v1175_v30 = vpop.f32.mrf.mxu0  ;;  %7829 = vmatmul.mubr.msk.f32.gmra.mxu0 %vm489_vm2, %v9206_v2  ;;  %v3821_v51 = vmul.f32 %v3805_v20, %v3770_v47 }
 0x17a   : > { %v9307_v7 = vadd.f32 %v1175_v30, %v783_v28  ;;  %v789_v14 = vpop.f32.mrf.mxu1  ;;  %7799 = vmatmul.mubr.msk.f32.gmra.mxu1 %vm489_vm2, %v9060_v59  ;;  %4118 = vmatprep.mubr.f32.mxu0 %v13079_v49  ;;  %v4265_v30 = vsel %vm4262_vm9, %v9109_v24, %v4257_v9 }
 0x17b   : > { %v1177_v17 = vpop.f32.mrf.mxu0  ;;  %3689 = vmatprep.mubr.f32.mxu1 %v13079_v49  ;;  %v4318_v37 = vmul.f32 %v4293_v60, %v4265_v30 }
 0x17c   : > { %v9319_v22 = vadd.f32 %v1177_v17, %v785_v6  ;;  %v791_v28 = vpop.f32.mrf.mxu1  ;;  %v9336_v6 = vld [vmem:[%s12807_s1 + $0x100] sm:$0xff] }
 0x17d   : > { %v1181_v34 = vpop.f32.mrf.mxu0  ;;  %7830 = vmatmul.mubr.msk.f32.gmra.mxu0 %vm489_vm2, %v9237_v21 }
 0x17e   : > { %v9326_v44 = vadd.f32 %v1181_v34, %v789_v14  ;;  %v9328_v13 = vpop.f32.mrf.mxu1  ;;  %7808 = vmatmul.mubr.msk.f32.vlgmr.msra.gmra.mxu1 %vm489_vm2, %v9002_v40  ;;  %4422 = vmatprep.mubr.f32.mxu0 %v13079_v49 }
 0x17f   : > { %7820 = vmatpush1.msk.msra.mxu1 %vm502_vm1, %v3816_v3  ;;  %v1183_v9 = vpop.f32.mrf.mxu0  ;;  %3695 = vmatprep.mubr.f32.mxu1 %v13079_v49 }
 0x180   : > { %v9340_v34 = vadd.f32 %v1183_v9, %v791_v28  ;;  %7831 = vmatprep.subr.msk.mxu1 %vm502_vm1, %v3821_v51  ;;  %v9343_v4 = vpop.f32.mrf.mxu1  ;;  %v9358_v51 = vld [vmem:[%s12807_s1 + $0x108] sm:$0xff]  ;;  %v9379_v28 = vld [vmem:[%s12807_s1 + $0x110] sm:$0xff] }
 0x181   : > { %v1453_v40 = vpop.f32.mrf.mxu0  ;;  %7840 = vmatmul.mubr.msk.f32.vlgmr.msra.gmra.mxu0 %vm489_vm2, %v9336_v6 }
 0x182   : > { %v9348_v20 = vadd.f32 %v1453_v40, %v9173_v35  ;;  %7851 = vmatpush1.msk.msra.mxu0 %vm502_vm1, %v4318_v37  ;;  %v9351_v14 = vpop.f32.mrf.mxu1  ;;  %7809 = vmatmul.mubr.msk.f32.gmra.mxu1 %vm489_vm2, %v9018_v38  ;;  %v4289_v37 = vrot.slane %v9137_v62, %v8162_v18 }
 0x183   : > { %v9360_v47 = vpop.f32.mrf.mxu0  ;;  %4428 = vmatprep.mubr.f32.mxu0 %v13079_v49  ;;  %3701 = vmatprep.mubr.f32.mxu1 %v13079_v49 }
 0x184   : > { %v9364_v35 = vpop.f32.mrf.mxu1 }
 0x185   : > { %v1459_v17 = vpop.f32.mrf.mxu0  ;;  %7841 = vmatmul.mubr.msk.f32.gmra.mxu0 %vm489_vm2, %v9358_v51 }
 0x186   : > { %v9369_v60 = vadd.f32 %v1459_v17, %v9196_v41  ;;  %v9371_v38 = vpop.f32.mrf.mxu1  ;;  %7810 = vmatmul.mubr.msk.f32.gmra.mxu1 %vm489_vm2, %v9036_v31  ;;  %4434 = vmatprep.mubr.f32.mxu0 %v13079_v49  ;;  %v3801_v41 = vrot.slane %v8979_v16, %v8335_v25  ;;  %v3763_v31 = vsel %vm3762_vm8, %v9062_v54, %v9038_v55  ;;  %v9407_v16 = vld [vmem:[%s12807_s1 + $0x118] sm:$0xff] }
 0x187   : > { %v9381_v3 = vpop.f32.mrf.mxu0  ;;  %3707 = vmatprep.mubr.f32.mxu1 %v13079_v49  ;;  %v4266_v55 = vsel %vm4262_vm9, %v9102_v33, %v9109_v24 }
 0x188   : > { %v9384_v30 = vpop.f32.mrf.mxu1  ;;  %v4317_v45 = vmul.f32 %v4289_v37, %v4266_v55 }
 0x189   : > { %v1465_v9 = vpop.f32.mrf.mxu0  ;;  %7842 = vmatmul.mubr.msk.f32.gmra.mxu0 %vm489_vm2, %v9379_v28 }
 0x18a   : > { %v9397_v40 = vadd.f32 %v1465_v9, %v9227_v29  ;;  %v9399_v17 = vpop.f32.mrf.mxu1  ;;  %7811 = vmatmul.mubr.msk.f32.gmra.mxu1 %vm489_vm2, %v9060_v59  ;;  %4440 = vmatprep.mubr.f32.mxu0 %v13079_v49  ;;  %v3820_v9 = vmul.f32 %v3801_v41, %v3763_v31 }
 0x18b   : > { %v9413_v54 = vpop.f32.mrf.mxu0  ;;  %4011 = vmatprep.mubr.f32.mxu1 %v13079_v49 }
 0x18c   : > { %v9416_v29 = vpop.f32.mrf.mxu1 }
 0x18d   : > { %v1471_v59 = vpop.f32.mrf.mxu0  ;;  %7843 = vmatmul.mubr.msk.f32.gmra.mxu0 %vm489_vm2, %v9407_v16 }
 0x18e   : > { %v9421_v18 = vadd.f32 %v1471_v59, %v9264_v0  ;;  %v1074_v12 = vpop.f32.mrf.mxu1  ;;  %7821 = vmatmul.mubr.msk.f32.vlgmr.msra.gmra.mxu1 %vm489_vm2, %v9164_v15  ;;  %4600 = vmatprep.mubr.f32.mxu0 %v13079_v49 }
 0x18f   : > { %v9427_v24 = vadd.f32 %v1074_v12, %v9156_v50  ;;  %7832 = vmatpush1.msk.msra.mxu1 %vm502_vm1, %v3820_v9  ;;  %v9430_v41 = vpop.f32.mrf.mxu0  ;;  %4017 = vmatprep.mubr.f32.mxu1 %v13079_v49 }
 0x190   : > { %7844 = vmatprep.subr.msk.mxu1 %vm502_vm1, %v4317_v45  ;;  %v1076_v31 = vpop.f32.mrf.mxu1 }
 0x191   : > { %v9435_v0 = vadd.f32 %v1076_v31, %v9169_v32  ;;  %v1631_v37 = vpop.f32.mrf.mxu0  ;;  %7852 = vmatmul.mubr.msk.f32.vlgmr.msra.gmra.mxu0 %vm489_vm2, %v9336_v6 }
 0x192   : > { %v9440_v55 = vadd.f32 %v1631_v37, %v9277_v52  ;;  %v1080_v12 = vpop.f32.mrf.mxu1  ;;  %7822 = vmatmul.mubr.msk.f32.gmra.mxu1 %vm489_vm2, %v9183_v42  ;;  %4606 = vmatprep.mubr.f32.mxu0 %v13079_v49 }
 0x193   : > { %v9446_v50 = vadd.f32 %v1080_v12, %v9176_v10  ;;  %v9448_v45 = vpop.f32.mrf.mxu0  ;;  %4023 = vmatprep.mubr.f32.mxu1 %v13079_v49  ;;  %v4285_v12 = vrot.slane %v9137_v62, %v8167_v19 }
 0x194   : > { %v1082_v32 = vpop.f32.mrf.mxu1 }
 0x195   : > { %v9452_v9 = vadd.f32 %v1082_v32, %v9189_v61  ;;  %v1637_v59 = vpop.f32.mrf.mxu0  ;;  %7853 = vmatmul.mubr.msk.f32.gmra.mxu0 %vm489_vm2, %v9358_v51 }
 0x196   : > { %v9457_v52 = vadd.f32 %v1637_v59, %v9289_v56  ;;  %v1086_v31 = vpop.f32.mrf.mxu1  ;;  %7823 = vmatmul.mubr.msk.f32.gmra.mxu1 %vm489_vm2, %v9206_v2  ;;  %4612 = vmatprep.mubr.f32.mxu0 %v13079_v49  ;;  %v4305_v59 = vrot.slane %v9137_v62, %v8238_v46 }
 0x197   : > { %13080 = vst [vmem:[#allocation20_spill] sm:$0xff] %v9452_v9  ;;  %v9463_v10 = vadd.f32 %v1086_v31, %v9198_v26  ;;  %v9465_v37 = vpop.f32.mrf.mxu0  ;;  %4029 = vmatprep.mubr.f32.mxu1 %v13079_v49  ;;  %v4267_v26 = vsel %vm4262_vm9, %v9139_v63, %v9102_v33 }
 0x198   : > { %v1088_v61 = vpop.f32.mrf.mxu1 }
 0x199   : > { %v9471_v56 = vadd.f32 %v1088_v61, %v9214_v5  ;;  %v1643_v32 = vpop.f32.mrf.mxu0  ;;  %7854 = vmatmul.mubr.msk.f32.gmra.mxu0 %vm489_vm2, %v9379_v28  ;;  %v4270_v5 = vsel %vm4262_vm9, %v9208_v53, %v9191_v36 }
 0x19a   : > { %v9482_v31 = vadd.f32 %v1643_v32, %v9307_v7  ;;  %v1092_v9 = vpop.f32.mrf.mxu1  ;;  %7824 = vmatmul.mubr.msk.f32.gmra.mxu1 %vm489_vm2, %v9237_v21  ;;  %4618 = vmatprep.mubr.f32.mxu0 %v13079_v49  ;;  %v4316_v32 = vmul.f32 %v4285_v12, %v4267_v26 }
 0x19b   : > { %13081 = vst [vmem:[#allocation21_spill] sm:$0xff] %v9471_v56  ;;  %v9492_v61 = vadd.f32 %v1092_v9, %v9229_v58  ;;  %v1645_v33 = vpop.f32.mrf.mxu0  ;;  %4189 = vmatprep.mubr.f32.mxu1 %v13079_v49  ;;  %v4321_v56 = vmul.f32 %v4305_v59, %v4270_v5 }
 0x19c   : > { %v9496_v63 = vadd.f32 %v1645_v33, %v9319_v22  ;;  %v1094_v7 = vpop.f32.mrf.mxu1 }
 0x19d   : > { %v9499_v46 = vadd.f32 %v1094_v7, %v9251_v23  ;;  %v1649_v19 = vpop.f32.mrf.mxu0  ;;  %7855 = vmatmul.mubr.msk.f32.gmra.mxu0 %vm489_vm2, %v9407_v16 }
 0x19e   : > { %v9504_v36 = vadd.f32 %v1649_v19, %v9326_v44  ;;  %v1252_v58 = vpop.f32.mrf.mxu1  ;;  %7833 = vmatmul.mubr.msk.f32.vlgmr.msra.gmra.mxu1 %vm489_vm2, %v9164_v15  ;;  %v1744_v15 = vadd.f32 %v9360_v47, %v9187_v48 }
 0x19f   : > { %v9509_v22 = vadd.f32 %v1252_v58, %v9328_v13  ;;  %7845 = vmatpush1.msk.msra.mxu1 %vm502_vm1, %v4316_v32  ;;  %v1651_v9 = vpop.f32.mrf.mxu0  ;;  %4195 = vmatprep.mubr.f32.mxu1 %v13079_v49 }
 0x1a0   : > { %v9514_v23 = vadd.f32 %v1651_v9, %v9340_v34  ;;  %7856 = vmatprep.subr.msk.mxu1 %vm502_vm1, %v4321_v56  ;;  %v1254_v12 = vpop.f32.mrf.mxu1 }
 0x1a1   : > { %v9518_v19 = vadd.f32 %v1254_v12, %v9343_v4  ;;  %v1953_v44 = vpop.f32.mrf.mxu0 }
 0x1a2   : > { %v9523_v13 = vadd.f32 %v1953_v44, %v9348_v20  ;;  %v1258_v26 = vpop.f32.mrf.mxu1  ;;  %7834 = vmatmul.mubr.msk.f32.gmra.mxu1 %vm489_vm2, %v9183_v42  ;;  %v1752_v20 = vadd.f32 %v9381_v3, %v9212_v43  ;;  %v4263_v43 = vsel %vm4262_vm9, %v9239_v57, %v9208_v53 }
 0x1a3   : > { %v9528_v34 = vadd.f32 %v1258_v26, %v9351_v14  ;;  %v1955_v59 = vpop.f32.mrf.mxu0  ;;  %4201 = vmatprep.mubr.f32.mxu1 %v13079_v49  ;;  %v4301_v14 = vrot.slane %v9137_v62, %v8335_v25  ;;  %v1760_v62 = vadd.f32 %v9413_v54, %v9249_v39 }
 0x1a4   : > { %v9531_v56 = vadd.f32 %v1955_v59, %v1744_v15  ;;  %v1260_v4 = vpop.f32.mrf.mxu1 }
 0x1a5   : > { %v9534_v5 = vadd.f32 %v1260_v4, %v9364_v35  ;;  %v1959_v48 = vpop.f32.mrf.mxu0  ;;  %v4320_v58 = vmul.f32 %v4301_v14, %v4263_v43 }
 0x1a6   : > { %v9539_v47 = vadd.f32 %v1959_v48, %v9369_v60  ;;  %v1264_v42 = vpop.f32.mrf.mxu1  ;;  %7835 = vmatmul.mubr.msk.f32.gmra.mxu1 %vm489_vm2, %v9206_v2 }
 0x1a7   : > { %v9546_v33 = vadd.f32 %v1264_v42, %v9371_v38  ;;  %v1961_v7 = vpop.f32.mrf.mxu0  ;;  %4207 = vmatprep.mubr.f32.mxu1 %v13079_v49 }
 0x1a8   : > { %v9553_v35 = vadd.f32 %v1961_v7, %v1752_v20  ;;  %v1266_v60 = vpop.f32.mrf.mxu1 }
 0x1a9   : > { %v9556_v3 = vadd.f32 %v1266_v60, %v9384_v30  ;;  %v1965_v2 = vpop.f32.mrf.mxu0 }
 0x1aa   : > { %v9561_v38 = vadd.f32 %v1965_v2, %v9397_v40  ;;  %v1270_v32 = vpop.f32.mrf.mxu1  ;;  %7836 = vmatmul.mubr.msk.f32.gmra.mxu1 %vm489_vm2, %v9237_v21  ;;  %v1768_v40 = vadd.f32 %v9430_v41, %v9272_v27 }
 0x1ab   : > { %v9566_v53 = vadd.f32 %v1270_v32, %v9399_v17  ;;  %v1967_v57 = vpop.f32.mrf.mxu0  ;;  %4511 = vmatprep.mubr.f32.mxu1 %v13079_v49 }
 0x1ac   : > { %v9569_v30 = vadd.f32 %v1967_v57, %v1760_v62  ;;  %v1272_v9 = vpop.f32.mrf.mxu1 }
 0x1ad   : > { %v9572_v12 = vadd.f32 %v1272_v9, %v9416_v29  ;;  %v1971_v39 = vpop.f32.mrf.mxu0 }
 0x1ae   : > { %v9577_v54 = vadd.f32 %v1971_v39, %v9421_v18  ;;  %v1542_v21 = vpop.f32.mrf.mxu1  ;;  %7846 = vmatmul.mubr.msk.f32.vlgmr.msra.gmra.mxu1 %vm489_vm2, %v9336_v6  ;;  %v1748_v18 = vadd.f32 %v9448_v45, %v9284_v1  ;;  %v1756_v1 = vadd.f32 %v9465_v37, %v9295_v8 }
 0x1af   : > { %v9582_v17 = vadd.f32 %v1542_v21, %v9427_v24  ;;  %v1973_v44 = vpop.f32.mrf.mxu0  ;;  %4517 = vmatprep.mubr.f32.mxu1 %v13079_v49  ;;  %7857 = vmatpush1.msk.msra.mxu1 %vm502_vm1, %v4320_v58 }
 0x1b0   : > { %v9586_v29 = vadd.f32 %v1973_v44, %v1768_v40  ;;  %v9588_v15 = vpop.f32.mrf.mxu1 }
 0x1b1   : > { %v2131_v27 = vpop.f32.mrf.mxu0 }
 0x1b2   : > { %v9593_v41 = vadd.f32 %v2131_v27, %v9440_v55  ;;  %v1548_v26 = vpop.f32.mrf.mxu1  ;;  %7847 = vmatmul.mubr.msk.f32.gmra.mxu1 %vm489_vm2, %v9358_v51 }
 0x1b3   : > { %v9598_v24 = vadd.f32 %v1548_v26, %v9446_v50  ;;  %v2133_v59 = vpop.f32.mrf.mxu0  ;;  %4523 = vmatprep.mubr.f32.mxu1 %v13079_v49 }
 0x1b4   : > { %v9601_v4 = vadd.f32 %v2133_v59, %v1748_v18  ;;  %v9603_v48 = vpop.f32.mrf.mxu1 }
 0x1b5   : > { %v2137_v20 = vpop.f32.mrf.mxu0 }
 0x1b6   : > { %v9608_v55 = vadd.f32 %v2137_v20, %v9457_v52  ;;  %v1554_v45 = vpop.f32.mrf.mxu1  ;;  %7848 = vmatmul.mubr.msk.f32.gmra.mxu1 %vm489_vm2, %v9379_v28 }
 0x1b7   : > { %v9613_v50 = vadd.f32 %v1554_v45, %v9463_v10  ;;  %v2139_v42 = vpop.f32.mrf.mxu0  ;;  %4529 = vmatprep.mubr.f32.mxu1 %v13079_v49 }
 0x1b8   : > { %v9616_v14 = vadd.f32 %v2139_v42, %v1756_v1  ;;  %v9618_v7 = vpop.f32.mrf.mxu1 }
 0x1b9   : > { %v2143_v43 = vpop.f32.mrf.mxu0 }
 0x1ba   : > { %v9621_v8 = vadd.f32 %v2143_v43, %v9482_v31  ;;  %v1560_v52 = vpop.f32.mrf.mxu1  ;;  %7849 = vmatmul.mubr.msk.f32.gmra.mxu1 %vm489_vm2, %v9407_v16 }
 0x1bb   : > { %v9626_v37 = vadd.f32 %v1560_v52, %v9492_v61  ;;  %v2145_v10 = vpop.f32.mrf.mxu0  ;;  %4689 = vmatprep.mubr.f32.mxu1 %v13079_v49  ;;  %v13082_v52 = vld [vmem:[#allocation20_spill] sm:$0xff] }
 0x1bc   : > { %v9630_v60 = vadd.f32 %v2145_v10, %v9496_v63  ;;  %v9632_v2 = vpop.f32.mrf.mxu1  ;;  %v1754_v10 = vadd.f32 %v9603_v48, %v13082_v52 }
 0x1bd   : > { %v2149_v62 = vpop.f32.mrf.mxu0 }
 0x1be   : > { %v9635_v32 = vadd.f32 %v2149_v62, %v9504_v36  ;;  %v1720_v31 = vpop.f32.mrf.mxu1  ;;  %7858 = vmatmul.mubr.msk.f32.vlgmr.msra.gmra.mxu1 %vm489_vm2, %v9336_v6 }
 0x1bf   : > { %v9640_v58 = vadd.f32 %v1720_v31, %v9509_v22  ;;  %v2151_v61 = vpop.f32.mrf.mxu0  ;;  %4695 = vmatprep.mubr.f32.mxu1 %v13079_v49 }
 0x1c0   : > { %v9644_v57 = vadd.f32 %v2151_v61, %v9514_v23  ;;  %v1722_v63 = vpop.f32.mrf.mxu1  ;;  %v13083_v61 = vld [vmem:[#allocation21_spill] sm:$0xff] }
 0x1c1   : > { %v9647_v9 = vadd.f32 %v1722_v63, %v9518_v19  ;;  %v2424_v39 = vpop.f32.mrf.mxu0  ;;  %v1762_v63 = vadd.f32 %v9618_v7, %v13083_v61 }
 0x1c2   : > { %v9650_v36 = vadd.f32 %v2424_v39, %v9523_v13  ;;  %v1726_v40 = vpop.f32.mrf.mxu1  ;;  %7859 = vmatmul.mubr.msk.f32.gmra.mxu1 %vm489_vm2, %v9358_v51 }
 0x1c3   : > { %v9655_v6 = vadd.f32 %v1726_v40, %v9528_v34  ;;  %v2426_v22 = vpop.f32.mrf.mxu0  ;;  %4701 = vmatprep.mubr.f32.mxu1 %v13079_v49 }
 0x1c4   : > { %v9659_v23 = vadd.f32 %v2426_v22, %v9531_v56  ;;  %v1728_v21 = vpop.f32.mrf.mxu1 }
 0x1c5   : > { %v9662_v19 = vadd.f32 %v1728_v21, %v9534_v5  ;;  %v2430_v44 = vpop.f32.mrf.mxu0 }
 0x1c6   : > { %v9665_v13 = vadd.f32 %v2430_v44, %v9539_v47  ;;  %v1732_v27 = vpop.f32.mrf.mxu1  ;;  %7860 = vmatmul.mubr.msk.f32.gmra.mxu1 %vm489_vm2, %v9379_v28  ;;  %v1770_v44 = vadd.f32 %v9632_v2, %v9499_v46 }
 0x1c7   : > { %v9670_v51 = vadd.f32 %v1732_v27, %v9546_v33  ;;  %v2432_v34 = vpop.f32.mrf.mxu0  ;;  %4707 = vmatprep.mubr.f32.mxu1 %v13079_v49 }
 0x1c8   : > { %v9674_v56 = vadd.f32 %v2432_v34, %v9553_v35  ;;  %v1734_v18 = vpop.f32.mrf.mxu1 }
 0x1c9   : > { %v9677_v5 = vadd.f32 %v1734_v18, %v9556_v3  ;;  %v2436_v26 = vpop.f32.mrf.mxu0  ;;  %v1746_v3 = vadd.f32 %v9588_v15, %v9435_v0 }
 0x1ca   : > { %v9680_v47 = vadd.f32 %v2436_v26, %v9561_v38  ;;  %v1738_v59 = vpop.f32.mrf.mxu1  ;;  %7861 = vmatmul.mubr.msk.f32.gmra.mxu1 %vm489_vm2, %v9407_v16 }
 0x1cb   : > { %v9685_v28 = vadd.f32 %v1738_v59, %v9566_v53  ;;  %v2438_v33 = vpop.f32.mrf.mxu0  ;;  %6952 = vmatprep.mubr.f32.mxu1 %v13079_v49 }
 0x1cc   : > { %v9689_v35 = vadd.f32 %v2438_v33, %v9569_v30  ;;  %v1740_v20 = vpop.f32.mrf.mxu1 }
 0x1cd   : > { %v9694_v38 = vadd.f32 %v1740_v20, %v9572_v12  ;;  %v2442_v1 = vpop.f32.mrf.mxu0 }
 0x1ce   : > { %v9697_v45 = vadd.f32 %v2442_v1, %v9577_v54  ;;  %v2042_v16 = vpop.f32.mrf.mxu1 }
 0x1cf   : > { %v9700_v53 = vadd.f32 %v2042_v16, %v9582_v17  ;;  %v2444_v42 = vpop.f32.mrf.mxu0 }
 0x1d0   : > { %v9703_v43 = vadd.f32 %v2444_v42, %v9586_v29  ;;  %v2044_v30 = vpop.f32.mrf.mxu1 }
 0x1d1   : > { %v9707_v0 = vadd.f32 %v2044_v30, %v1746_v3  ;;  %v2602_v12 = vpop.f32.mrf.mxu0 }
 0x1d2   : > { %v9710_v15 = vadd.f32 %v2602_v12, %v9593_v41  ;;  %v2048_v54 = vpop.f32.mrf.mxu1 }
 0x1d3   : > { %v9713_v62 = vadd.f32 %v2048_v54, %v9598_v24  ;;  %v2604_v17 = vpop.f32.mrf.mxu0 }
 0x1d4   : > { %v9716_v31 = vadd.f32 %v2604_v17, %v9601_v4  ;;  %v2050_v29 = vpop.f32.mrf.mxu1 }
 0x1d5   : > { %v9720_v39 = vadd.f32 %v2050_v29, %v1754_v10  ;;  %v2608_v48 = vpop.f32.mrf.mxu0 }
 0x1d6   : > { %v9723_v40 = vadd.f32 %v2608_v48, %v9608_v55  ;;  %v2054_v41 = vpop.f32.mrf.mxu1 }
 0x1d7   : > { %v9726_v22 = vadd.f32 %v2054_v41, %v9613_v50  ;;  %v2610_v24 = vpop.f32.mrf.mxu0 }
 0x1d8   : > { %v9729_v21 = vadd.f32 %v2610_v24, %v9616_v14  ;;  %v2056_v4 = vpop.f32.mrf.mxu1 }
 0x1d9   : > { %v9733_v27 = vadd.f32 %v2056_v4, %v1762_v63  ;;  %v2614_v7 = vpop.f32.mrf.mxu0 }
 0x1da   : > { %v9736_v34 = vadd.f32 %v2614_v7, %v9621_v8  ;;  %v2060_v55 = vpop.f32.mrf.mxu1 }
 0x1db   : > { %v9739_v18 = vadd.f32 %v2060_v55, %v9626_v37  ;;  %v2616_v50 = vpop.f32.mrf.mxu0 }
 0x1dc   : > { %v9742_v26 = vadd.f32 %v2616_v50, %v9630_v60  ;;  %v2062_v14 = vpop.f32.mrf.mxu1 }
 0x1dd   : > { %v9744_v59 = vadd.f32 %v2062_v14, %v1770_v44  ;;  %v2620_v33 = vpop.f32.mrf.mxu0 }
 0x1de   : > { %v9747_v46 = vadd.f32 %v2620_v33, %v9635_v32  ;;  %v2220_v2 = vpop.f32.mrf.mxu1 }
 0x1df   : > { %v9750_v20 = vadd.f32 %v2220_v2, %v9640_v58  ;;  %v2622_v8 = vpop.f32.mrf.mxu0 }
 0x1e0   : > { %v9753_v3 = vadd.f32 %v2622_v8, %v9644_v57  ;;  %v2222_v37 = vpop.f32.mrf.mxu1 }
 0x1e1   : > { %v9756_v1 = vadd.f32 %v2222_v37, %v9647_v9  ;;  %v2924_v60 = vpop.f32.mrf.mxu0 }
 0x1e2   : > { %v9759_v16 = vadd.f32 %v2924_v60, %v9650_v36  ;;  %v2226_v42 = vpop.f32.mrf.mxu1 }
 0x1e3   : > { %v9762_v32 = vadd.f32 %v2226_v42, %v9655_v6  ;;  %v2926_v30 = vpop.f32.mrf.mxu0 }
 0x1e4   : > { %v9765_v58 = vadd.f32 %v2926_v30, %v9659_v23  ;;  %v2228_v52 = vpop.f32.mrf.mxu1 }
 0x1e5   : > { %v2258_v57 = vadd.f32 %v2228_v52, %v9662_v19  ;;  %v2930_v10 = vpop.f32.mrf.mxu0 }
 0x1e6   : > { %v3222_v12 = vadd.f32 %v2930_v10, %v9665_v13  ;;  %v2232_v9 = vpop.f32.mrf.mxu1 }
 0x1e7   : > { %v2265_v54 = vadd.f32 %v2232_v9, %v9670_v51  ;;  %v2932_v17 = vpop.f32.mrf.mxu0 }
 0x1e8   : > { %v3223_v36 = vadd.f32 %v2932_v17, %v9674_v56  ;;  %v2234_v29 = vpop.f32.mrf.mxu1 }
 0x1e9   : > { %v2266_v6 = vadd.f32 %v2234_v29, %v9677_v5  ;;  %v2936_v61 = vpop.f32.mrf.mxu0 }
 0x1ea   : > { %v3230_v63 = vadd.f32 %v2936_v61, %v9680_v47  ;;  %v2238_v23 = vpop.f32.mrf.mxu1 }
 0x1eb   : > { %v2273_v48 = vadd.f32 %v2238_v23, %v9685_v28  ;;  %v2938_v41 = vpop.f32.mrf.mxu0 }
 0x1ec   : > { %v3231_v19 = vadd.f32 %v2938_v41, %v9689_v35  ;;  %v2240_v24 = vpop.f32.mrf.mxu1 }
 0x1ed   : > { %v2274_v13 = vadd.f32 %v2240_v24, %v9694_v38  ;;  %v2942_v4 = vpop.f32.mrf.mxu0 }
 0x1ee   : > { %v3238_v51 = vadd.f32 %v2942_v4, %v9697_v45  ;;  %v2513_v44 = vpop.f32.mrf.mxu1 }
 0x1ef   : > { %v2716_v56 = vadd.f32 %v2513_v44, %v9700_v53  ;;  %v2944_v7 = vpop.f32.mrf.mxu0 }
 0x1f0   : > { %v3239_v5 = vadd.f32 %v2944_v7, %v9703_v43  ;;  %v2515_v55 = vpop.f32.mrf.mxu1 }
 0x1f1   : > { %v2717_v47 = vadd.f32 %v2515_v55, %v9707_v0  ;;  %v3102_v50 = vpop.f32.mrf.mxu0 }
 0x1f2   : > { %v3218_v28 = vadd.f32 %v3102_v50, %v9710_v15  ;;  %v2519_v14 = vpop.f32.mrf.mxu1 }
 0x1f3   : > { %v2724_v35 = vadd.f32 %v2519_v14, %v9713_v62  ;;  %v3104_v33 = vpop.f32.mrf.mxu0 }
 0x1f4   : > { %v3219_v38 = vadd.f32 %v3104_v33, %v9716_v31  ;;  %v2521_v2 = vpop.f32.mrf.mxu1 }
 0x1f5   : > { %v2725_v45 = vadd.f32 %v2521_v2, %v9720_v39  ;;  %v3108_v8 = vpop.f32.mrf.mxu0 }
 0x1f6   : > { %v3226_v53 = vadd.f32 %v3108_v8, %v9723_v40  ;;  %v2525_v37 = vpop.f32.mrf.mxu1 }
 0x1f7   : > { %v2732_v43 = vadd.f32 %v2525_v37, %v9726_v22  ;;  %v3110_v60 = vpop.f32.mrf.mxu0 }
 0x1f8   : > { %v3227_v0 = vadd.f32 %v3110_v60, %v9729_v21  ;;  %v2527_v42 = vpop.f32.mrf.mxu1 }
 0x1f9   : > { %v2733_v15 = vadd.f32 %v2527_v42, %v9733_v27  ;;  %v3114_v30 = vpop.f32.mrf.mxu0 }
 0x1fa   : > { %v3234_v62 = vadd.f32 %v3114_v30, %v9736_v34  ;;  %v2531_v52 = vpop.f32.mrf.mxu1 }
 0x1fb   : > { %v2740_v31 = vadd.f32 %v2531_v52, %v9739_v18  ;;  %v3116_v10 = vpop.f32.mrf.mxu0 }
 0x1fc   : > { %v3235_v39 = vadd.f32 %v3116_v10, %v9742_v26  ;;  %v2533_v9 = vpop.f32.mrf.mxu1 }
 0x1fd   : > { %v2741_v40 = vadd.f32 %v2533_v9, %v9744_v59  ;;  %v3120_v17 = vpop.f32.mrf.mxu0 }
 0x1fe   : > { %v3242_v22 = vadd.f32 %v3120_v17, %v9747_v46  ;;  %v2691_v29 = vpop.f32.mrf.mxu1 }
 0x1ff   : > { %v2720_v21 = vadd.f32 %v2691_v29, %v9750_v20  ;;  %v3122_v61 = vpop.f32.mrf.mxu0 }
 0x200   : > { %v3243_v27 = vadd.f32 %v3122_v61, %v9753_v3  ;;  %v2693_v23 = vpop.f32.mrf.mxu1 }
 0x201   : > { %v2721_v34 = vadd.f32 %v2693_v23, %v9756_v1  ;;  %v9796_v41 = vpop.f32.mrf.mxu0 }
 0x202   : > { %v2697_v18 = vpop.f32.mrf.mxu1 }
 0x203   : > { %v2728_v26 = vadd.f32 %v2697_v18, %v9762_v32  ;;  %v9799_v24 = vpop.f32.mrf.mxu0 }
 0x204   : > { %v2699_v59 = vpop.f32.mrf.mxu1 }
 0x205   : > { %v2729_v4 = vadd.f32 %v2699_v59, %v2258_v57  ;;  %v3430_v44 = vpop.f32.mrf.mxu0 }
 0x206   : > { %v9801_v46 = vadd.f32 %v3430_v44, %v3222_v12  ;;  %v2703_v7 = vpop.f32.mrf.mxu1 }
 0x207   : > { %v2736_v20 = vadd.f32 %v2703_v7, %v2265_v54  ;;  %v3432_v55 = vpop.f32.mrf.mxu0 }
 0x208   : > { %v3723_v50 = vadd.f32 %v3432_v55, %v3223_v36  ;;  %v2705_v3 = vpop.f32.mrf.mxu1 }
 0x209   : > { %v2737_v14 = vadd.f32 %v2705_v3, %v2266_v6  ;;  %v3436_v33 = vpop.f32.mrf.mxu0 }
 0x20a   : > { %v3730_v1 = vadd.f32 %v3436_v33, %v3230_v63  ;;  %v2709_v2 = vpop.f32.mrf.mxu1 }
 0x20b   : > { %v2744_v8 = vadd.f32 %v2709_v2, %v2273_v48  ;;  %v3438_v37 = vpop.f32.mrf.mxu0 }
 0x20c   : > { %v3731_v60 = vadd.f32 %v3438_v37, %v3231_v19  ;;  %v2711_v32 = vpop.f32.mrf.mxu1 }
 0x20d   : > { %v2745_v42 = vadd.f32 %v2711_v32, %v2274_v13  ;;  %v3442_v30 = vpop.f32.mrf.mxu0 }
 0x20e   : > { %v3738_v52 = vadd.f32 %v3442_v30, %v3238_v51  ;;  %v3013_v57 = vpop.f32.mrf.mxu1 }
 0x20f   : > { %v3216_v10 = vadd.f32 %v3013_v57, %v2716_v56  ;;  %v3444_v12 = vpop.f32.mrf.mxu0 }
 0x210   : > { %v3739_v9 = vadd.f32 %v3444_v12, %v3239_v5  ;;  %v3015_v17 = vpop.f32.mrf.mxu1 }
 0x211   : > { %v9803_v54 = vadd.f32 %v3015_v17, %v2717_v47  ;;  %v3602_v36 = vpop.f32.mrf.mxu0 }
 0x212   : > { %v3718_v29 = vadd.f32 %v3602_v36, %v3218_v28  ;;  %v3019_v6 = vpop.f32.mrf.mxu1 }
 0x213   : > { %v3224_v61 = vadd.f32 %v3019_v6, %v2724_v35  ;;  %v3604_v63 = vpop.f32.mrf.mxu0 }
 0x214   : > { %v3719_v23 = vadd.f32 %v3604_v63, %v3219_v38  ;;  %v3021_v48 = vpop.f32.mrf.mxu1 }
 0x215   : > { %v3225_v18 = vadd.f32 %v3021_v48, %v2725_v45  ;;  %v3608_v19 = vpop.f32.mrf.mxu0 }
 0x216   : > { %v3726_v59 = vadd.f32 %v3608_v19, %v3226_v53  ;;  %v3025_v13 = vpop.f32.mrf.mxu1 }
 0x217   : > { %v3232_v44 = vadd.f32 %v3025_v13, %v2732_v43  ;;  %v3610_v51 = vpop.f32.mrf.mxu0 }
 0x218   : > { %v3727_v7 = vadd.f32 %v3610_v51, %v3227_v0  ;;  %v3027_v56 = vpop.f32.mrf.mxu1 }
 0x219   : > { %v3233_v55 = vadd.f32 %v3027_v56, %v2733_v15  ;;  %v3614_v5 = vpop.f32.mrf.mxu0 }
 0x21a   : > { %v3734_v3 = vadd.f32 %v3614_v5, %v3234_v62  ;;  %v3031_v47 = vpop.f32.mrf.mxu1 }
 0x21b   : > { %v3240_v33 = vadd.f32 %v3031_v47, %v2740_v31  ;;  %v3616_v2 = vpop.f32.mrf.mxu0 }
 0x21c   : > { %v3735_v28 = vadd.f32 %v3616_v2, %v3235_v39  ;;  %v3033_v37 = vpop.f32.mrf.mxu1 }
 0x21d   : > { %v3241_v35 = vadd.f32 %v3033_v37, %v2741_v40  ;;  %v3620_v32 = vpop.f32.mrf.mxu0 }
 0x21e   : > { %v3742_v38 = vadd.f32 %v3620_v32, %v3242_v22  ;;  %v3191_v30 = vpop.f32.mrf.mxu1 }
 0x21f   : > { %v3220_v45 = vadd.f32 %v3191_v30, %v2720_v21  ;;  %v3622_v57 = vpop.f32.mrf.mxu0 }
 0x220   : > { %v9805_v53 = vadd.f32 %v3622_v57, %v3243_v27  ;;  %v3193_v43 = vpop.f32.mrf.mxu1 }
 0x221   : > { %v9807_v12 = vadd.f32 %v3193_v43, %v2721_v34  ;;  %v3924_v0 = vpop.f32.mrf.mxu0 }
 0x222   : > { %v3197_v15 = vpop.f32.mrf.mxu1 }
 0x223   : > { %v9809_v17 = vadd.f32 %v3197_v15, %v2728_v26  ;;  %v3926_v62 = vpop.f32.mrf.mxu0 }
 0x224   : > { %v3199_v31 = vpop.f32.mrf.mxu1 }
 0x225   : > { %v9811_v36 = vadd.f32 %v3199_v31, %v2729_v4  ;;  %v9813_v39 = vpop.f32.mrf.mxu0 }
 0x226   : > { %v3203_v40 = vpop.f32.mrf.mxu1 }
 0x227   : > { %v9815_v22 = vadd.f32 %v3203_v40, %v2736_v20  ;;  %v3932_v21 = vpop.f32.mrf.mxu0 }
 0x228   : > { %v9817_v6 = vadd.f32 %v3932_v21, %v3723_v50  ;;  %v3205_v27 = vpop.f32.mrf.mxu1 }
 0x229   : > { %v9819_v63 = vadd.f32 %v3205_v27, %v2737_v14  ;;  %v3936_v34 = vpop.f32.mrf.mxu0 }
 0x22a   : > { %v9821_v48 = vadd.f32 %v3936_v34, %v3730_v1  ;;  %v3209_v26 = vpop.f32.mrf.mxu1 }
 0x22b   : > { %v9823_v19 = vadd.f32 %v3209_v26, %v2744_v8  ;;  %v3938_v13 = vpop.f32.mrf.mxu0 }
 0x22c   : > { %v9825_v4 = vadd.f32 %v3938_v13, %v3731_v60  ;;  %v3211_v51 = vpop.f32.mrf.mxu1 }
 0x22d   : > { %v9827_v56 = vadd.f32 %v3211_v51, %v2745_v42  ;;  %v3942_v20 = vpop.f32.mrf.mxu0  ;;  %v9861_v51 = vpop.permute.xlu0 %4767 }
 0x22e   : > { %v9829_v5 = vadd.f32 %v3942_v20, %v3738_v52  ;;  %v3513_v50 = vpop.f32.mrf.mxu1 }
 0x22f   : > { %v9831_v47 = vadd.f32 %v3513_v50, %v3216_v10  ;;  %v3944_v14 = vpop.f32.mrf.mxu0 }
 0x230   : > { %v9833_v2 = vadd.f32 %v3944_v14, %v3739_v9  ;;  %v9835_v1 = vpop.f32.mrf.mxu1 }
 0x231   : > { %v4102_v37 = vpop.f32.mrf.mxu0 }
 0x232   : > { %v9837_v8 = vadd.f32 %v4102_v37, %v3718_v29  ;;  %v3519_v32 = vpop.f32.mrf.mxu1 }
 0x233   : > { %v9839_v60 = vadd.f32 %v3519_v32, %v3224_v61  ;;  %v4104_v30 = vpop.f32.mrf.mxu0 }
 0x234   : > { %v9841_v42 = vadd.f32 %v4104_v30, %v3719_v23  ;;  %v3521_v57 = vpop.f32.mrf.mxu1 }
 0x235   : > { %v9843_v52 = vadd.f32 %v3521_v57, %v3225_v18  ;;  %v4108_v43 = vpop.f32.mrf.mxu0 }
 0x236   : > { %v9845_v10 = vadd.f32 %v4108_v43, %v3726_v59  ;;  %v3525_v15 = vpop.f32.mrf.mxu1 }
 0x237   : > { %v9847_v9 = vadd.f32 %v3525_v15, %v3232_v44  ;;  %v4110_v31 = vpop.f32.mrf.mxu0 }
 0x238   : > { %v9849_v40 = vadd.f32 %v4110_v31, %v3727_v7  ;;  %v3527_v29 = vpop.f32.mrf.mxu1  ;;  %v3714_v7 = vadd.f32 %v9796_v41, %v9759_v16 }
 0x239   : > { %v9851_v21 = vadd.f32 %v3527_v29, %v3233_v55  ;;  %v4114_v61 = vpop.f32.mrf.mxu0 }
 0x23a   : > { %v9853_v27 = vadd.f32 %v4114_v61, %v3734_v3  ;;  %v3531_v23 = vpop.f32.mrf.mxu1  ;;  %v4214_v14 = vadd.f32 %v3924_v0, %v3714_v7 }
 0x23b   : > { %v9855_v34 = vadd.f32 %v3531_v23, %v3240_v33  ;;  %v4116_v18 = vpop.f32.mrf.mxu0  ;;  %v3715_v33 = vadd.f32 %v9799_v24, %v9765_v58 }
 0x23c   : > { %v9857_v26 = vadd.f32 %v4116_v18, %v3735_v28  ;;  %v3533_v59 = vpop.f32.mrf.mxu1 }
 0x23d   : > { %v9859_v13 = vadd.f32 %v3533_v59, %v3241_v35  ;;  %v4120_v44 = vpop.f32.mrf.mxu0  ;;  %v4215_v30 = vadd.f32 %v3926_v62, %v3715_v33 }
 0x23e   : > { %v9865_v55 = vadd.f32 %v4120_v44, %v3742_v38  ;;  %v3691_v20 = vpop.f32.mrf.mxu1  ;;  %v9874_v38 = vpop.permute.xlu0 %4752 }
 0x23f   : > { %v3720_v3 = vadd.f32 %v3691_v20, %v3220_v45  ;;  %v4122_v50 = vpop.f32.mrf.mxu0 }
 0x240   : > { %v9870_v28 = vadd.f32 %v4122_v50, %v9805_v53  ;;  %v3693_v35 = vpop.f32.mrf.mxu1 }
 0x241   : > { %v3721_v37 = vadd.f32 %v3693_v35, %v9807_v12  ;;  %v4424_v32 = vpop.f32.mrf.mxu0 }
 0x242   : > { %v4714_v57 = vadd.f32 %v4424_v32, %v4214_v14  ;;  %v3697_v43 = vpop.f32.mrf.mxu1 }
 0x243   : > { %v3728_v16 = vadd.f32 %v3697_v43, %v9809_v17  ;;  %v4426_v41 = vpop.f32.mrf.mxu0 }
 0x244   : > { %v4715_v45 = vadd.f32 %v4426_v41, %v4215_v30  ;;  %v4770_v15 = vadd.f32 %v9874_v38, %v4714_v57  ;;  %v3699_v58 = vpop.f32.mrf.mxu1 }
 0x245   : > { %v3729_v24 = vadd.f32 %v3699_v58, %v9811_v36  ;;  %v4430_v44 = vpop.f32.mrf.mxu0 }
 0x246   : > { %v4771_v53 = vadd.f32 %v9874_v38, %v4715_v45  ;;  %v9879_v0 = vmax.f32 %v4770_v15, 0.0  ;;  %v3703_v12 = vpop.f32.mrf.mxu1 }
 0x247   : > { %v3736_v62 = vadd.f32 %v3703_v12, %v9815_v22  ;;  %v9894_v22 = vpop.permute.xlu1 %4762 }
 0x248   : > { %13084 = vst [vmem:[#allocation20_spill] sm:$0xff] %v9879_v0  ;;  %v3705_v31 = vpop.f32.mrf.mxu1  ;;  %5398 = vrot.lane.b32.xlu0 %v9879_v0, %s7940_s11  ;;  %6312 = vrot.lane.b32.xlu1 %v9879_v0, %s7944_s15  ;;  %v9887_v29 = vmax.f32 %v4771_v53, 0.0 }
 0x249   : > { %v3737_v17 = vadd.f32 %v3705_v31, %v9819_v63  ;;  %v4222_v63 = vadd.f32 %v9813_v39, %v9801_v46 }
 0x24a   : > { %13085 = vst [vmem:[#allocation21_spill] sm:$0xff] %v9887_v29  ;;  %v3709_v61 = vpop.f32.mrf.mxu1 }
 0x24b   : > { %v3744_v36 = vadd.f32 %v3709_v61, %v9823_v19  ;;  %v4722_v19 = vadd.f32 %v4430_v44, %v4222_v63  ;;  %v9909_v50 = vpop.permute.xlu1 %4757  ;;  %v4432_v61 = vpop.f32.mrf.mxu0 }
 0x24c   : > { %v3711_v23 = vpop.f32.mrf.mxu1  ;;  %5196 = vrot.lane.b32.xlu0 %v9879_v0, %s7939_s10  ;;  %5406 = vrot.lane.b32.xlu1 %v9887_v29, %s7940_s11 }
 0x24d   : > { %v3745_v18 = vadd.f32 %v3711_v23, %v9827_v56  ;;  %v4778_v39 = vadd.f32 %v9909_v50, %v4722_v19 }
 0x24e   : > { %v9897_v59 = vpop.f32.mrf.mxu1 }
 0x24f   : > { %v9929_v30 = vmax.f32 %v4778_v39, 0.0 }
 0x250   : > { %v9901_v7 = vpop.f32.mrf.mxu1  ;;  %4994 = vrot.lane.b32.xlu0 %v9879_v0, %s7937_s8  ;;  %5204 = vrot.lane.b32.xlu1 %v9887_v29, %s7939_s10 }
 0x251   : > { %13086 = vst [vmem:[#allocation22_spill] sm:$0xff] %v9929_v30 }
 0x252   : > { %v9907_v20 = vpop.f32.mrf.mxu1 }
 0x254   : > { %v4021_v56 = vpop.f32.mrf.mxu1  ;;  %4834 = vrot.lane.b32.xlu0 %v9879_v0, %s7938_s9  ;;  %5002 = vrot.lane.b32.xlu1 %v9887_v29, %s7937_s8 }
 0x255   : > { %v9916_v46 = vadd.f32 %v4021_v56, %v9843_v52 }
 0x256   : > { %v4025_v33 = vpop.f32.mrf.mxu1 }
 0x257   : > { %v9920_v14 = vadd.f32 %v4025_v33, %v9847_v9 }
 0x258   : > { %v4027_v35 = vpop.f32.mrf.mxu1  ;;  %6110 = vrot.lane.b32.xlu0 %v9879_v0, %s7943_s14  ;;  %4842 = vrot.lane.b32.xlu1 %v9887_v29, %s7938_s9 }
 0x259   : > { %v9927_v32 = vadd.f32 %v4027_v35, %v9851_v21 }
 0x25a   : > { %v4031_v52 = vpop.f32.mrf.mxu1 }
 0x25b   : > { %v9932_v57 = vadd.f32 %v4031_v52, %v9855_v34 }
 0x25c   : > { %v4033_v43 = vpop.f32.mrf.mxu1  ;;  %5908 = vrot.lane.b32.xlu0 %v9879_v0, %s7942_s13  ;;  %6314 = vrot.lane.b32.xlu1 %v9929_v30, %s7944_s15 }
 0x25d   : > { %v9939_v9 = vadd.f32 %v4033_v43, %v9859_v13 }
 0x25e   : > { %v4191_v41 = vpop.f32.mrf.mxu1 }
 0x25f   : > { %v9941_v45 = vadd.f32 %v4191_v41, %v3720_v3 }
 0x260   : > { %v4193_v21 = vpop.f32.mrf.mxu1  ;;  %5706 = vrot.lane.b32.xlu0 %v9879_v0, %s7941_s12  ;;  %5198 = vrot.lane.b32.xlu1 %v9929_v30, %s7939_s10 }
 0x261   : > { %v9947_v34 = vadd.f32 %v4193_v21, %v3721_v37 }
 0x262   : > { %v4197_v15 = vpop.f32.mrf.mxu1 }
 0x263   : > { %v9949_v58 = vadd.f32 %v4197_v15, %v3728_v16 }
 0x264   : > { %v4199_v53 = vpop.f32.mrf.mxu1  ;;  %6320 = vrot.lane.b32.xlu0 %v9887_v29, %s7944_s15  ;;  %4996 = vrot.lane.b32.xlu1 %v9929_v30, %s7937_s8 }
 0x265   : > { %v9955_v13 = vadd.f32 %v4199_v53, %v3729_v24 }
 0x266   : > { %v4203_v3 = vpop.f32.mrf.mxu1 }
 0x267   : > { %v9957_v12 = vadd.f32 %v4203_v3, %v3736_v62  ;;  %v4723_v62 = vadd.f32 %v4432_v61, %v9817_v6  ;;  %v4436_v6 = vpop.f32.mrf.mxu0 }
 0x268   : > { %v4205_v31 = vpop.f32.mrf.mxu1  ;;  %6118 = vrot.lane.b32.xlu0 %v9887_v29, %s7943_s14  ;;  %4836 = vrot.lane.b32.xlu1 %v9929_v30, %s7938_s9 }
 0x269   : > { %v9963_v37 = vadd.f32 %v4205_v31, %v3737_v17  ;;  %v4779_v17 = vadd.f32 %v9909_v50, %v4723_v62  ;;  %v4438_v63 = vpop.f32.mrf.mxu0 }
 0x26a   : > { %v4209_v16 = vpop.f32.mrf.mxu1  ;;  %v4731_v56 = vadd.f32 %v4438_v63, %v9825_v4 }
 0x26b   : > { %v9965_v23 = vadd.f32 %v4209_v16, %v3744_v36  ;;  %v9983_v36 = vmax.f32 %v4779_v17, 0.0  ;;  %v4442_v4 = vpop.f32.mrf.mxu0 }
 0x26c   : > { %v4211_v44 = vpop.f32.mrf.mxu1  ;;  %5916 = vrot.lane.b32.xlu0 %v9887_v29, %s7942_s13  ;;  %6112 = vrot.lane.b32.xlu1 %v9929_v30, %s7943_s14  ;;  %v4738_v35 = vadd.f32 %v4442_v4, %v9829_v5 }
 0x26d   : > { %v9971_v24 = vadd.f32 %v4211_v44, %v3745_v18  ;;  %13087 = vst [vmem:[#allocation23_spill] sm:$0xff] %v9983_v36  ;;  %v4730_v18 = vadd.f32 %v4436_v6, %v9821_v48  ;;  %v4787_v48 = vadd.f32 %v9894_v22, %v4731_v56  ;;  %v4444_v5 = vpop.f32.mrf.mxu0 }
 0x26e   : > { %v4794_v52 = vadd.f32 %v9861_v51, %v4738_v35  ;;  %v4739_v41 = vadd.f32 %v4444_v5, %v9833_v2 }
 0x26f   : > { %v4786_v19 = vadd.f32 %v9894_v22, %v4730_v18  ;;  %v10011_v33 = vmax.f32 %v4787_v48, 0.0  ;;  %v4602_v53 = vpop.f32.mrf.mxu0 }
 0x270   : > { %5714 = vrot.lane.b32.xlu0 %v9887_v29, %s7941_s12  ;;  %5910 = vrot.lane.b32.xlu1 %v9929_v30, %s7942_s13  ;;  %v10031_v43 = vmax.f32 %v4794_v52, 0.0  ;;  %v4795_v21 = vadd.f32 %v9861_v51, %v4739_v41  ;;  %v4718_v2 = vadd.f32 %v4602_v53, %v9837_v8 }
 0x271   : > { %v10004_v39 = vmax.f32 %v4786_v19, 0.0  ;;  %13089 = vst [vmem:[#allocation25_spill] sm:$0xff] %v10011_v33  ;;  %v4604_v63 = vpop.f32.mrf.mxu0 }
 0x272   : > { %13090 = vst [vmem:[#allocation26_spill] sm:$0xff] %v10031_v43  ;;  %v10063_v15 = vmax.f32 %v4795_v21, 0.0  ;;  %v4774_v16 = vadd.f32 %v9874_v38, %v4718_v2  ;;  %v4719_v19 = vadd.f32 %v4604_v63, %v9841_v42 }
 0x273   : > { %13088 = vst [vmem:[#allocation24_spill] sm:$0xff] %v10004_v39  ;;  %v4608_v4 = vpop.f32.mrf.mxu0 }
 0x274   : > { %5400 = vrot.lane.b32.xlu0 %v9929_v30, %s7940_s11  ;;  %5708 = vrot.lane.b32.xlu1 %v9929_v30, %s7941_s12  ;;  %13091 = vst [vmem:[#allocation27_spill] sm:$0xff] %v10063_v15  ;;  %v10087_v8 = vmax.f32 %v4774_v16, 0.0  ;;  %v4775_v35 = vadd.f32 %v9874_v38, %v4719_v19  ;;  %v4726_v52 = vadd.f32 %v4608_v4, %v9845_v10 }
 0x275   : > { %v4610_v19 = vpop.f32.mrf.mxu0 }
 0x276   : > { %13094 = vst [vmem:[#allocation30_spill] sm:$0xff] %v10087_v8  ;;  %v10124_v42 = vmax.f32 %v4775_v35, 0.0  ;;  %v4782_v21 = vadd.f32 %v9909_v50, %v4726_v52  ;;  %v4727_v4 = vadd.f32 %v4610_v19, %v9849_v40 }
 0x277   : > { %v4614_v0 = vpop.f32.mrf.mxu0 }
 0x278   : > { %6322 = vrot.lane.b32.xlu0 %v9983_v36, %s7944_s15  ;;  %5408 = vrot.lane.b32.xlu1 %v9983_v36, %s7940_s11  ;;  %13102 = vst [vmem:[#allocation38_spill] sm:$0xff] %v10124_v42  ;;  %v10135_v10 = vmax.f32 %v4782_v21, 0.0  ;;  %v4783_v21 = vadd.f32 %v9909_v50, %v4727_v4  ;;  %v4734_v29 = vadd.f32 %v4614_v0, %v9853_v27 }
 0x27a   : > { %13105 = vst [vmem:[#allocation41_spill] sm:$0xff] %v10135_v10  ;;  %v10164_v40 = vmax.f32 %v4783_v21, 0.0  ;;  %v4790_v19 = vadd.f32 %v9894_v22, %v4734_v29  ;;  %v4616_v21 = vpop.f32.mrf.mxu0 }
 0x27b   : > { %v4735_v29 = vadd.f32 %v4616_v21, %v9857_v26 }
 0x27c   : > { %5206 = vrot.lane.b32.xlu0 %v9983_v36, %s7939_s10  ;;  %6120 = vrot.lane.b32.xlu1 %v9983_v36, %s7943_s14  ;;  %13111 = vst [vmem:[#allocation47_spill] sm:$0xff] %v10164_v40  ;;  %v10175_v27 = vmax.f32 %v4790_v19, 0.0  ;;  %v4620_v49 = vpop.f32.mrf.mxu0 }
 0x27d   : > { %v4791_v19 = vadd.f32 %v9894_v22, %v4735_v29  ;;  %v4742_v25 = vadd.f32 %v4620_v49, %v9865_v55 }
 0x27e   : > { %13114 = vst [vmem:[#allocation50_spill] sm:$0xff] %v10175_v27 }
 0x27f   : > { %v10204_v26 = vmax.f32 %v4791_v19, 0.0  ;;  %v4798_v21 = vadd.f32 %v9861_v51, %v4742_v25 }
 0x280   : > { %5004 = vrot.lane.b32.xlu0 %v9983_v36, %s7937_s8  ;;  %5918 = vrot.lane.b32.xlu1 %v9983_v36, %s7942_s13 }
 0x281   : > { %13118 = vst [vmem:[#allocation54_spill] sm:$0xff] %v10204_v26  ;;  %v10215_v49 = vmax.f32 %v4798_v21, 0.0  ;;  %v3717_v21 = vadd.f32 %v9835_v1, %v9803_v54  ;;  %v4216_v1 = vadd.f32 %v9897_v59, %v9831_v47 }
 0x283   : > { %13121 = vst [vmem:[#allocation57_spill] sm:$0xff] %v10215_v49 }
 0x284   : > { %4844 = vrot.lane.b32.xlu0 %v9983_v36, %s7938_s9  ;;  %5716 = vrot.lane.b32.xlu1 %v9983_v36, %s7941_s12 }
 0x288   : > { %5402 = vrot.lane.b32.xlu0 %v10004_v39, %s7940_s11  ;;  %6316 = vrot.lane.b32.xlu1 %v10004_v39, %s7944_s15 }
 0x28c   : > { %5200 = vrot.lane.b32.xlu0 %v10004_v39, %s7939_s10  ;;  %5410 = vrot.lane.b32.xlu1 %v10011_v33, %s7940_s11 }
 0x290   : > { %4998 = vrot.lane.b32.xlu0 %v10004_v39, %s7937_s8  ;;  %5208 = vrot.lane.b32.xlu1 %v10011_v33, %s7939_s10 }
 0x294   : > { %4838 = vrot.lane.b32.xlu0 %v10004_v39, %s7938_s9  ;;  %5006 = vrot.lane.b32.xlu1 %v10011_v33, %s7937_s8 }
 0x298   : > { %6114 = vrot.lane.b32.xlu0 %v10004_v39, %s7943_s14  ;;  %4846 = vrot.lane.b32.xlu1 %v10011_v33, %s7938_s9 }
 0x29c   : > { %5912 = vrot.lane.b32.xlu0 %v10004_v39, %s7942_s13  ;;  %6318 = vrot.lane.b32.xlu1 %v10031_v43, %s7944_s15 }
 0x2a0   : > { %5710 = vrot.lane.b32.xlu0 %v10004_v39, %s7941_s12  ;;  %5202 = vrot.lane.b32.xlu1 %v10031_v43, %s7939_s10 }
 0x2a4   : > { %6324 = vrot.lane.b32.xlu0 %v10011_v33, %s7944_s15  ;;  %5000 = vrot.lane.b32.xlu1 %v10031_v43, %s7937_s8 }
 0x2a8   : > { %6122 = vrot.lane.b32.xlu0 %v10011_v33, %s7943_s14  ;;  %4840 = vrot.lane.b32.xlu1 %v10031_v43, %s7938_s9 }
 0x2ac   : > { %5920 = vrot.lane.b32.xlu0 %v10011_v33, %s7942_s13  ;;  %6116 = vrot.lane.b32.xlu1 %v10031_v43, %s7943_s14 }
 0x2b0   : > { %5718 = vrot.lane.b32.xlu0 %v10011_v33, %s7941_s12  ;;  %5914 = vrot.lane.b32.xlu1 %v10031_v43, %s7942_s13 }
 0x2b4   : > { %5404 = vrot.lane.b32.xlu0 %v10031_v43, %s7940_s11  ;;  %5712 = vrot.lane.b32.xlu1 %v10031_v43, %s7941_s12 }
 0x2b8   : > { %5210 = vrot.lane.b32.xlu0 %v10063_v15, %s7939_s10  ;;  %6326 = vrot.lane.b32.xlu1 %v10063_v15, %s7944_s15 }
 0x2ba   : > { %v10070_v3 = vpop.permute.xlu0 %5398  ;;  %v10072_v31 = vpop.permute.xlu1 %6312 }
 0x2bb   : > { %13092 = vst [vmem:[#allocation28_spill] sm:$0xff] %v10072_v31 }
 0x2bc   : > { %5008 = vrot.lane.b32.xlu0 %v10063_v15, %s7937_s8  ;;  %5412 = vrot.lane.b32.xlu1 %v10063_v15, %s7940_s11 }
 0x2be   : > { %v10079_v61 = vpop.permute.xlu0 %5196  ;;  %v10081_v44 = vpop.permute.xlu1 %5406 }
 0x2bf   : > { %13093 = vst [vmem:[#allocation29_spill] sm:$0xff] %v10079_v61 }
 0x2c0   : > { %4848 = vrot.lane.b32.xlu0 %v10063_v15, %s7938_s9  ;;  %6124 = vrot.lane.b32.xlu1 %v10063_v15, %s7943_s14 }
 0x2c2   : > { %v10089_v62 = vpop.permute.xlu0 %4994  ;;  %v10091_v17 = vpop.permute.xlu1 %5204 }
 0x2c3   : > { %13095 = vst [vmem:[#allocation31_spill] sm:$0xff] %v10089_v62 }
 0x2c4   : > { %6142 = vrot.lane.b32.xlu0 %v10087_v8, %s7943_s14  ;;  %5922 = vrot.lane.b32.xlu1 %v10063_v15, %s7942_s13 }
 0x2c6   : > { %v10097_v6 = vpop.permute.xlu0 %4834  ;;  %v10099_v18 = vpop.permute.xlu1 %5002 }
 0x2c7   : > { %13096 = vst [vmem:[#allocation32_spill] sm:$0xff] %v10097_v6  ;;  %13097 = vst [vmem:[#allocation33_spill] sm:$0xff] %v10099_v18 }
 0x2c8   : > { %5940 = vrot.lane.b32.xlu0 %v10087_v8, %s7942_s13  ;;  %5720 = vrot.lane.b32.xlu1 %v10063_v15, %s7941_s12 }
 0x2ca   : > { %v10106_v56 = vpop.permute.xlu0 %6110  ;;  %v10108_v48 = vpop.permute.xlu1 %4842 }
 0x2cb   : > { %13098 = vst [vmem:[#allocation34_spill] sm:$0xff] %v10106_v56  ;;  %13099 = vst [vmem:[#allocation35_spill] sm:$0xff] %v10108_v48 }
 0x2cc   : > { %5738 = vrot.lane.b32.xlu0 %v10087_v8, %s7941_s12  ;;  %5430 = vrot.lane.b32.xlu1 %v10087_v8, %s7940_s11 }
 0x2ce   : > { %v10116_v5 = vpop.permute.xlu0 %5908  ;;  %v10118_v41 = vpop.permute.xlu1 %6314 }
 0x2cf   : > { %13100 = vst [vmem:[#allocation36_spill] sm:$0xff] %v10116_v5  ;;  %13101 = vst [vmem:[#allocation37_spill] sm:$0xff] %v10118_v41 }
 0x2d0   : > { %6344 = vrot.lane.b32.xlu0 %v10087_v8, %s7944_s15  ;;  %5228 = vrot.lane.b32.xlu1 %v10087_v8, %s7939_s10 }
 0x2d2   : > { %v10127_v53 = vpop.permute.xlu0 %5706  ;;  %v10129_v2 = vpop.permute.xlu1 %5198 }
 0x2d3   : > { %13103 = vst [vmem:[#allocation39_spill] sm:$0xff] %v10127_v53  ;;  %13104 = vst [vmem:[#allocation40_spill] sm:$0xff] %v10129_v2  ;;  %v4513_v2 = vpop.f32.mrf.mxu1 }
 0x2d4   : > { %5438 = vrot.lane.b32.xlu0 %v10124_v42, %s7940_s11  ;;  %6352 = vrot.lane.b32.xlu1 %v10124_v42, %s7944_s15 }
 0x2d6   : > { %v10137_v16 = vpop.permute.xlu0 %6320  ;;  %v10139_v63 = vpop.permute.xlu1 %4996 }
 0x2d7   : > { %13106 = vst [vmem:[#allocation42_spill] sm:$0xff] %v10139_v63 }
 0x2d8   : > { %5740 = vrot.lane.b32.xlu0 %v10135_v10, %s7941_s12  ;;  %6144 = vrot.lane.b32.xlu1 %v10135_v10, %s7943_s14 }
 0x2da   : > { %v10146_v35 = vpop.permute.xlu0 %6118  ;;  %v10148_v52 = vpop.permute.xlu1 %4836 }
 0x2db   : > { %13107 = vst [vmem:[#allocation43_spill] sm:$0xff] %v10146_v35  ;;  %13108 = vst [vmem:[#allocation44_spill] sm:$0xff] %v10148_v52 }
 0x2dc   : > { %6346 = vrot.lane.b32.xlu0 %v10135_v10, %s7944_s15  ;;  %5942 = vrot.lane.b32.xlu1 %v10135_v10, %s7942_s13 }
 0x2de   : > { %v10156_v36 = vpop.permute.xlu0 %5916  ;;  %v10158_v30 = vpop.permute.xlu1 %6112 }
 0x2df   : > { %13109 = vst [vmem:[#allocation45_spill] sm:$0xff] %v10156_v36  ;;  %13110 = vst [vmem:[#allocation46_spill] sm:$0xff] %v10158_v30 }
 0x2e0   : > { %5230 = vrot.lane.b32.xlu0 %v10135_v10, %s7939_s10  ;;  %5432 = vrot.lane.b32.xlu1 %v10135_v10, %s7940_s11 }
 0x2e2   : > { %v10167_v39 = vpop.permute.xlu0 %5714  ;;  %v10169_v33 = vpop.permute.xlu1 %5910 }
 0x2e3   : > { %13112 = vst [vmem:[#allocation48_spill] sm:$0xff] %v10167_v39  ;;  %13113 = vst [vmem:[#allocation49_spill] sm:$0xff] %v10169_v33 }
 0x2e4   : > { %5440 = vrot.lane.b32.xlu0 %v10164_v40, %s7940_s11  ;;  %6354 = vrot.lane.b32.xlu1 %v10164_v40, %s7944_s15 }
 0x2e6   : > { %v10177_v0 = vpop.permute.xlu0 %5400  ;;  %v10179_v4 = vpop.permute.xlu1 %5708 }
 0x2e7   : > { %13115 = vst [vmem:[#allocation51_spill] sm:$0xff] %v10177_v0  ;;  %13116 = vst [vmem:[#allocation52_spill] sm:$0xff] %v10179_v4 }
 0x2e8   : > { %6146 = vrot.lane.b32.xlu0 %v10175_v27, %s7943_s14  ;;  %5238 = vrot.lane.b32.xlu1 %v10164_v40, %s7939_s10 }
 0x2ea   : > { %v10186_v43 = vpop.permute.xlu0 %6322  ;;  %v10188_v15 = vpop.permute.xlu1 %5408 }
 0x2ec   : > { %5944 = vrot.lane.b32.xlu0 %v10175_v27, %s7942_s13  ;;  %5434 = vrot.lane.b32.xlu1 %v10175_v27, %s7940_s11 }
 0x2ee   : > { %v10196_v52 = vpop.permute.xlu0 %5206  ;;  %v10198_v4 = vpop.permute.xlu1 %6120 }
 0x2ef   : > { %13117 = vst [vmem:[#allocation53_spill] sm:$0xff] %v10198_v4 }
 0x2f0   : > { %5742 = vrot.lane.b32.xlu0 %v10175_v27, %s7941_s12  ;;  %5232 = vrot.lane.b32.xlu1 %v10175_v27, %s7939_s10 }
 0x2f2   : > { %v10207_v33 = vpop.permute.xlu0 %5004  ;;  %v10209_v63 = vpop.permute.xlu1 %5918 }
 0x2f3   : > { %13119 = vst [vmem:[#allocation55_spill] sm:$0xff] %v10207_v33  ;;  %13120 = vst [vmem:[#allocation56_spill] sm:$0xff] %v10209_v63  ;;  %v4622_v63 = vpop.f32.mrf.mxu0 }
 0x2f4   : > { %6348 = vrot.lane.b32.xlu0 %v10175_v27, %s7944_s15  ;;  %6356 = vrot.lane.b32.xlu1 %v10204_v26, %s7944_s15 }
 0x2f6   : > { %v10217_v55 = vpop.permute.xlu0 %4844  ;;  %v10219_v29 = vpop.permute.xlu1 %5716 }
 0x2f7   : > { %13122 = vst [vmem:[#allocation58_spill] sm:$0xff] %v10217_v55  ;;  %13123 = vst [vmem:[#allocation59_spill] sm:$0xff] %v10219_v29  ;;  %v4743_v29 = vadd.f32 %v4622_v63, %v9870_v28  ;;  %v4217_v55 = vadd.f32 %v9901_v7, %v3717_v21  ;;  %v4716_v7 = vadd.f32 %v4513_v2, %v4216_v1 }
 0x2f8   : > { %5442 = vrot.lane.b32.xlu0 %v10204_v26, %s7940_s11  ;;  %6148 = vrot.lane.b32.xlu1 %v10215_v49, %s7943_s14 }
 0x2f9   : > { %v4799_v30 = vadd.f32 %v9861_v51, %v4743_v29  ;;  %v4772_v47 = vadd.f32 %v9874_v38, %v4716_v7  ;;  %v4224_v7 = vadd.f32 %v9907_v20, %v9839_v60 }
 0x2fa   : > { %v10225_v25 = vpop.permute.xlu0 %5402  ;;  %v10227_v19 = vpop.permute.xlu1 %6316 }
 0x2fb   : > { %13124 = vst [vmem:[#allocation60_spill] sm:$0xff] %v10225_v25  ;;  %13125 = vst [vmem:[#allocation61_spill] sm:$0xff] %v10227_v19  ;;  %v4515_v25 = vpop.f32.mrf.mxu1  ;;  %v10256_v28 = vmax.f32 %v4799_v30, 0.0  ;;  %v10278_v2 = vmax.f32 %v4772_v47, 0.0 }
 0x2fc   : > { %5240 = vrot.lane.b32.xlu0 %v10204_v26, %s7939_s10  ;;  %5946 = vrot.lane.b32.xlu1 %v10215_v49, %s7942_s13  ;;  %v4717_v4 = vadd.f32 %v4515_v25, %v4217_v55 }
 0x2fd   : > { %13129 = vst [vmem:[#allocation65_spill] sm:$0xff] %v10256_v28  ;;  %v4519_v1 = vpop.f32.mrf.mxu1 }
 0x2fe   : > { %v10236_v53 = vpop.permute.xlu0 %5200  ;;  %v10238_v39 = vpop.permute.xlu1 %5410  ;;  %v4773_v63 = vadd.f32 %v9874_v38, %v4717_v4 }
 0x2ff   : > { %13126 = vst [vmem:[#allocation62_spill] sm:$0xff] %v10236_v53  ;;  %13127 = vst [vmem:[#allocation63_spill] sm:$0xff] %v10238_v39  ;;  %v13148_v53 = vld [vmem:[#allocation4_spill] sm:$0xff] }
 0x300   : > { %6350 = vrot.lane.b32.xlu0 %v10215_v49, %s7944_s15  ;;  %5744 = vrot.lane.b32.xlu1 %v10215_v49, %s7941_s12  ;;  %v10268_v59 = vmax.f32 %v4773_v63, 0.0  ;;  %v4724_v63 = vadd.f32 %v4519_v1, %v4224_v7 }
 0x302   : > { %v10246_v0 = vpop.permute.xlu0 %4998  ;;  %v10248_v54 = vpop.permute.xlu1 %5208  ;;  %v4780_v47 = vadd.f32 %v9909_v50, %v4724_v63 }
 0x303   : > { %13128 = vst [vmem:[#allocation64_spill] sm:$0xff] %v10246_v0 }
 0x304   : > { %5234 = vrot.lane.b32.xlu0 %v10215_v49, %s7939_s10  ;;  %5436 = vrot.lane.b32.xlu1 %v10215_v49, %s7940_s11  ;;  %v10307_v1 = vmax.f32 %v4780_v47, 0.0 }
 0x306   : > { %v10259_v29 = vpop.permute.xlu0 %4838  ;;  %v10261_v55 = vpop.permute.xlu1 %5006 }
 0x307   : > { %13130 = vst [vmem:[#allocation66_spill] sm:$0xff] %v10259_v29  ;;  %13131 = vst [vmem:[#allocation67_spill] sm:$0xff] %v10261_v55 }
 0x308   : > { %5444 = vrot.lane.b32.xlu0 %v10256_v28, %s7940_s11  ;;  %6358 = vrot.lane.b32.xlu1 %v10256_v28, %s7944_s15 }
 0x30a   : > { %v10270_v25 = vpop.permute.xlu0 %6114  ;;  %v10272_v30 = vpop.permute.xlu1 %4846 }
 0x30b   : > { %13132 = vst [vmem:[#allocation68_spill] sm:$0xff] %v10270_v25  ;;  %13133 = vst [vmem:[#allocation69_spill] sm:$0xff] %v10272_v30 }
 0x30c   : > { %5422 = vrot.lane.b32.xlu0 %v10268_v59, %s7940_s11  ;;  %5242 = vrot.lane.b32.xlu1 %v10256_v28, %s7939_s10 }
 0x30e   : > { %v10280_v4 = vpop.permute.xlu0 %5912  ;;  %v10282_v21 = vpop.permute.xlu1 %6318 }
 0x30f   : > { %13134 = vst [vmem:[#allocation70_spill] sm:$0xff] %v10280_v4  ;;  %13135 = vst [vmem:[#allocation71_spill] sm:$0xff] %v10282_v21 }
 0x310   : > { %5220 = vrot.lane.b32.xlu0 %v10268_v59, %s7939_s10  ;;  %6328 = vrot.lane.b32.xlu1 %v10278_v2, %s7944_s15 }
 0x312   : > { %v10290_v25 = vpop.permute.xlu0 %5710  ;;  %v10292_v29 = vpop.permute.xlu1 %5202 }
 0x313   : > { %13136 = vst [vmem:[#allocation72_spill] sm:$0xff] %v10290_v25  ;;  %13137 = vst [vmem:[#allocation73_spill] sm:$0xff] %v10292_v29  ;;  %v10348_v29 = vld [vmem:[%s12811_s5 + $0x18] sm:$0xff] }
 0x314   : > { %5018 = vrot.lane.b32.xlu0 %v10268_v59, %s7937_s8  ;;  %5414 = vrot.lane.b32.xlu1 %v10278_v2, %s7940_s11  ;;  %v10361_v30 = vrot.slane %v10348_v29, %v13148_v53 }
 0x316   : > { %v10299_v60 = vpop.permute.xlu0 %6324  ;;  %v10301_v20 = vpop.permute.xlu1 %5000  ;;  %13149 = vst [vmem:[#allocation84_spill] sm:$0xff] %v10361_v30 }
 0x317   : > { %13138 = vst [vmem:[#allocation74_spill] sm:$0xff] %v10301_v20 }
 0x318   : > { %4858 = vrot.lane.b32.xlu0 %v10268_v59, %s7938_s9  ;;  %5212 = vrot.lane.b32.xlu1 %v10278_v2, %s7939_s10 }
 0x31a   : > { %v10309_v7 = vpop.permute.xlu0 %6122  ;;  %v10311_v25 = vpop.permute.xlu1 %4840 }
 0x31b   : > { %13139 = vst [vmem:[#allocation75_spill] sm:$0xff] %v10309_v7  ;;  %13140 = vst [vmem:[#allocation76_spill] sm:$0xff] %v10311_v25 }
 0x31c   : > { %5416 = vrot.lane.b32.xlu0 %v10307_v1, %s7940_s11  ;;  %5010 = vrot.lane.b32.xlu1 %v10278_v2, %s7937_s8 }
 0x31e   : > { %v10317_v63 = vpop.permute.xlu0 %5920  ;;  %v10319_v20 = vpop.permute.xlu1 %6116 }
 0x31f   : > { %13141 = vst [vmem:[#allocation77_spill] sm:$0xff] %v10317_v63  ;;  %13142 = vst [vmem:[#allocation78_spill] sm:$0xff] %v10319_v20 }
 0x320   : > { %5214 = vrot.lane.b32.xlu0 %v10307_v1, %s7939_s10  ;;  %4850 = vrot.lane.b32.xlu1 %v10278_v2, %s7938_s9 }
 0x322   : > { %v10325_v47 = vpop.permute.xlu0 %5718  ;;  %v10327_v4 = vpop.permute.xlu1 %5914 }
 0x323   : > { %13143 = vst [vmem:[#allocation79_spill] sm:$0xff] %v10325_v47  ;;  %13144 = vst [vmem:[#allocation80_spill] sm:$0xff] %v10327_v4  ;;  %v4521_v4 = vpop.f32.mrf.mxu1 }
 0x324   : > { %5012 = vrot.lane.b32.xlu0 %v10307_v1, %s7937_s8  ;;  %6126 = vrot.lane.b32.xlu1 %v10278_v2, %s7943_s14 }
 0x325   : > { %v4525_v5 = vpop.f32.mrf.mxu1 }
 0x326   : > { %v10333_v25 = vpop.permute.xlu0 %5404  ;;  %v10335_v63 = vpop.permute.xlu1 %5712 }
 0x327   : > { %13145 = vst [vmem:[#allocation81_spill] sm:$0xff] %v10333_v25  ;;  %13146 = vst [vmem:[#allocation82_spill] sm:$0xff] %v10335_v63  ;;  %v4725_v63 = vadd.f32 %v4521_v4, %v9916_v46  ;;  %v4527_v6 = vpop.f32.mrf.mxu1 }
 0x328   : > { %4852 = vrot.lane.b32.xlu0 %v10307_v1, %s7938_s9  ;;  %5924 = vrot.lane.b32.xlu1 %v10278_v2, %s7942_s13  ;;  %v4733_v48 = vadd.f32 %v4527_v6, %v9927_v32 }
 0x329   : > { %v4781_v4 = vadd.f32 %v9909_v50, %v4725_v63 }
 0x32a   : > { %v10341_v20 = vpop.permute.xlu0 %5210  ;;  %v10343_v47 = vpop.permute.xlu1 %6326  ;;  %v4789_v63 = vadd.f32 %v9894_v22, %v4733_v48 }
 0x32c   : > { %6128 = vrot.lane.b32.xlu0 %v10307_v1, %s7943_s14  ;;  %5722 = vrot.lane.b32.xlu1 %v10278_v2, %s7941_s12  ;;  %v10401_v32 = vmax.f32 %v4789_v63, 0.0 }
 0x32e   : > { %v10355_v7 = vpop.permute.xlu0 %5008  ;;  %v10357_v0 = vpop.permute.xlu1 %5412 }
 0x32f   : > { %13147 = vst [vmem:[#allocation83_spill] sm:$0xff] %v10355_v7  ;;  %v5489_v36 = vsel %vm1791_vm5, %v10333_v25, %v10357_v0  ;;  %v10381_v25 = vmax.f32 %v4781_v4, 0.0 }
 0x330   : > { %5926 = vrot.lane.b32.xlu0 %v10307_v1, %s7942_s13  ;;  %6134 = vrot.lane.b32.xlu1 %v10268_v59, %s7943_s14  ;;  %v5561_v46 = vmul.f32 %v10361_v30, %v5489_v36 }
 0x332   : > { %v10373_v56 = vpop.permute.xlu0 %4848  ;;  %6817 = vmatprep.subr.mxu0 %v5561_v46  ;;  %v10375_v35 = vpop.permute.xlu1 %6124 }
 0x333   : > { %13150 = vst [vmem:[#allocation85_spill] sm:$0xff] %v10373_v56  ;;  %13151 = vst [vmem:[#allocation86_spill] sm:$0xff] %v10375_v35 }
 0x334   : > { %5724 = vrot.lane.b32.xlu0 %v10307_v1, %s7941_s12  ;;  %5932 = vrot.lane.b32.xlu1 %v10268_v59, %s7942_s13 }
 0x336   : > { %v10384_v62 = vpop.permute.xlu0 %6142  ;;  %v10386_v36 = vpop.permute.xlu1 %5922 }
 0x337   : > { %13152 = vst [vmem:[#allocation87_spill] sm:$0xff] %v10384_v62  ;;  %13153 = vst [vmem:[#allocation88_spill] sm:$0xff] %v10386_v36  ;;  %v4531_v36 = vpop.f32.mrf.mxu1 }
 0x338   : > { %6136 = vrot.lane.b32.xlu0 %v10381_v25, %s7943_s14  ;;  %5730 = vrot.lane.b32.xlu1 %v10268_v59, %s7941_s12  ;;  %v4740_v63 = vadd.f32 %v4531_v36, %v9932_v57 }
 0x33a   : > { %v10393_v46 = vpop.permute.xlu0 %5940  ;;  %v10395_v35 = vpop.permute.xlu1 %5720 }
 0x33b   : > { %13154 = vst [vmem:[#allocation89_spill] sm:$0xff] %v10393_v46  ;;  %13155 = vst [vmem:[#allocation90_spill] sm:$0xff] %v10395_v35 }
 0x33c   : > { %5934 = vrot.lane.b32.xlu0 %v10381_v25, %s7942_s13  ;;  %6336 = vrot.lane.b32.xlu1 %v10268_v59, %s7944_s15 }
 0x33e   : > { %v10403_v6 = vpop.permute.xlu0 %5738  ;;  %v10405_v4 = vpop.permute.xlu1 %5430 }
 0x33f   : > { %13156 = vst [vmem:[#allocation91_spill] sm:$0xff] %v10403_v6  ;;  %13157 = vst [vmem:[#allocation92_spill] sm:$0xff] %v10405_v4 }
 0x340   : > { %5426 = vrot.lane.b32.xlu0 %v10401_v32, %s7940_s11  ;;  %6330 = vrot.lane.b32.xlu1 %v10307_v1, %s7944_s15 }
 0x342   : > { %v10411_v48 = vpop.permute.xlu0 %6344  ;;  %v10413_v35 = vpop.permute.xlu1 %5228 }
 0x343   : > { %13158 = vst [vmem:[#allocation93_spill] sm:$0xff] %v10411_v48  ;;  %13159 = vst [vmem:[#allocation94_spill] sm:$0xff] %v10413_v35  ;;  %v4796_v35 = vadd.f32 %v9861_v51, %v4740_v63  ;;  %v4732_v63 = vadd.f32 %v4525_v5, %v9920_v14 }
 0x344   : > { %5224 = vrot.lane.b32.xlu0 %v10401_v32, %s7939_s10  ;;  %5424 = vrot.lane.b32.xlu1 %v10381_v25, %s7940_s11 }
 0x345   : > { %v10437_v57 = vmax.f32 %v4796_v35, 0.0  ;;  %v4788_v35 = vadd.f32 %v9894_v22, %v4732_v63 }
 0x346   : > { %v10420_v4 = vpop.permute.xlu0 %5438  ;;  %v10422_v6 = vpop.permute.xlu1 %6352 }
 0x347   : > { %13160 = vst [vmem:[#allocation95_spill] sm:$0xff] %v10420_v4  ;;  %13161 = vst [vmem:[#allocation96_spill] sm:$0xff] %v10422_v6  ;;  %v10465_v14 = vmax.f32 %v4788_v35, 0.0 }
 0x348   : > { %5022 = vrot.lane.b32.xlu0 %v10401_v32, %s7937_s8  ;;  %5222 = vrot.lane.b32.xlu1 %v10381_v25, %s7939_s10  ;;  %13164 = vst [vmem:[#allocation99_spill] sm:$0xff] %v10437_v57 }
 0x34a   : > { %v10429_v48 = vpop.permute.xlu0 %5740  ;;  %v10431_v46 = vpop.permute.xlu1 %6144 }
 0x34b   : > { %13162 = vst [vmem:[#allocation97_spill] sm:$0xff] %v10429_v48  ;;  %13163 = vst [vmem:[#allocation98_spill] sm:$0xff] %v10431_v46 }
 0x34c   : > { %4862 = vrot.lane.b32.xlu0 %v10401_v32, %s7938_s9  ;;  %5020 = vrot.lane.b32.xlu1 %v10381_v25, %s7937_s8 }
 0x34e   : > { %v10439_v36 = vpop.permute.xlu0 %6346  ;;  %v10441_v4 = vpop.permute.xlu1 %5942 }
 0x34f   : > { %13165 = vst [vmem:[#allocation100_spill] sm:$0xff] %v10439_v36  ;;  %13166 = vst [vmem:[#allocation101_spill] sm:$0xff] %v10441_v4 }
 0x350   : > { %6334 = vrot.lane.b32.xlu0 %v10437_v57, %s7944_s15  ;;  %4860 = vrot.lane.b32.xlu1 %v10381_v25, %s7938_s9 }
 0x352   : > { %v10448_v6 = vpop.permute.xlu0 %5230  ;;  %v10450_v48 = vpop.permute.xlu1 %5432 }
 0x353   : > { %13167 = vst [vmem:[#allocation102_spill] sm:$0xff] %v10448_v6  ;;  %13168 = vst [vmem:[#allocation103_spill] sm:$0xff] %v10450_v48 }
 0x354   : > { %5420 = vrot.lane.b32.xlu0 %v10437_v57, %s7940_s11  ;;  %5732 = vrot.lane.b32.xlu1 %v10381_v25, %s7941_s12 }
 0x356   : > { %v10457_v36 = vpop.permute.xlu0 %5440  ;;  %v10459_v4 = vpop.permute.xlu1 %6354 }
 0x357   : > { %13169 = vst [vmem:[#allocation104_spill] sm:$0xff] %v10457_v36  ;;  %13170 = vst [vmem:[#allocation105_spill] sm:$0xff] %v10459_v4 }
 0x358   : > { %5218 = vrot.lane.b32.xlu0 %v10437_v57, %s7939_s10  ;;  %6338 = vrot.lane.b32.xlu1 %v10381_v25, %s7944_s15 }
 0x35a   : > { %v10467_v5 = vpop.permute.xlu0 %6146  ;;  %v10469_v6 = vpop.permute.xlu1 %5238 }
 0x35b   : > { %13171 = vst [vmem:[#allocation106_spill] sm:$0xff] %v10467_v5  ;;  %13172 = vst [vmem:[#allocation107_spill] sm:$0xff] %v10469_v6  ;;  %v4533_v6 = vpop.f32.mrf.mxu1 }
 0x35c   : > { %5016 = vrot.lane.b32.xlu0 %v10437_v57, %s7937_s8  ;;  %6332 = vrot.lane.b32.xlu1 %v10465_v14, %s7944_s15  ;;  %v4741_v4 = vadd.f32 %v4533_v6, %v9939_v9 }
 0x35e   : > { %v10475_v63 = vpop.permute.xlu0 %5944  ;;  %v10477_v48 = vpop.permute.xlu1 %5434 }
 0x35f   : > { %13173 = vst [vmem:[#allocation108_spill] sm:$0xff] %v10475_v63  ;;  %13174 = vst [vmem:[#allocation109_spill] sm:$0xff] %v10477_v48 }
 0x360   : > { %4856 = vrot.lane.b32.xlu0 %v10437_v57, %s7938_s9  ;;  %5418 = vrot.lane.b32.xlu1 %v10465_v14, %s7940_s11 }
 0x362   : > { %v10483_v35 = vpop.permute.xlu0 %5742  ;;  %v10485_v36 = vpop.permute.xlu1 %5232 }
 0x363   : > { %13175 = vst [vmem:[#allocation110_spill] sm:$0xff] %v10483_v35  ;;  %13176 = vst [vmem:[#allocation111_spill] sm:$0xff] %v10485_v36  ;;  %v4797_v36 = vadd.f32 %v9861_v51, %v4741_v4 }
 0x364   : > { %6132 = vrot.lane.b32.xlu0 %v10437_v57, %s7943_s14  ;;  %5216 = vrot.lane.b32.xlu1 %v10465_v14, %s7939_s10 }
 0x365   : > { %v10509_v9 = vmax.f32 %v4797_v36, 0.0 }
 0x366   : > { %v10492_v48 = vpop.permute.xlu0 %6348  ;;  %v10494_v63 = vpop.permute.xlu1 %6356 }
 0x367   : > { %13177 = vst [vmem:[#allocation112_spill] sm:$0xff] %v10492_v48  ;;  %13178 = vst [vmem:[#allocation113_spill] sm:$0xff] %v10494_v63  ;;  %v4691_v63 = vpop.f32.mrf.mxu1 }
 0x368   : > { %5930 = vrot.lane.b32.xlu0 %v10437_v57, %s7942_s13  ;;  %5014 = vrot.lane.b32.xlu1 %v10465_v14, %s7937_s8  ;;  %13181 = vst [vmem:[#allocation116_spill] sm:$0xff] %v10509_v9  ;;  %v4720_v4 = vadd.f32 %v4691_v63, %v9941_v45 }
 0x369   : > { %v4693_v5 = vpop.f32.mrf.mxu1 }
 0x36a   : > { %v10501_v35 = vpop.permute.xlu0 %5442  ;;  %v10503_v62 = vpop.permute.xlu1 %6148  ;;  %v4776_v36 = vadd.f32 %v9874_v38, %v4720_v4  ;;  %v4721_v63 = vadd.f32 %v4693_v5, %v9947_v34 }
 0x36b   : > { %13179 = vst [vmem:[#allocation114_spill] sm:$0xff] %v10501_v35  ;;  %13180 = vst [vmem:[#allocation115_spill] sm:$0xff] %v10503_v62 }
 0x36c   : > { %5728 = vrot.lane.b32.xlu0 %v10437_v57, %s7941_s12  ;;  %4854 = vrot.lane.b32.xlu1 %v10465_v14, %s7938_s9  ;;  %v10537_v45 = vmax.f32 %v4776_v36, 0.0  ;;  %v4777_v4 = vadd.f32 %v9874_v38, %v4721_v63 }
 0x36e   : > { %v10511_v6 = vpop.permute.xlu0 %5240  ;;  %v10513_v48 = vpop.permute.xlu1 %5946  ;;  %13188 = vst [vmem:[#allocation123_spill] sm:$0xff] %v10537_v45  ;;  %v10557_v34 = vmax.f32 %v4777_v4, 0.0 }
 0x36f   : > { %13182 = vst [vmem:[#allocation117_spill] sm:$0xff] %v10511_v6  ;;  %13183 = vst [vmem:[#allocation118_spill] sm:$0xff] %v10513_v48 }
 0x370   : > { %6140 = vrot.lane.b32.xlu0 %v10509_v9, %s7943_s14  ;;  %6130 = vrot.lane.b32.xlu1 %v10465_v14, %s7943_s14  ;;  %13193 = vst [vmem:[#allocation128_spill] sm:$0xff] %v10557_v34 }
 0x372   : > { %v10520_v35 = vpop.permute.xlu0 %6350  ;;  %v10522_v46 = vpop.permute.xlu1 %5744 }
 0x373   : > { %13184 = vst [vmem:[#allocation119_spill] sm:$0xff] %v10520_v35  ;;  %13185 = vst [vmem:[#allocation120_spill] sm:$0xff] %v10522_v46 }
 0x374   : > { %5938 = vrot.lane.b32.xlu0 %v10509_v9, %s7942_s13  ;;  %5928 = vrot.lane.b32.xlu1 %v10465_v14, %s7942_s13 }
 0x376   : > { %v10529_v6 = vpop.permute.xlu0 %5234  ;;  %v10531_v48 = vpop.permute.xlu1 %5436 }
 0x377   : > { %13186 = vst [vmem:[#allocation121_spill] sm:$0xff] %v10529_v6  ;;  %13187 = vst [vmem:[#allocation122_spill] sm:$0xff] %v10531_v48 }
 0x378   : > { %5736 = vrot.lane.b32.xlu0 %v10509_v9, %s7941_s12  ;;  %5726 = vrot.lane.b32.xlu1 %v10465_v14, %s7941_s12 }
 0x37a   : > { %v10540_v35 = vpop.permute.xlu0 %5444  ;;  %v10542_v46 = vpop.permute.xlu1 %6358 }
 0x37b   : > { %13189 = vst [vmem:[#allocation124_spill] sm:$0xff] %v10540_v35  ;;  %13190 = vst [vmem:[#allocation125_spill] sm:$0xff] %v10542_v46 }
 0x37c   : > { %6360 = vrot.lane.b32.xlu0 %v10537_v45, %s7944_s15  ;;  %6138 = vrot.lane.b32.xlu1 %v10401_v32, %s7943_s14 }
 0x37e   : > { %v10549_v6 = vpop.permute.xlu0 %5422  ;;  %v10551_v48 = vpop.permute.xlu1 %5242 }
 0x37f   : > { %13191 = vst [vmem:[#allocation126_spill] sm:$0xff] %v10549_v6  ;;  %13192 = vst [vmem:[#allocation127_spill] sm:$0xff] %v10551_v48  ;;  %v4697_v48 = vpop.f32.mrf.mxu1 }
 0x380   : > { %5446 = vrot.lane.b32.xlu0 %v10537_v45, %s7940_s11  ;;  %5936 = vrot.lane.b32.xlu1 %v10401_v32, %s7942_s13  ;;  %v4728_v4 = vadd.f32 %v4697_v48, %v9949_v58 }
 0x381   : > { %v4699_v62 = vpop.f32.mrf.mxu1 }
 0x382   : > { %v10559_v5 = vpop.permute.xlu0 %5220  ;;  %v10561_v36 = vpop.permute.xlu1 %6328  ;;  %v4784_v56 = vadd.f32 %v9909_v50, %v4728_v4 }
 0x383   : > { %13194 = vst [vmem:[#allocation129_spill] sm:$0xff] %v10559_v5  ;;  %13195 = vst [vmem:[#allocation130_spill] sm:$0xff] %v10561_v36  ;;  %v4703_v58 = vpop.f32.mrf.mxu1 }
 0x384   : > { %5454 = vrot.lane.b32.xlu0 %v10557_v34, %s7940_s11  ;;  %5734 = vrot.lane.b32.xlu1 %v10401_v32, %s7941_s12  ;;  %v10594_v48 = vmax.f32 %v4784_v56, 0.0  ;;  %v4736_v33 = vadd.f32 %v4703_v58, %v9957_v12 }
 0x386   : > { %v10567_v38 = vpop.permute.xlu0 %5018  ;;  %v10569_v63 = vpop.permute.xlu1 %5414  ;;  %13199 = vst [vmem:[#allocation134_spill] sm:$0xff] %v10594_v48 }
 0x387   : > { %13196 = vst [vmem:[#allocation131_spill] sm:$0xff] %v10567_v38  ;;  %v4729_v38 = vadd.f32 %v4699_v62, %v9955_v13 }
 0x388   : > { %5252 = vrot.lane.b32.xlu0 %v10557_v34, %s7939_s10  ;;  %6340 = vrot.lane.b32.xlu1 %v10401_v32, %s7944_s15 }
 0x38a   : > { %v10576_v35 = vpop.permute.xlu0 %4858  ;;  %v10578_v46 = vpop.permute.xlu1 %5212 }
 0x38b   : > { %13197 = vst [vmem:[#allocation132_spill] sm:$0xff] %v10576_v35  ;;  %v4785_v35 = vadd.f32 %v9909_v50, %v4729_v38  ;;  %v4705_v50 = vpop.f32.mrf.mxu1 }
 0x38c   : > { %5050 = vrot.lane.b32.xlu0 %v10557_v34, %s7937_s8  ;;  %5428 = vrot.lane.b32.xlu1 %v10509_v9, %s7940_s11  ;;  %v4737_v38 = vadd.f32 %v4705_v50, %v9963_v37 }
 0x38d   : > { %v10606_v62 = vmax.f32 %v4785_v35, 0.0 }
 0x38e   : > { %v10586_v18 = vpop.permute.xlu0 %5416  ;;  %v10588_v30 = vpop.permute.xlu1 %5010 }
 0x38f   : > { %13198 = vst [vmem:[#allocation133_spill] sm:$0xff] %v10588_v30  ;;  %13201 = vst [vmem:[#allocation136_spill] sm:$0xff] %v10606_v62 }
 0x390   : > { %4890 = vrot.lane.b32.xlu0 %v10557_v34, %s7938_s9  ;;  %5226 = vrot.lane.b32.xlu1 %v10509_v9, %s7939_s10  ;;  %v4792_v34 = vadd.f32 %v9894_v22, %v4736_v33  ;;  %v4793_v33 = vadd.f32 %v9894_v22, %v4737_v38 }
 0x392   : > { %v10598_v4 = vpop.permute.xlu0 %5214  ;;  %v10600_v13 = vpop.permute.xlu1 %4850  ;;  %v10617_v12 = vmax.f32 %v4792_v34, 0.0  ;;  %v10637_v37 = vmax.f32 %v4793_v33, 0.0 }
 0x393   : > { %13200 = vst [vmem:[#allocation135_spill] sm:$0xff] %v10600_v13 }
 0x394   : > { %6362 = vrot.lane.b32.xlu0 %v10594_v48, %s7944_s15  ;;  %5024 = vrot.lane.b32.xlu1 %v10509_v9, %s7937_s8  ;;  %13204 = vst [vmem:[#allocation139_spill] sm:$0xff] %v10617_v12  ;;  %13209 = vst [vmem:[#allocation144_spill] sm:$0xff] %v10637_v37 }
 0x396   : > { %v10609_v56 = vpop.permute.xlu0 %5012  ;;  %v10611_v30 = vpop.permute.xlu1 %6126 }
 0x397   : > { %13202 = vst [vmem:[#allocation137_spill] sm:$0xff] %v10609_v56  ;;  %13203 = vst [vmem:[#allocation138_spill] sm:$0xff] %v10611_v30  ;;  %v13231_v56 = vld [vmem:[#allocation5_spill] sm:$0xff] }
 0x398   : > { %5456 = vrot.lane.b32.xlu0 %v10606_v62, %s7940_s11  ;;  %4864 = vrot.lane.b32.xlu1 %v10509_v9, %s7938_s9 }
 0x39a   : > { %v10620_v58 = vpop.permute.xlu0 %4852  ;;  %v10622_v35 = vpop.permute.xlu1 %5924 }
 0x39b   : > { %13205 = vst [vmem:[#allocation140_spill] sm:$0xff] %v10620_v58  ;;  %13206 = vst [vmem:[#allocation141_spill] sm:$0xff] %v10622_v35  ;;  %v4709_v35 = vpop.f32.mrf.mxu1  ;;  %v6403_v58 = vsel %vm4262_vm9, %v10282_v21, %v10343_v47 }
 0x39c   : > { %6364 = vrot.lane.b32.xlu0 %v10617_v12, %s7944_s15  ;;  %6342 = vrot.lane.b32.xlu1 %v10509_v9, %s7944_s15  ;;  %v4744_v22 = vadd.f32 %v4709_v35, %v9965_v23 }
 0x39e   : > { %v10629_v30 = vpop.permute.xlu0 %6128  ;;  %v10631_v13 = vpop.permute.xlu1 %5722  ;;  %v4800_v33 = vadd.f32 %v9861_v51, %v4744_v22 }
 0x39f   : > { %13207 = vst [vmem:[#allocation142_spill] sm:$0xff] %v10629_v30  ;;  %13208 = vst [vmem:[#allocation143_spill] sm:$0xff] %v10631_v13  ;;  %v4711_v30 = vpop.f32.mrf.mxu1 }
 0x3a0   : > { %5450 = vrot.lane.b32.xlu0 %v10617_v12, %s7940_s11  ;;  %5448 = vrot.lane.b32.xlu1 %v10594_v48, %s7940_s11  ;;  %v10665_v23 = vmax.f32 %v4800_v33, 0.0  ;;  %v4745_v35 = vadd.f32 %v4711_v30, %v9971_v24 }
 0x3a2   : > { %v10639_v34 = vpop.permute.xlu0 %5926  ;;  %v10641_v50 = vpop.permute.xlu1 %6134  ;;  %13216 = vst [vmem:[#allocation151_spill] sm:$0xff] %v10665_v23  ;;  %v4801_v22 = vadd.f32 %v9861_v51, %v4745_v35 }
 0x3a3   : > { %13210 = vst [vmem:[#allocation145_spill] sm:$0xff] %v10639_v34  ;;  %13211 = vst [vmem:[#allocation146_spill] sm:$0xff] %v10641_v50 }
 0x3a4   : > { %5458 = vrot.lane.b32.xlu0 %v10637_v37, %s7940_s11  ;;  %5254 = vrot.lane.b32.xlu1 %v10606_v62, %s7939_s10  ;;  %v10685_v24 = vmax.f32 %v4801_v22, 0.0 }
 0x3a6   : > { %v10648_v38 = vpop.permute.xlu0 %5724  ;;  %v10650_v13 = vpop.permute.xlu1 %5932  ;;  %13221 = vst [vmem:[#allocation156_spill] sm:$0xff] %v10685_v24 }
 0x3a7   : > { %13212 = vst [vmem:[#allocation147_spill] sm:$0xff] %v10648_v38  ;;  %13213 = vst [vmem:[#allocation148_spill] sm:$0xff] %v10650_v13 }
 0x3a8   : > { %5256 = vrot.lane.b32.xlu0 %v10637_v37, %s7939_s10  ;;  %5052 = vrot.lane.b32.xlu1 %v10606_v62, %s7937_s8 }
 0x3aa   : > { %v10657_v34 = vpop.permute.xlu0 %6136  ;;  %v10659_v50 = vpop.permute.xlu1 %5730 }
 0x3ab   : > { %13214 = vst [vmem:[#allocation149_spill] sm:$0xff] %v10657_v34  ;;  %13215 = vst [vmem:[#allocation150_spill] sm:$0xff] %v10659_v50 }
 0x3ac   : > { %5054 = vrot.lane.b32.xlu0 %v10637_v37, %s7937_s8  ;;  %4892 = vrot.lane.b32.xlu1 %v10606_v62, %s7938_s9 }
 0x3ae   : > { %v10668_v38 = vpop.permute.xlu0 %5934  ;;  %v10670_v13 = vpop.permute.xlu1 %6336 }
 0x3af   : > { %13217 = vst [vmem:[#allocation152_spill] sm:$0xff] %v10668_v38  ;;  %13218 = vst [vmem:[#allocation153_spill] sm:$0xff] %v10670_v13  ;;  %v10710_v38 = vld [vmem:[%s12811_s5 + $0x40] sm:$0xff] }
 0x3b0   : > { %4894 = vrot.lane.b32.xlu0 %v10637_v37, %s7938_s9  ;;  %5452 = vrot.lane.b32.xlu1 %v10665_v23, %s7940_s11  ;;  %13228 = vst [vmem:[#allocation163_spill] sm:$0xff] %v10710_v38  ;;  %v6417_v62 = vrot.slane %v10710_v38, %v13148_v53 }
 0x3b2   : > { %v10677_v50 = vpop.permute.xlu0 %5426  ;;  %v10679_v34 = vpop.permute.xlu1 %6330 }
 0x3b3   : > { %13219 = vst [vmem:[#allocation154_spill] sm:$0xff] %v10677_v50  ;;  %13220 = vst [vmem:[#allocation155_spill] sm:$0xff] %v10679_v34 }
 0x3b4   : > { %6366 = vrot.lane.b32.xlu0 %v10665_v23, %s7944_s15  ;;  %5250 = vrot.lane.b32.xlu1 %v10665_v23, %s7939_s10 }
 0x3b6   : > { %v10687_v30 = vpop.permute.xlu0 %5224  ;;  %v10689_v33 = vpop.permute.xlu1 %5424 }
 0x3b7   : > { %13222 = vst [vmem:[#allocation157_spill] sm:$0xff] %v10687_v30  ;;  %13223 = vst [vmem:[#allocation158_spill] sm:$0xff] %v10689_v33 }
 0x3b8   : > { %5460 = vrot.lane.b32.xlu0 %v10685_v24, %s7940_s11  ;;  %5040 = vrot.lane.b32.xlu1 %v10256_v28, %s7937_s8 }
 0x3ba   : > { %v10695_v51 = vpop.permute.xlu0 %5022  ;;  %v10697_v35 = vpop.permute.xlu1 %5222 }
 0x3bb   : > { %13224 = vst [vmem:[#allocation159_spill] sm:$0xff] %v10695_v51  ;;  %13225 = vst [vmem:[#allocation160_spill] sm:$0xff] %v10697_v35 }
 0x3bc   : > { %5236 = vrot.lane.b32.xlu0 %v10124_v42, %s7939_s10  ;;  %5030 = vrot.lane.b32.xlu1 %v10175_v27, %s7937_s8 }
 0x3be   : > { %v10703_v22 = vpop.permute.xlu0 %4862  ;;  %v10705_v13 = vpop.permute.xlu1 %5020 }
 0x3bf   : > { %13226 = vst [vmem:[#allocation161_spill] sm:$0xff] %v10703_v22  ;;  %13227 = vst [vmem:[#allocation162_spill] sm:$0xff] %v10705_v13  ;;  %v6413_v13 = vrot.slane %v10710_v38, %v13231_v56 }
 0x3c0   : > { %5032 = vrot.lane.b32.xlu0 %v10215_v49, %s7937_s8  ;;  %5258 = vrot.lane.b32.xlu1 %v10685_v24, %s7939_s10 }
 0x3c1   : > { %v6474_v55 = vmul.f32 %v6413_v13, %v6403_v58 }
 0x3c2   : > { %v10720_v9 = vpop.permute.xlu0 %6334  ;;  %v10722_v22 = vpop.permute.xlu1 %4860 }
 0x3c3   : > { %13229 = vst [vmem:[#allocation164_spill] sm:$0xff] %v10720_v9  ;;  %13230 = vst [vmem:[#allocation165_spill] sm:$0xff] %v10722_v22  ;;  %v6399_v57 = vsel %vm4262_vm9, %v10343_v47, %v10720_v9  ;;  %v10739_v22 = vld [vmem:[%s12809_s3] sm:$0xff] }
 0x3c4   : > { %5248 = vrot.lane.b32.xlu0 %v10617_v12, %s7939_s10  ;;  %5246 = vrot.lane.b32.xlu1 %v10594_v48, %s7939_s10  ;;  %v6475_v21 = vmul.f32 %v6417_v62, %v6399_v57  ;;  %13232 = vst [vmem:[#allocation5_spill] sm:$0xff] %v10739_v22  ;;  %v10743_v38 = vcombine.high %v10739_v22, %v10739_v22 }
 0x3c5   : > { %v6397_v22 = vsel %vm4262_vm9, %v10186_v43, %v10679_v34 }
 0x3c6   : > { %13233 = vst [vmem:[#allocation166_spill] sm:$0xff] %v10743_v38  ;;  %v10745_v51 = vpop.permute.xlu0 %5420  ;;  %6912 = vmatprep.subr.mxu1 %v6475_v21  ;;  %v10747_v47 = vpop.permute.xlu1 %5732  ;;  %6881 = vmatprep.mubr.f32.mxu0 %v10743_v38 }
 0x3c7   : > { %13234 = vst [vmem:[#allocation167_spill] sm:$0xff] %v10747_v47  ;;  %6913 = vmatpush1.msra.mxu1 %v6474_v55  ;;  %v6402_v55 = vsel %vm4262_vm9, %v10227_v19, %v10299_v60  ;;  %v6401_v47 = vsel %vm4262_vm9, %v10118_v41, %v10186_v43 }
 0x3c8   : > { %5038 = vrot.lane.b32.xlu0 %v10204_v26, %s7937_s8  ;;  %5056 = vrot.lane.b32.xlu1 %v10685_v24, %s7937_s8  ;;  %v6466_v61 = vmul.f32 %v6413_v13, %v6402_v55  ;;  %v6458_v7 = vmul.f32 %v6413_v13, %v6401_v47 }
 0x3ca   : > { %v10754_v57 = vpop.permute.xlu0 %5218  ;;  %v10756_v58 = vpop.permute.xlu1 %6338 }
 0x3cb   : > { %13235 = vst [vmem:[#allocation168_spill] sm:$0xff] %v10756_v58 }
 0x3cc   : > { %5028 = vrot.lane.b32.xlu0 %v10135_v10, %s7937_s8  ;;  %5036 = vrot.lane.b32.xlu1 %v10164_v40, %s7937_s8 }
 0x3ce   : > { %v10766_v21 = vpop.permute.xlu0 %5016  ;;  %v10768_v9 = vpop.permute.xlu1 %6332 }
 0x3cf   : > { %13236 = vst [vmem:[#allocation169_spill] sm:$0xff] %v10768_v9  ;;  %v6398_v58 = vsel %vm4262_vm9, %v10299_v60, %v10768_v9  ;;  %v6396_v60 = vsel %vm4262_vm9, %v10137_v16, %v10561_v36 }
 0x3d0   : > { %5244 = vrot.lane.b32.xlu0 %v10537_v45, %s7939_s10  ;;  %4896 = vrot.lane.b32.xlu1 %v10685_v24, %s7938_s9  ;;  %v6467_v19 = vmul.f32 %v6417_v62, %v6398_v58  ;;  %v6400_v58 = vsel %vm4262_vm9, %v10072_v31, %v10137_v16  ;;  %v6459_v24 = vmul.f32 %v6417_v62, %v6397_v22 }
 0x3d1   : > { %v6451_v43 = vmul.f32 %v6417_v62, %v6396_v60  ;;  %v6450_v55 = vmul.f32 %v6413_v13, %v6400_v58 }
 0x3d2   : > { %v10790_v9 = vpop.permute.xlu0 %4856  ;;  %6914 = vmatprep.subr.mxu1 %v6467_v19  ;;  %v10792_v34 = vpop.permute.xlu1 %5418 }
 0x3d3   : > { %6915 = vmatpush1.msra.mxu1 %v6466_v61  ;;  %v10809_v61 = vld [vmem:[%s12809_s3 + $0x8] sm:$0xf] }
 0x3d4   : > { %5034 = vrot.lane.b32.xlu0 %v10124_v42, %s7937_s8  ;;  %5026 = vrot.lane.b32.xlu1 %v10087_v8, %s7937_s8  ;;  %13238 = vst [vmem:[#allocation171_spill] sm:$0xff] %v10809_v61 }
 0x3d5   : > { %6916 = vmatprep.subr.mxu1 %v6459_v24 }
 0x3d6   : > { %6917 = vmatpush1.msra.mxu1 %v6458_v7  ;;  %v10802_v19 = vpop.permute.xlu0 %6132  ;;  %v10804_v41 = vpop.permute.xlu1 %5216 }
 0x3d7   : > { %13237 = vst [vmem:[#allocation170_spill] sm:$0xff] %v10802_v19  ;;  %6918 = vmatprep.subr.mxu1 %v6451_v43 }
 0x3d8   : > { %6919 = vmatpush1.msra.mxu1 %v6450_v55  ;;  %4872 = vrot.lane.b32.xlu0 %v10215_v49, %s7938_s9 }
 0x3d9   : > { %5048 = vrot.lane.b32.xlu1 %v10665_v23, %s7937_s8  ;;  %7870 = vmatmul.mubr.msk.f32.vlgmr.msra.gmra.mxu1 %vm6814_vm10, %v10809_v61 }
 0x3da   : > { %v10817_v16 = vpop.permute.xlu0 %5930  ;;  %v10819_v7 = vpop.permute.xlu1 %5014  ;;  %7023 = vmatprep.mubr.f32.mxu1 %v10743_v38 }
 0x3db   : > { %13239 = vst [vmem:[#allocation172_spill] sm:$0xff] %v10817_v16 }
 0x3dc   : > { %5046 = vrot.lane.b32.xlu0 %v10617_v12, %s7937_s8 }
 0x3dd   : > { %4880 = vrot.lane.b32.xlu1 %v10256_v28, %s7938_s9 }
 0x3de   : > { %v10826_v13 = vpop.permute.xlu0 %5728  ;;  %v10828_v62 = vpop.permute.xlu1 %4854 }
 0x3df   : > { %13240 = vst [vmem:[#allocation173_spill] sm:$0xff] %v10826_v13 }
 0x3e0   : > { %4878 = vrot.lane.b32.xlu0 %v10204_v26, %s7938_s9 }
 0x3e1   : > { %4870 = vrot.lane.b32.xlu1 %v10175_v27, %s7938_s9 }
 0x3e2   : > { %v10834_v24 = vpop.permute.xlu0 %6140  ;;  %v10836_v22 = vpop.permute.xlu1 %6130 }
 0x3e3   : > { %13241 = vst [vmem:[#allocation174_spill] sm:$0xff] %v10836_v22 }
 0x3e4   : > { %4868 = vrot.lane.b32.xlu0 %v10135_v10, %s7938_s9 }
 0x3e5   : > { %5044 = vrot.lane.b32.xlu1 %v10594_v48, %s7937_s8 }
 0x3e6   : > { %v10842_v47 = vpop.permute.xlu0 %5938  ;;  %v10844_v60 = vpop.permute.xlu1 %5928 }
 0x3e7   : > { %13242 = vst [vmem:[#allocation175_spill] sm:$0xff] %v10842_v47  ;;  %13243 = vst [vmem:[#allocation176_spill] sm:$0xff] %v10844_v60  ;;  %v10945_v60 = vld [vmem:[%s12811_s5 + $0x8] sm:$0xff] }
 0x3e8   : > { %5042 = vrot.lane.b32.xlu0 %v10537_v45, %s7937_s8  ;;  %13259 = vst [vmem:[#allocation190_spill] sm:$0xff] %v10945_v60  ;;  %v10999_v47 = vrot.slane %v10945_v60, %v13148_v53 }
 0x3e9   : > { %4876 = vrot.lane.b32.xlu1 %v10164_v40, %s7938_s9 }
 0x3ea   : > { %v10850_v58 = vpop.permute.xlu0 %5736  ;;  %v10852_v43 = vpop.permute.xlu1 %5726 }
 0x3eb   : > { %13244 = vst [vmem:[#allocation177_spill] sm:$0xff] %v10850_v58  ;;  %13245 = vst [vmem:[#allocation178_spill] sm:$0xff] %v10852_v43 }
 0x3ec   : > { %4874 = vrot.lane.b32.xlu0 %v10124_v42, %s7938_s9 }
 0x3ed   : > { %4866 = vrot.lane.b32.xlu1 %v10087_v8, %s7938_s9 }
 0x3ee   : > { %v10858_v55 = vpop.permute.xlu0 %6360  ;;  %v10860_v31 = vpop.permute.xlu1 %6138 }
 0x3ef   : > { %13246 = vst [vmem:[#allocation179_spill] sm:$0xff] %v10858_v55  ;;  %v13254_v55 = vld [vmem:[#allocation6_spill] sm:$0xff] }
 0x3f0   : > { %4886 = vrot.lane.b32.xlu0 %v10617_v12, %s7938_s9  ;;  %v5511_v43 = vrot.slane %v10348_v29, %v13254_v55 }
 0x3f1   : > { %4888 = vrot.lane.b32.xlu1 %v10665_v23, %s7938_s9 }
 0x3f2   : > { %v10866_v10 = vpop.permute.xlu0 %5446  ;;  %v10868_v27 = vpop.permute.xlu1 %5936 }
 0x3f3   : > { %13247 = vst [vmem:[#allocation180_spill] sm:$0xff] %v10866_v10  ;;  %13248 = vst [vmem:[#allocation181_spill] sm:$0xff] %v10868_v27  ;;  %v5485_v10 = vsel %vm1791_vm5, %v10357_v0, %v10745_v51 }
 0x3f4   : > { %6164 = vrot.lane.b32.xlu0 %v10665_v23, %s7943_s14 }
 0x3f5   : > { %6156 = vrot.lane.b32.xlu1 %v10256_v28, %s7943_s14 }
 0x3f6   : > { %v10874_v8 = vpop.permute.xlu0 %5454  ;;  %v10876_v49 = vpop.permute.xlu1 %5734 }
 0x3f7   : > { %13249 = vst [vmem:[#allocation182_spill] sm:$0xff] %v10874_v8  ;;  %13250 = vst [vmem:[#allocation183_spill] sm:$0xff] %v10876_v49  ;;  %v5480_v8 = vsel %vm1791_vm5, %v10792_v34, %v10677_v50  ;;  %v5479_v50 = vsel %vm1791_vm5, %v10586_v18, %v10689_v33 }
 0x3f8   : > { %6154 = vrot.lane.b32.xlu0 %v10204_v26, %s7943_s14  ;;  %v5555_v33 = vmul.f32 %v5511_v43, %v5480_v8  ;;  %v10956_v8 = vld [vmem:[%s12811_s5 + $0x38] sm:$0xff] }
 0x3f9   : > { %4884 = vrot.lane.b32.xlu1 %v10594_v48, %s7938_s9 }
 0x3fa   : > { %v10882_v36 = vpop.permute.xlu0 %5252  ;;  %v10884_v38 = vpop.permute.xlu1 %6340 }
 0x3fb   : > { %13251 = vst [vmem:[#allocation184_spill] sm:$0xff] %v10882_v36  ;;  %13252 = vst [vmem:[#allocation185_spill] sm:$0xff] %v10884_v38  ;;  %v13256_v36 = vld [vmem:[#allocation7_spill] sm:$0xff] }
 0x3fc   : > { %4882 = vrot.lane.b32.xlu0 %v10537_v45, %s7938_s9  ;;  %v5507_v38 = vrot.slane %v10348_v29, %v13256_v36  ;;  %v7865_v29 = vld [vmem:[%s12811_s5 + $0x20] sm:$0xff] }
 0x3fd   : > { %6162 = vrot.lane.b32.xlu1 %v10617_v12, %s7943_s14 }
 0x3fe   : > { %v10894_v61 = vpop.permute.xlu0 %5050  ;;  %v10898_v49 = vpop.permute.xlu1 %5428  ;;  %v5562_v58 = vmul.f32 %v5507_v38, %v5485_v10  ;;  %v5478_v10 = vsel %vm1791_vm5, %v10569_v63, %v10549_v6  ;;  %v5482_v6 = vsel %vm1791_vm5, %v10081_v44, %v10569_v63 }
 0x3ff   : > { %13253 = vst [vmem:[#allocation186_spill] sm:$0xff] %v10894_v61  ;;  %13255 = vst [vmem:[#allocation187_spill] sm:$0xff] %v10898_v49  ;;  %v5481_v0 = vsel %vm1791_vm5, %v10745_v51, %v10898_v49  ;;  %v5484_v61 = vsel %vm1791_vm5, %v10238_v39, %v10792_v34  ;;  %v10928_v34 = vld [vmem:[%s12811_s5 + $0x10] sm:$0xff]  ;;  %v5483_v51 = vsel %vm1791_vm5, %v10188_v15, %v10586_v18 }
 0x400   : > { %v5563_v13 = vmul.f32 %v5511_v43, %v5481_v0  ;;  %6160 = vrot.lane.b32.xlu0 %v10594_v48, %s7943_s14  ;;  %v5554_v27 = vmul.f32 %v5507_v38, %v5484_v61  ;;  %v10948_v18 = vrot.slane %v7865_v29, %v13256_v36  ;;  %v5547_v61 = vmul.f32 %v5511_v43, %v5479_v50  ;;  %v10985_v50 = vld [vmem:[%s12811_s5 + $0x28] sm:$0xff] }
 0x401   : > { %6152 = vrot.lane.b32.xlu1 %v10164_v40, %s7943_s14  ;;  %v10980_v63 = vrot.slane %v10928_v34, %v13148_v53  ;;  %v11003_v39 = vrot.slane %v10956_v8, %v13231_v56  ;;  %v5538_v22 = vmul.f32 %v5507_v38, %v5482_v6  ;;  %v11023_v6 = vrot.slane %v10985_v50, %v13231_v56 }
 0x402   : > { %v10934_v0 = vpop.permute.xlu0 %4890  ;;  %6959 = vmatprep.subr.mxu1 %v5563_v13  ;;  %v10936_v49 = vpop.permute.xlu1 %5226  ;;  %v10951_v13 = vrot.slane %v7865_v29, %v13231_v56 }
 0x403   : > { %13257 = vst [vmem:[#allocation188_spill] sm:$0xff] %v10934_v0  ;;  %13258 = vst [vmem:[#allocation189_spill] sm:$0xff] %v10936_v49  ;;  %6960 = vmatpush1.msra.mxu1 %v5562_v58  ;;  %v10965_v58 = vrot.slane %v7865_v29, %v13254_v55  ;;  %v5546_v0 = vmul.f32 %v5507_v38, %v5483_v51  ;;  %v5279_v16 = vsel %vm1291_vm4, %v10754_v57, %v10936_v49 }
 0x404   : > { %13260 = vst [vmem:[#allocation191_spill] sm:$0xff] %v10951_v13  ;;  %6158 = vrot.lane.b32.xlu0 %v10537_v45, %s7943_s14  ;;  %6961 = vmatprep.subr.mxu1 %v5555_v33  ;;  %v10970_v13 = vld [vmem:[%s12811_s5 + $0x30] sm:$0xff]  ;;  %v5283_v33 = vsel %vm1291_vm4, %v10341_v20, %v10754_v57  ;;  %v5309_v29 = vrot.slane %v10928_v34, %v13254_v55  ;;  %13262 = vst [vmem:[#allocation193_spill] sm:$0xff] %v11023_v6 }
 0x405   : > { %6150 = vrot.lane.b32.xlu1 %v10124_v42, %s7943_s14  ;;  %6962 = vmatpush1.msra.mxu1 %v5554_v27  ;;  %v5539_v49 = vmul.f32 %v5511_v43, %v5478_v10  ;;  %v5305_v57 = vrot.slane %v10928_v34, %v13256_v36  ;;  %v11013_v43 = vrot.slane %v10970_v13, %v13231_v56 }
 0x406   : > { %v10993_v51 = vpop.permute.xlu0 %6362  ;;  %6963 = vmatprep.subr.mxu1 %v5547_v61  ;;  %v10995_v27 = vpop.permute.xlu1 %5024  ;;  %v5278_v61 = vsel %vm1291_vm4, %v10804_v41, %v10687_v30  ;;  %v5282_v10 = vsel %vm1291_vm4, %v10248_v54, %v10804_v41  ;;  %v5277_v38 = vsel %vm1291_vm4, %v10598_v4, %v10697_v35  ;;  %v5281_v41 = vsel %vm1291_vm4, %v10196_v52, %v10598_v4 }
 0x407   : > { %13261 = vst [vmem:[#allocation192_spill] sm:$0xff] %v10993_v51  ;;  %6964 = vmatpush1.msra.mxu1 %v5546_v0  ;;  %v5361_v51 = vmul.f32 %v5309_v29, %v5279_v16  ;;  %v5360_v0 = vmul.f32 %v5305_v57, %v5283_v33  ;;  %v5353_v30 = vmul.f32 %v5309_v29, %v5278_v61 }
 0x408   : > { %5954 = vrot.lane.b32.xlu0 %v10256_v28, %s7942_s13  ;;  %6965 = vmatprep.subr.mxu1 %v5539_v49  ;;  %v11041_v53 = vmul.f32 %v10965_v58, %v10268_v59  ;;  %v11045_v33 = vmul.f32 %v10948_v18, %v10278_v2  ;;  %v5352_v4 = vmul.f32 %v5305_v57, %v5282_v10 }
 0x409   : > { %5962 = vrot.lane.b32.xlu1 %v10665_v23, %s7942_s13  ;;  %6966 = vmatpush1.msra.mxu1 %v5538_v22  ;;  %v5276_v22 = vsel %vm1291_vm4, %v10578_v46, %v10559_v5  ;;  %v11057_v61 = vmul.f32 %v10948_v18, %v10307_v1  ;;  %v5280_v59 = vsel %vm1291_vm4, %v10091_v17, %v10578_v46  ;;  %v13273_v5 = vld [vmem:[#allocation29_spill] sm:$0xff] }
 0x40a   : > { %v11035_v49 = vpop.permute.xlu0 %5456  ;;  %6967 = vmatprep.subr.mxu1 %v5361_v51  ;;  %v11037_v16 = vpop.permute.xlu1 %4864  ;;  %13264 = vst [vmem:[#allocation195_spill] sm:$0xff] %v11041_v53  ;;  %13265 = vst [vmem:[#allocation196_spill] sm:$0xff] %v11045_v33  ;;  %v11053_v51 = vmul.f32 %v10965_v58, %v10381_v25  ;;  %v5345_v2 = vmul.f32 %v5309_v29, %v5277_v38  ;;  %v11067_v10 = vmul.f32 %v10948_v18, %v10465_v14  ;;  %v13274_v53 = vld [vmem:[#allocation159_spill] sm:$0xff] }
 0x40b   : > { %13263 = vst [vmem:[#allocation194_spill] sm:$0xff] %v11037_v16  ;;  %6968 = vmatpush1.msra.mxu1 %v5360_v0  ;;  %13267 = vst [vmem:[#allocation198_spill] sm:$0xff] %v11057_v61  ;;  %v5344_v25 = vmul.f32 %v5305_v57, %v5281_v41  ;;  %v5077_v1 = vsel %vm429_vm0, %v10766_v21, %v10995_v27  ;;  %v11077_v46 = vmul.f32 %v10965_v58, %v10401_v32 }
 0x40c   : > { %13266 = vst [vmem:[#allocation197_spill] sm:$0xff] %v11053_v51  ;;  %6170 = vrot.lane.b32.xlu0 %v10637_v37, %s7943_s14  ;;  %6969 = vmatprep.subr.mxu1 %v5353_v30  ;;  %13268 = vst [vmem:[#allocation199_spill] sm:$0xff] %v11067_v10  ;;  %v5486_v14 = vsel %vm1791_vm5, %v10070_v3, %v10081_v44  ;;  %v13270_v30 = vld [vmem:[#allocation83_spill] sm:$0xff]  ;;  %v5107_v0 = vrot.slane %v10945_v60, %v13254_v55  ;;  %v13288_v10 = vld [vmem:[#allocation33_spill] sm:$0xff] }
 0x40d   : > { %5952 = vrot.lane.b32.xlu1 %v10204_v26, %s7942_s13  ;;  %6970 = vmatpush1.msra.mxu1 %v5352_v4  ;;  %13269 = vst [vmem:[#allocation200_spill] sm:$0xff] %v11077_v46  ;;  %v5081_v38 = vsel %vm429_vm0, %v13270_v30, %v10766_v21  ;;  %v5337_v32 = vmul.f32 %v5309_v29, %v5276_v22  ;;  %v13290_v46 = vld [vmem:[#allocation131_spill] sm:$0xff]  ;;  %v13324_v30 = vld [vmem:[#allocation132_spill] sm:$0xff] }
 0x40e   : > { %v11089_v41 = vpop.permute.xlu0 %6364  ;;  %6971 = vmatprep.subr.mxu1 %v5345_v2  ;;  %v11091_v4 = vpop.permute.xlu1 %6342  ;;  %v5284_v35 = vsel %vm1291_vm4, %v13273_v5, %v10091_v17  ;;  %v5336_v44 = vmul.f32 %v5305_v57, %v5280_v59  ;;  %v5103_v33 = vrot.slane %v10945_v60, %v13256_v36  ;;  %v5076_v21 = vsel %vm429_vm0, %v10819_v7, %v13274_v53  ;;  %v13275_v2 = vld [vmem:[#allocation67_spill] sm:$0xff]  ;;  %v13278_v59 = vld [vmem:[#allocation162_spill] sm:$0xff]  ;;  %v13321_v5 = vld [vmem:[#allocation48_spill] sm:$0xff] }
 0x40f   : > { %13271 = vst [vmem:[#allocation201_spill] sm:$0xff] %v11089_v41  ;;  %13272 = vst [vmem:[#allocation202_spill] sm:$0xff] %v11091_v4  ;;  %6972 = vmatpush1.msra.mxu1 %v5344_v25  ;;  %v5080_v29 = vsel %vm429_vm0, %v13275_v2, %v10819_v7  ;;  %v5159_v22 = vmul.f32 %v5107_v0, %v5077_v1  ;;  %v13276_v17 = vld [vmem:[#allocation99_spill] sm:$0xff]  ;;  %v13279_v4 = vld [vmem:[#allocation137_spill] sm:$0xff] }
 0x410   : > { %5960 = vrot.lane.b32.xlu0 %v10617_v12, %s7942_s13  ;;  %6973 = vmatprep.subr.mxu1 %v5337_v32  ;;  %v11111_v57 = vmul.f32 %v10948_v18, %v13276_v17  ;;  %v5075_v53 = vsel %vm429_vm0, %v13279_v4, %v13278_v59  ;;  %v5158_v25 = vmul.f32 %v5103_v33, %v5081_v38  ;;  %v13280_v41 = vld [vmem:[#allocation136_spill] sm:$0xff]  ;;  %v13283_v32 = vld [vmem:[#allocation55_spill] sm:$0xff]  ;;  %v13318_v60 = vld [vmem:[#allocation46_spill] sm:$0xff] }
 0x411   : > { %6168 = vrot.lane.b32.xlu1 %v13280_v41, %s7943_s14  ;;  %6974 = vmatpush1.msra.mxu1 %v5336_v44  ;;  %v13281_v7 = vld [vmem:[#allocation116_spill] sm:$0xff]  ;;  %v5079_v18 = vsel %vm429_vm0, %v13283_v32, %v13279_v4  ;;  %v5151_v59 = vmul.f32 %v5107_v0, %v5076_v21  ;;  %v11135_v44 = vmul.f32 %v10980_v63, %v5284_v35  ;;  %v13293_v35 = vld [vmem:[#allocation35_spill] sm:$0xff] }
 0x412   : > { %13277 = vst [vmem:[#allocation67_spill] sm:$0xff] %v11111_v57  ;;  %v11121_v1 = vmul.f32 %v10965_v58, %v13281_v7  ;;  %v11127_v17 = vpop.permute.xlu0 %5450  ;;  %6975 = vmatprep.subr.mxu1 %v5159_v22  ;;  %v11129_v61 = vpop.permute.xlu1 %5448  ;;  %v13286_v38 = vld [vmem:[#allocation84_spill] sm:$0xff]  ;;  %v13289_v58 = vld [vmem:[#allocation31_spill] sm:$0xff]  ;;  %v13291_v57 = vld [vmem:[#allocation133_spill] sm:$0xff]  ;;  %v5150_v22 = vmul.f32 %v5103_v33, %v5080_v29  ;;  %v5143_v29 = vmul.f32 %v5107_v0, %v5075_v53 }
 0x413   : > { %13284 = vst [vmem:[#allocation137_spill] sm:$0xff] %v11127_v17  ;;  %13285 = vst [vmem:[#allocation116_spill] sm:$0xff] %v11129_v61  ;;  %v11132_v51 = vmul.f32 %v13286_v38, %v5486_v14  ;;  %v5082_v7 = vsel %vm429_vm0, %v13289_v58, %v13288_v10  ;;  %v5074_v4 = vsel %vm429_vm0, %v13291_v57, %v13290_v46  ;;  %6976 = vmatpush1.msra.mxu1 %v5158_v25  ;;  %v13294_v21 = vld [vmem:[#allocation32_spill] sm:$0xff]  ;;  %v13295_v46 = vld [vmem:[#allocation9_spill] sm:$0xff] }
 0x414   : > { %13282 = vst [vmem:[#allocation99_spill] sm:$0xff] %v11121_v1  ;;  %13287 = vst [vmem:[#allocation55_spill] sm:$0xff] %v11135_v44  ;;  %v11149_v14 = vsel %vm1791_vm5, %v11129_v61, %v11035_v49  ;;  %v4922_v17 = vsel %vm354_vm3, %v13294_v21, %v13293_v35  ;;  %v5078_v58 = vsel %vm429_vm0, %v13288_v10, %v13291_v57  ;;  %5950 = vrot.lane.b32.xlu0 %v10164_v40, %s7942_s13  ;;  %v13296_v44 = vld [vmem:[#allocation163_spill] sm:$0xff]  ;;  %v13299_v57 = vld [vmem:[#allocation34_spill] sm:$0xff] }
 0x415   : > { %13292 = vst [vmem:[#allocation84_spill] sm:$0xff] %v11149_v14  ;;  %6977 = vmatprep.subr.mxu1 %v5151_v59  ;;  %v11163_v61 = vrot.slane %v13296_v44, %v13295_v46  ;;  %v5142_v25 = vmul.f32 %v5103_v33, %v5079_v18  ;;  %v4917_v14 = vsel %vm354_vm3, %v10790_v9, %v11037_v16  ;;  %v13298_v10 = vld [vmem:[#allocation43_spill] sm:$0xff]  ;;  %v13300_v53 = vld [vmem:[#allocation85_spill] sm:$0xff] }
 0x416   : > { %5958 = vrot.lane.b32.xlu1 %v10594_v48, %s7942_s13  ;;  %6978 = vmatpush1.msra.mxu1 %v5150_v22  ;;  %v6198_v59 = vsel %vm3762_vm8, %v13299_v57, %v13298_v10  ;;  %v4921_v46 = vsel %vm354_vm3, %v13300_v53, %v10790_v9  ;;  %v11179_v18 = vpop.permute.xlu0 %5458  ;;  %v11181_v21 = vpop.permute.xlu1 %5254  ;;  %v5135_v16 = vmul.f32 %v5107_v0, %v5074_v4  ;;  %v13303_v22 = vld [vmem:[#allocation45_spill] sm:$0xff]  ;;  %v13306_v53 = vld [vmem:[#allocation11_spill] sm:$0xff] }
 0x417   : > { %13297 = vst [vmem:[#allocation33_spill] sm:$0xff] %v11163_v61  ;;  %13301 = vst [vmem:[#allocation133_spill] sm:$0xff] %v11179_v18  ;;  %6979 = vmatprep.subr.mxu1 %v5143_v29  ;;  %v11184_v44 = vmul.f32 %v10999_v47, %v5082_v7  ;;  %v13304_v61 = vld [vmem:[#allocation36_spill] sm:$0xff]  ;;  %v5134_v57 = vmul.f32 %v5103_v33, %v5078_v58  ;;  %v13305_v10 = vld [vmem:[#allocation161_spill] sm:$0xff]  ;;  %v11195_v29 = vmul.f32 %v4922_v17, %v13306_v53 }
 0x418   : > { %v5996_v1 = vsel %vm3262_vm7, %v13304_v61, %v13303_v22  ;;  %v4916_v9 = vsel %vm354_vm3, %v10828_v62, %v13305_v10  ;;  %6980 = vmatpush1.msra.mxu1 %v5142_v25  ;;  %v13308_v0 = vld [vmem:[#allocation51_spill] sm:$0xff]  ;;  %v13309_v4 = vld [vmem:[#allocation69_spill] sm:$0xff]  ;;  %v13310_v33 = vld [vmem:[#allocation16_spill] sm:$0xff]  ;;  %v11209_v25 = vmul.f32 %v11003_v39, %v6198_v59 }
 0x419   : > { %13302 = vst [vmem:[#allocation35_spill] sm:$0xff] %v11184_v44  ;;  %13307 = vst [vmem:[#allocation11_spill] sm:$0xff] %v11195_v29  ;;  %v5487_v7 = vsel %vm1791_vm5, %v13308_v0, %v10188_v15  ;;  %v4920_v61 = vsel %vm354_vm3, %v13309_v4, %v10828_v62  ;;  %v4957_v58 = vmul.f32 %v4917_v14, %v13310_v33  ;;  %v13311_v22 = vld [vmem:[#allocation128_spill] sm:$0xff]  ;;  %6981 = vmatprep.subr.mxu1 %v5135_v16  ;;  %v13313_v17 = vld [vmem:[#allocation165_spill] sm:$0xff] }
 0x41a   : > { %6166 = vrot.lane.b32.xlu0 %v13311_v22, %s7943_s14  ;;  %13312 = vst [vmem:[#allocation51_spill] sm:$0xff] %v11209_v25  ;;  %v13314_v10 = vld [vmem:[#allocation140_spill] sm:$0xff]  ;;  %v13315_v15 = vld [vmem:[#allocation17_spill] sm:$0xff]  ;;  %5948 = vrot.lane.b32.xlu1 %v10124_v42, %s7942_s13  ;;  %v11219_v62 = vmul.f32 %v11013_v43, %v5996_v1  ;;  %v13319_v59 = vld [vmem:[#allocation58_spill] sm:$0xff] }
 0x41b   : > { %v4915_v29 = vsel %vm354_vm3, %v13314_v10, %v13313_v17  ;;  %v4956_v44 = vmul.f32 %v4921_v46, %v13315_v15  ;;  %6982 = vmatpush1.msra.mxu1 %v5134_v57  ;;  %v13317_v14 = vld [vmem:[#allocation53_spill] sm:$0xff]  ;;  %v4919_v25 = vsel %vm354_vm3, %v13319_v59, %v13314_v10  ;;  %v11229_v17 = vpop.permute.xlu0 %5256  ;;  %v11231_v46 = vpop.permute.xlu1 %5052  ;;  %v4949_v57 = vmul.f32 %v4916_v9, %v13310_v33  ;;  %v13322_v1 = vld [vmem:[#allocation39_spill] sm:$0xff] }
 0x41c   : > { %13316 = vst [vmem:[#allocation69_spill] sm:$0xff] %v11219_v62  ;;  %v6199_v16 = vsel %vm3762_vm8, %v13318_v60, %v13317_v14  ;;  %6983 = vmatprep.subr.mxu1 %v4957_v58  ;;  %13320 = vst [vmem:[#allocation16_spill] sm:$0xff] %v11231_v46  ;;  %v11238_v62 = vsel %vm2762_vm6, %v13322_v1, %v13321_v5  ;;  %v13325_v60 = vld [vmem:[#allocation135_spill] sm:$0xff]  ;;  %v4948_v10 = vmul.f32 %v4920_v61, %v13315_v15  ;;  %v13326_v46 = vld [vmem:[#allocation40_spill] sm:$0xff] }
 0x41d   : > { %13323 = vst [vmem:[#allocation140_spill] sm:$0xff] %v11238_v62  ;;  %v4914_v14 = vsel %vm354_vm3, %v13325_v60, %v13324_v30  ;;  %6984 = vmatpush1.msra.mxu1 %v4956_v44  ;;  %v11246_v58 = vmul.f32 %v13286_v38, %v5487_v7  ;;  %v5285_v9 = vsel %vm1291_vm4, %v13326_v46, %v10196_v52  ;;  %v13328_v30 = vld [vmem:[#allocation115_spill] sm:$0xff]  ;;  %v13333_v5 = vld [vmem:[#allocation106_spill] sm:$0xff] }
 0x41e   : > { %v4918_v1 = vsel %vm354_vm3, %v13293_v35, %v13325_v60  ;;  %5956 = vrot.lane.b32.xlu0 %v10537_v45, %s7942_s13  ;;  %6985 = vmatprep.subr.mxu1 %v4949_v57  ;;  %v4941_v61 = vmul.f32 %v4915_v29, %v13310_v33  ;;  %v11260_v44 = vmul.f32 %v11003_v39, %v6199_v16  ;;  %v13329_v60 = vld [vmem:[#allocation42_spill] sm:$0xff] }
 0x41f   : > { %v4940_v7 = vmul.f32 %v4919_v25, %v13315_v15  ;;  %v6189_v52 = vsel %vm3762_vm8, %v10834_v24, %v13328_v30  ;;  %5760 = vrot.lane.b32.xlu1 %v10665_v23, %s7941_s12  ;;  %6986 = vmatpush1.msra.mxu1 %v4948_v10  ;;  %v5083_v35 = vsel %vm429_vm0, %v13329_v60, %v13283_v32  ;;  %v11277_v25 = vpop.permute.xlu0 %5054  ;;  %v11279_v16 = vpop.permute.xlu1 %4892  ;;  %v13331_v23 = vld [vmem:[#allocation56_spill] sm:$0xff]  ;;  %v13332_v30 = vld [vmem:[#allocation49_spill] sm:$0xff] }
 0x420   : > { %13327 = vst [vmem:[#allocation17_spill] sm:$0xff] %v11260_v44  ;;  %v6193_v29 = vsel %vm3762_vm8, %v10802_v19, %v10834_v24  ;;  %6987 = vmatprep.subr.mxu1 %v4941_v61  ;;  %13330 = vst [vmem:[#allocation58_spill] sm:$0xff] %v11279_v16  ;;  %v4933_v57 = vmul.f32 %v4914_v14, %v13310_v33  ;;  %v6223_v10 = vrot.slane %v10956_v8, %v13254_v55  ;;  %v13334_v33 = vld [vmem:[#allocation59_spill] sm:$0xff]  ;;  %v13335_v14 = vld [vmem:[#allocation52_spill] sm:$0xff] }
 0x421   : > { %v5997_v32 = vsel %vm3262_vm7, %v13332_v30, %v13331_v23  ;;  %v4932_v62 = vmul.f32 %v4918_v1, %v13315_v15  ;;  %v6219_v24 = vrot.slane %v10956_v8, %v13256_v36  ;;  %v6188_v61 = vsel %vm3762_vm8, %v10860_v31, %v13333_v5  ;;  %6988 = vmatpush1.msra.mxu1 %v4940_v7  ;;  %v13336_v19 = vld [vmem:[#allocation174_spill] sm:$0xff]  ;;  %v13337_v1 = vld [vmem:[#allocation44_spill] sm:$0xff]  ;;  %v13339_v23 = vld [vmem:[#allocation149_spill] sm:$0xff] }
 0x422   : > { %v5795_v44 = vsel %vm2762_vm6, %v13335_v14, %v13334_v33  ;;  %v6192_v30 = vsel %vm3762_vm8, %v13336_v19, %v10860_v31  ;;  %5752 = vrot.lane.b32.xlu0 %v10256_v28, %s7941_s12  ;;  %6989 = vmatprep.subr.mxu1 %v4933_v57  ;;  %v6275_v15 = vmul.f32 %v6223_v10, %v6189_v52  ;;  %v13338_v5 = vld [vmem:[#allocation98_spill] sm:$0xff] }
 0x423   : > { %v4923_v7 = vsel %vm354_vm3, %v13337_v1, %v13319_v59  ;;  %v6187_v14 = vsel %vm3762_vm8, %v13339_v23, %v13338_v5  ;;  %v6274_v33 = vmul.f32 %v6219_v24, %v6193_v29  ;;  %5750 = vrot.lane.b32.xlu1 %v10204_v26, %s7941_s12  ;;  %6990 = vmatpush1.msra.mxu1 %v4932_v62  ;;  %v13341_v52 = vld [vmem:[#allocation142_spill] sm:$0xff]  ;;  %v11322_v28 = vpop.permute.xlu0 %4894  ;;  %v11324_v59 = vpop.permute.xlu1 %5452  ;;  %v13345_v62 = vld [vmem:[#allocation87_spill] sm:$0xff] }
 0x424   : > { %v11316_v31 = vmul.f32 %v11013_v43, %v5997_v32  ;;  %v6191_v57 = vsel %vm3762_vm8, %v13341_v52, %v13339_v23  ;;  %13342 = vst [vmem:[#allocation40_spill] sm:$0xff] %v11322_v28  ;;  %6991 = vmatprep.subr.mxu1 %v6275_v15  ;;  %13343 = vst [vmem:[#allocation42_spill] sm:$0xff] %v11324_v59  ;;  %v6267_v19 = vmul.f32 %v6223_v10, %v6188_v61  ;;  %v13346_v32 = vld [vmem:[#allocation146_spill] sm:$0xff]  ;;  %v13353_v52 = vld [vmem:[#allocation175_spill] sm:$0xff] }
 0x425   : > { %v11327_v29 = vmul.f32 %v10980_v63, %v5285_v9  ;;  %v11330_v26 = vmul.f32 %v11023_v6, %v5795_v44  ;;  %v6186_v5 = vsel %vm3762_vm8, %v13346_v32, %v13345_v62  ;;  %6992 = vmatpush2.msra.mxu1 %v6274_v33  ;;  %v11337_v23 = vmul.f32 %v10999_v47, %v5083_v35  ;;  %v13348_v15 = vld [vmem:[#allocation138_spill] sm:$0xff]  ;;  %v13351_v62 = vld [vmem:[#allocation60_spill] sm:$0xff] }
 0x426   : > { %13340 = vst [vmem:[#allocation135_spill] sm:$0xff] %v11316_v31  ;;  %v6266_v31 = vmul.f32 %v6219_v24, %v6192_v30  ;;  %v6190_v61 = vsel %vm3762_vm8, %v13348_v15, %v13346_v32  ;;  %5968 = vrot.lane.b32.xlu0 %v10637_v37, %s7942_s13  ;;  %6993 = vmatprep.subr.mxu1 %v6267_v19  ;;  %v13352_v33 = vld [vmem:[#allocation118_spill] sm:$0xff]  ;;  %v13359_v28 = vld [vmem:[#allocation108_spill] sm:$0xff] }
 0x427   : > { %13344 = vst [vmem:[#allocation149_spill] sm:$0xff] %v11330_v26  ;;  %13347 = vst [vmem:[#allocation146_spill] sm:$0xff] %v11337_v23  ;;  %v6259_v9 = vmul.f32 %v6223_v10, %v6187_v14  ;;  %v11346_v44 = vmul.f32 %v4923_v7, %v13306_v53  ;;  %v13350_v26 = vld [vmem:[#allocation63_spill] sm:$0xff]  ;;  %v6258_v35 = vmul.f32 %v6219_v24, %v6191_v57  ;;  %5966 = vrot.lane.b32.xlu1 %v13280_v41, %s7942_s13  ;;  %v13354_v19 = vld [vmem:[#allocation62_spill] sm:$0xff]  ;;  %v11366_v57 = vpop.permute.xlu0 %6366  ;;  %v11368_v32 = vpop.permute.xlu1 %5250 }
 0x428   : > { %v5488_v30 = vsel %vm1791_vm5, %v13351_v62, %v13350_v26  ;;  %v5987_v59 = vsel %vm3262_vm7, %v13353_v52, %v13352_v33  ;;  %6994 = vmatpush2.msra.mxu1 %v6266_v31  ;;  %v5286_v14 = vsel %vm1291_vm4, %v13354_v19, %v10248_v54  ;;  %v13355_v7 = vld [vmem:[#allocation172_spill] sm:$0xff]  ;;  %13356 = vst [vmem:[#allocation63_spill] sm:$0xff] %v11366_v57  ;;  %13357 = vst [vmem:[#allocation60_spill] sm:$0xff] %v11368_v32 }
 0x429   : > { %13349 = vst [vmem:[#allocation203_spill] sm:$0xff] %v11346_v44  ;;  %v5991_v26 = vsel %vm3262_vm7, %v13355_v7, %v13353_v52  ;;  %6995 = vmatprep.subr.mxu1 %v6259_v9  ;;  %v6251_v33 = vmul.f32 %v6223_v10, %v6186_v5  ;;  %v6021_v44 = vrot.slane %v10970_v13, %v13254_v55  ;;  %v13358_v31 = vld [vmem:[#allocation64_spill] sm:$0xff]  ;;  %v13360_v52 = vld [vmem:[#allocation181_spill] sm:$0xff] }
 0x42a   : > { %v5084_v16 = vsel %vm429_vm0, %v13358_v31, %v13275_v2  ;;  %v6250_v54 = vmul.f32 %v6219_v24, %v6190_v61  ;;  %v6017_v1 = vrot.slane %v10970_v13, %v13256_v36  ;;  %v5986_v9 = vsel %vm3262_vm7, %v13360_v52, %v13359_v28  ;;  %6996 = vmatpush2.msra.mxu1 %v6258_v35  ;;  %v13361_v5 = vld [vmem:[#allocation176_spill] sm:$0xff]  ;;  %v13362_v61 = vld [vmem:[#allocation101_spill] sm:$0xff] }
 0x42b   : > { %v5990_v10 = vsel %vm3262_vm7, %v13361_v5, %v13360_v52  ;;  %5758 = vrot.lane.b32.xlu0 %v10617_v12, %s7941_s12  ;;  %6997 = vmatprep.subr.mxu1 %v6251_v33  ;;  %v6073_v2 = vmul.f32 %v6021_v44, %v5987_v59  ;;  %v5553_v24 = vmul.f32 %v13286_v38, %v5488_v30  ;;  %v13363_v7 = vld [vmem:[#allocation152_spill] sm:$0xff]  ;;  %v13365_v52 = vld [vmem:[#allocation145_spill] sm:$0xff]  ;;  %v11405_v38 = vld [vmem:[%s12811_s5 + $0x18] sm:$0xff]  ;;  %v11409_v33 = vpop.permute.xlu0 %5460 }
 0x42c   : > { %v5985_v32 = vsel %vm3262_vm7, %v13363_v7, %v13362_v61  ;;  %v6072_v15 = vmul.f32 %v6017_v1, %v5991_v26  ;;  %v13364_v35 = vld [vmem:[#allocation156_spill] sm:$0xff]  ;;  %6998 = vmatpush2.msra.mxu1 %v6250_v54  ;;  %v11396_v28 = vmul.f32 %v10980_v63, %v5286_v14  ;;  %v5989_v59 = vsel %vm3262_vm7, %v13365_v52, %v13363_v7  ;;  %v11411_v26 = vpop.permute.xlu1 %5040  ;;  %v13367_v12 = vld [vmem:[#allocation66_spill] sm:$0xff]  ;;  %v13368_v52 = vld [vmem:[#allocation81_spill] sm:$0xff] }
 0x42d   : > { %6172 = vrot.lane.b32.xlu1 %v13364_v35, %s7943_s14  ;;  %13366 = vst [vmem:[#allocation175_spill] sm:$0xff] %v11405_v38  ;;  %v5499_v30 = vrot.slane %v11405_v38, %v13231_v56  ;;  %6999 = vmatprep.subr.mxu1 %v6073_v2  ;;  %v6065_v14 = vmul.f32 %v6021_v44, %v5986_v9  ;;  %v13370_v2 = vld [vmem:[#allocation148_spill] sm:$0xff] }
 0x42e   : > { %v11414_v54 = vmul.f32 %v10999_v47, %v5084_v16  ;;  %v11420_v7 = vsel %vm354_vm3, %v13367_v12, %v13309_v4  ;;  %v6064_v61 = vmul.f32 %v6017_v1, %v5990_v10  ;;  %v5492_v5 = vsel %vm1791_vm5, %v11179_v18, %v13351_v62  ;;  %7000 = vmatpush2.msra.mxu1 %v6072_v15  ;;  %v13369_v16 = vld [vmem:[#allocation89_spill] sm:$0xff]  ;;  %v13371_v10 = vld [vmem:[#allocation75_spill] sm:$0xff]  ;;  %v13372_v12 = vld [vmem:[#allocation68_spill] sm:$0xff] }
 0x42f   : > { %v5493_v9 = vsel %vm1791_vm5, %v11409_v33, %v13368_v52  ;;  %v5984_v38 = vsel %vm3262_vm7, %v13370_v2, %v13369_v16  ;;  %5748 = vrot.lane.b32.xlu0 %v10164_v40, %s7941_s12  ;;  %7001 = vmatprep.subr.mxu1 %v6065_v14  ;;  %v6057_v4 = vmul.f32 %v6021_v44, %v5985_v32  ;;  %v13373_v18 = vld [vmem:[#allocation141_spill] sm:$0xff] }
 0x430   : > { %v5560_v23 = vmul.f32 %v5499_v30, %v5493_v9  ;;  %v6200_v62 = vsel %vm3762_vm8, %v13372_v12, %v13371_v10  ;;  %v5988_v15 = vsel %vm3262_vm7, %v13373_v18, %v13370_v2  ;;  %v6056_v52 = vmul.f32 %v6017_v1, %v5989_v59  ;;  %7002 = vmatpush2.msra.mxu1 %v6064_v61  ;;  %v13374_v9 = vld [vmem:[#allocation120_spill] sm:$0xff]  ;;  %v13375_v16 = vld [vmem:[#allocation177_spill] sm:$0xff]  ;;  %v11454_v12 = vpop.permute.xlu0 %5236  ;;  %v11456_v59 = vpop.permute.xlu1 %5030 }
 0x431   : > { %5756 = vrot.lane.b32.xlu1 %v10594_v48, %s7941_s12  ;;  %v5785_v32 = vsel %vm2762_vm6, %v13375_v16, %v13374_v9  ;;  %v5491_v14 = vsel %vm1791_vm5, %v11035_v49, %v13308_v0  ;;  %v5552_v40 = vmul.f32 %v5499_v30, %v5492_v5  ;;  %7003 = vmatprep.subr.mxu1 %v6057_v4  ;;  %v13377_v2 = vld [vmem:[#allocation173_spill] sm:$0xff]  ;;  %v13381_v4 = vld [vmem:[#allocation183_spill] sm:$0xff] }
 0x432   : > { %6818 = vmatpush1.msra.mxu0 %v5560_v23  ;;  %13376 = vst [vmem:[#allocation62_spill] sm:$0xff] %v11456_v59  ;;  %v5789_v61 = vsel %vm2762_vm6, %v13377_v2, %v13375_v16  ;;  %7004 = vmatpush2.msra.mxu1 %v6056_v52  ;;  %v6049_v48 = vmul.f32 %v6021_v44, %v5984_v38  ;;  %v13378_v49 = vld [vmem:[#allocation73_spill] sm:$0xff] }
 0x433   : > { %6819 = vmatprep.subr.mxu0 %v5553_v24  ;;  %v5819_v9 = vrot.slane %v10985_v50, %v13254_v55  ;;  %v5287_v0 = vsel %vm1291_vm4, %v13378_v49, %v10341_v20  ;;  %v6048_v23 = vmul.f32 %v6017_v1, %v5988_v15  ;;  %v5815_v5 = vrot.slane %v10985_v50, %v13256_v36  ;;  %v13379_v24 = vld [vmem:[#allocation182_spill] sm:$0xff] }
 0x434   : > { %5964 = vrot.lane.b32.xlu0 %v13311_v22, %s7942_s13  ;;  %6820 = vmatpush1.msra.mxu0 %v5552_v40  ;;  %v5490_v44 = vsel %vm1791_vm5, %v13379_v24, %v10070_v3  ;;  %v5544_v38 = vmul.f32 %v5499_v30, %v5491_v14  ;;  %v13380_v1 = vld [vmem:[#allocation110_spill] sm:$0xff]  ;;  %v11484_v40 = vrot.slane %v10928_v34, %v13231_v56  ;;  %v5033_v3 = vpop.permute.xlu0 %5032  ;;  %v11487_v52 = vpop.permute.xlu1 %5258 }
 0x435   : > { %5970 = vrot.lane.b32.xlu1 %v13364_v35, %s7942_s13  ;;  %7005 = vmatprep.subr.mxu1 %v6049_v48  ;;  %v5871_v16 = vmul.f32 %v5819_v9, %v5785_v32  ;;  %v5870_v20 = vmul.f32 %v5815_v5, %v5789_v61  ;;  %v5784_v15 = vsel %vm2762_vm6, %v13381_v4, %v13380_v1  ;;  %v13382_v14 = vld [vmem:[#allocation178_spill] sm:$0xff]  ;;  %s7635_s13 = sshll.u32 %s7628_s25, 1 }
 0x436   : > { %6821 = vmatprep.subr.mxu0 %v11246_v58  ;;  %7006 = vmatpush2.msra.mxu1 %v6048_v23  ;;  %v5788_v48 = vsel %vm2762_vm6, %v13382_v14, %v13381_v4  ;;  %v11496_v32 = vsel %vm429_vm0, %v5033_v3, %v11411_v26  ;;  %v11501_v61 = vsel %vm429_vm0, %v10995_v27, %v5033_v3  ;;  %v13385_v58 = vld [vmem:[#allocation97_spill] sm:$0xff]  ;;  %v13386_v23 = vld [vmem:[#allocation167_spill] sm:$0xff]  ;;  %p278_p4 = scmp.lt.s32.totalorder %s7635_s13, 3 }
 0x437   : > { %13383 = vst [vmem:[#allocation64_spill] sm:$0xff] %v11496_v32  ;;  %13384 = vst [vmem:[#allocation181_spill] sm:$0xff] %v11501_v61  ;;  %6822 = vmatpush1.msra.mxu0 %v5544_v38  ;;  %7007 = vmatprep.subr.mxu1 %v5871_v16  ;;  %v5783_v1 = vsel %vm2762_vm6, %v13386_v23, %v13385_v58  ;;  %v5536_v36 = vmul.f32 %v5499_v30, %v5490_v44  ;;  %v13387_v27 = vld [vmem:[#allocation147_spill] sm:$0xff] }
 0x438   : > { %v5291_v4 = vsel %vm1291_vm4, %v11487_v52, %v13378_v49  ;;  %6823 = vmatprep.subr.mxu0 %v11132_v51  ;;  %v5359_v32 = vmul.f32 %v10980_v63, %v5287_v0  ;;  %v5787_v38 = vsel %vm2762_vm6, %v13387_v27, %v13386_v23  ;;  %7008 = vmatpush2.msra.mxu1 %v5870_v20  ;;  %v11526_v63 = vpop.permute.xlu0 %5248  ;;  %v11528_v49 = vpop.permute.xlu1 %5246  ;;  %v13388_v20 = vld [vmem:[#allocation91_spill] sm:$0xff]  ;;  %s13628_s13 = smov (!%p278_p4, %s7635_s13), 3 }
 0x439   : > { %v5358_v16 = vmul.f32 %v11484_v40, %v5291_v4  ;;  %5754 = vrot.lane.b32.xlu0 %v10537_v45, %s7941_s12  ;;  %v5863_v30 = vmul.f32 %v5819_v9, %v5784_v15  ;;  %v5862_v44 = vmul.f32 %v5815_v5, %v5788_v48  ;;  %v5290_v51 = vsel %vm1291_vm4, %v11229_v17, %v13354_v19  ;;  %v13389_v15 = vld [vmem:[#allocation150_spill] sm:$0xff]  ;;  %v13390_v48 = vld [vmem:[#allocation143_spill] sm:$0xff]  ;;  %v13391_v45 = vld [vmem:[#allocation77_spill] sm:$0xff]  ;;  %s7876_s14 = sshll.u32 %s13628_s13, 4 }
 0x43a   : > { %6824 = vmatpush1.msra.mxu0 %v5536_v36  ;;  %5746 = vrot.lane.b32.xlu1 %v10124_v42, %s7941_s12  ;;  %v11532_v0 = vmul.f32 %v11420_v7, %v13306_v53  ;;  %v5782_v3 = vsel %vm2762_vm6, %v13389_v15, %v13388_v20  ;;  %v5786_v36 = vsel %vm2762_vm6, %v13390_v48, %v13389_v15  ;;  %v13392_v42 = vld [vmem:[#allocation70_spill] sm:$0xff]  ;;  %v13393_v15 = vld [vmem:[#allocation83_spill] sm:$0xff]  ;;  %s282_s10 = scalar_lea.vmem %s12813_s7, %s7876_s14 }
 0x43b   : > { %7009 = vmatprep.subr.mxu1 %v5863_v30  ;;  %6825 = vmatprep.subr.mxu0 %v5359_v32  ;;  %v5855_v19 = vmul.f32 %v5819_v9, %v5783_v1  ;;  %v11543_v23 = vmul.f32 %v11003_v39, %v6200_v62  ;;  %v5854_v4 = vmul.f32 %v5815_v5, %v5787_v38  ;;  %v13394_v30 = vld [vmem:[#allocation74_spill] sm:$0xff]  ;;  %v13395_v38 = vld [vmem:[#allocation29_spill] sm:$0xff]  ;;  %v13407_v61 = vld [vmem:[#allocation99_spill] sm:$0xff] }
 0x43c   : > { %v5289_v7 = vsel %vm1291_vm4, %v11181_v21, %v13326_v46  ;;  %7010 = vmatpush2.msra.mxu1 %v5862_v44  ;;  %6826 = vmatpush1.msra.mxu0 %v5358_v16  ;;  %v5998_v20 = vsel %vm3262_vm7, %v13392_v42, %v13391_v45  ;;  %v5085_v1 = vsel %vm429_vm0, %v13394_v30, %v13393_v15  ;;  %v13396_v46 = vld [vmem:[#allocation184_spill] sm:$0xff]  ;;  %v11565_v58 = vpop.permute.xlu0 %5038  ;;  %v11567_v42 = vpop.permute.xlu1 %5056  ;;  %v13414_v48 = vld [vmem:[#allocation82_spill] sm:$0xff] }
 0x43d   : > { %v5350_v62 = vmul.f32 %v11484_v40, %v5290_v51  ;;  %7011 = vmatprep.subr.mxu1 %v5855_v19  ;;  %6827 = vmatprep.subr.mxu0 %v11396_v28  ;;  %v5846_v32 = vmul.f32 %v5815_v5, %v5786_v36  ;;  %v5288_v16 = vsel %vm1291_vm4, %v13396_v46, %v13395_v38  ;;  %v13399_v19 = vld [vmem:[#allocation4_spill] sm:$0xff] }
 0x43e   : > { %7012 = vmatpush2.msra.mxu1 %v5854_v4  ;;  %5766 = vrot.lane.b32.xlu0 %v10637_v37, %s7941_s12  ;;  %v5847_v44 = vmul.f32 %v5819_v9, %v5782_v3  ;;  %v5342_v51 = vmul.f32 %v11484_v40, %v5289_v7  ;;  %v11576_v28 = vsel %vm429_vm0, %v11456_v59, %v11565_v58  ;;  %v13398_v3 = vld [vmem:[#allocation190_spill] sm:$0xff]  ;;  %v13400_v7 = vld [vmem:[#allocation79_spill] sm:$0xff]  ;;  %v13401_v15 = vld [vmem:[#allocation72_spill] sm:$0xff] }
 0x43f   : > { %5768 = vrot.lane.b32.xlu1 %v13364_v35, %s7941_s12  ;;  %6828 = vmatpush1.msra.mxu0 %v5350_v62  ;;  %13397 = vst [vmem:[#allocation152_spill] sm:$0xff] %v11576_v28  ;;  %v5089_v9 = vsel %vm429_vm0, %v11567_v42, %v13394_v30  ;;  %v11583_v5 = vmul.f32 %v11013_v43, %v5998_v20  ;;  %v13403_v30 = vld [vmem:[#allocation85_spill] sm:$0xff]  ;;  %v13404_v20 = vld [vmem:[#allocation76_spill] sm:$0xff]  ;;  %v13408_v59 = vld [vmem:[#allocation55_spill] sm:$0xff] }
 0x440   : > { %v11587_v36 = vrot.slane %v13398_v3, %v13231_v56  ;;  %7013 = vmatprep.subr.mxu1 %v5847_v44  ;;  %6829 = vmatprep.subr.mxu0 %v11327_v29  ;;  %v11592_v4 = vrot.slane %v10956_v8, %v13399_v19  ;;  %v11598_v62 = vsel %vm2762_vm6, %v13401_v15, %v13400_v7  ;;  %v13405_v29 = vld [vmem:[#allocation86_spill] sm:$0xff]  ;;  %v11613_v55 = vpop.permute.xlu0 %5028 }
 0x441   : > { %13402 = vst [vmem:[#allocation81_spill] sm:$0xff] %v11598_v62  ;;  %v4925_v38 = vsel %vm354_vm3, %v13404_v20, %v13403_v30  ;;  %7014 = vmatpush2.msra.mxu1 %v5846_v32  ;;  %6830 = vmatpush1.msra.mxu0 %v5342_v51  ;;  %v5157_v56 = vmul.f32 %v10999_v47, %v5085_v1  ;;  %v13406_v44 = vld [vmem:[#allocation78_spill] sm:$0xff]  ;;  %13409 = vst [vmem:[#allocation148_spill] sm:$0xff] %v11613_v55  ;;  %v11615_v30 = vpop.permute.xlu1 %5036  ;;  %v13411_v32 = vld [vmem:[#allocation88_spill] sm:$0xff] }
 0x442   : > { %v6201_v8 = vsel %vm3762_vm8, %v13406_v44, %v13405_v29  ;;  %v5334_v28 = vmul.f32 %v11484_v40, %v5288_v16  ;;  %7015 = vmatprep.subr.mxu1 %v13407_v61  ;;  %v5156_v15 = vmul.f32 %v11587_v36, %v5089_v9  ;;  %6831 = vmatprep.subr.mxu0 %v13408_v59  ;;  %v13412_v51 = vld [vmem:[#allocation80_spill] sm:$0xff]  ;;  %v13413_v1 = vld [vmem:[#allocation90_spill] sm:$0xff]  ;;  %v13415_v16 = vld [vmem:[#allocation67_spill] sm:$0xff] }
 0x443   : > { %13410 = vst [vmem:[#allocation75_spill] sm:$0xff] %v11615_v30  ;;  %v5999_v47 = vsel %vm3262_vm7, %v13412_v51, %v13411_v32  ;;  %v5797_v40 = vsel %vm2762_vm6, %v13414_v48, %v13413_v1  ;;  %7016 = vmatpush2.msra.mxu1 %v13415_v16  ;;  %5762 = vrot.lane.b32.xlu0 %v13311_v22, %s7941_s12  ;;  %v13417_v61 = vld [vmem:[#allocation96_spill] sm:$0xff]  ;;  %v13418_v9 = vld [vmem:[#allocation93_spill] sm:$0xff]  ;;  %v13433_v62 = vld [vmem:[#allocation198_spill] sm:$0xff] }
 0x444   : > { %v11632_v59 = vsel %vm429_vm0, %v11613_v55, %v11615_v30  ;;  %v6384_v51 = vsel %vm4262_vm9, %v13418_v9, %v13417_v61  ;;  %v5088_v48 = vsel %vm429_vm0, %v11277_v25, %v13358_v31  ;;  %5764 = vrot.lane.b32.xlu1 %v13280_v41, %s7941_s12  ;;  %6832 = vmatpush1.msra.mxu0 %v5334_v28  ;;  %v13436_v30 = vld [vmem:[#allocation31_spill] sm:$0xff] }
 0x445   : > { %13416 = vst [vmem:[#allocation141_spill] sm:$0xff] %v11632_v59  ;;  %v11646_v16 = vrot.slane %v10970_v13, %v13399_v19  ;;  %v11649_v44 = vmul.f32 %v11003_v39, %v6201_v8  ;;  %v13419_v59 = vld [vmem:[#allocation200_spill] sm:$0xff]  ;;  %6833 = vmatprep.subr.mxu0 %v5157_v56  ;;  %v4955_v55 = vmul.f32 %v4925_v38, %v13306_v53  ;;  %v13423_v8 = vld [vmem:[#allocation199_spill] sm:$0xff]  ;;  %v11668_v56 = vpop.permute.xlu0 %5244  ;;  %v11670_v53 = vpop.permute.xlu1 %4896 }
 0x446   : > { %7017 = vmatprep.subr.mxu1 %v13419_v59  ;;  %v11655_v9 = vrot.slane %v10985_v50, %v13399_v19  ;;  %v11658_v31 = vmul.f32 %v11013_v43, %v5999_v47  ;;  %v11661_v28 = vmul.f32 %v11023_v6, %v5797_v40  ;;  %v13422_v13 = vld [vmem:[#allocation16_spill] sm:$0xff]  ;;  %6834 = vmatpush1.msra.mxu0 %v5156_v15  ;;  %v13425_v50 = vld [vmem:[#allocation33_spill] sm:$0xff]  ;;  %v13430_v19 = vld [vmem:[#allocation119_spill] sm:$0xff] }
 0x447   : > { %v5087_v39 = vsel %vm429_vm0, %v13422_v13, %v13329_v60  ;;  %7018 = vmatpush2.msra.mxu1 %v13423_v8  ;;  %13424 = vst [vmem:[#allocation73_spill] sm:$0xff] %v11670_v53  ;;  %v11673_v38 = vmul.f32 %v13425_v50, %v6384_v51  ;;  %v5148_v43 = vmul.f32 %v11587_v36, %v5088_v48  ;;  %v13426_v47 = vld [vmem:[#allocation125_spill] sm:$0xff]  ;;  %v13429_v15 = vld [vmem:[#allocation100_spill] sm:$0xff] }
 0x448   : > { %13420 = vst [vmem:[#allocation177_spill] sm:$0xff] %v11655_v9  ;;  %13421 = vst [vmem:[#allocation173_spill] sm:$0xff] %v11661_v28  ;;  %v6383_v40 = vsel %vm4262_vm9, %v13426_v47, %v11366_v57  ;;  %v13427_v59 = vld [vmem:[#allocation197_spill] sm:$0xff]  ;;  %6835 = vmatprep.subr.mxu0 %v11414_v54  ;;  %v6387_v51 = vsel %vm4262_vm9, %v13430_v19, %v13426_v47  ;;  %v13431_v48 = vld [vmem:[#allocation8_spill] sm:$0xff]  ;;  %6372 = vrot.lane.b32.xlu0 %v10637_v37, %s7944_s15 }
 0x449   : > { %7019 = vmatprep.subr.mxu1 %v13427_v59  ;;  %v13428_v60 = vld [vmem:[#allocation105_spill] sm:$0xff]  ;;  %v13432_v28 = vld [vmem:[#allocation163_spill] sm:$0xff]  ;;  %v13435_v54 = vld [vmem:[#allocation112_spill] sm:$0xff]  ;;  %v5140_v47 = vmul.f32 %v11587_v36, %v5087_v39  ;;  %6374 = vrot.lane.b32.xlu1 %v13364_v35, %s7944_s15  ;;  %v11716_v39 = vpop.permute.xlu0 %5034  ;;  %v11718_v19 = vpop.permute.xlu1 %5026  ;;  %v6478_v35 = vmul.f32 %v13425_v50, %v6387_v51 }
 0x44a   : > { %v6385_v8 = vsel %vm4262_vm9, %v13429_v15, %v13428_v60  ;;  %v6433_v6 = vrot.slane %v13432_v28, %v13431_v48  ;;  %7020 = vmatpush2.msra.mxu1 %v13433_v62  ;;  %v13434_v59 = vld [vmem:[#allocation113_spill] sm:$0xff]  ;;  %v13437_v15 = vld [vmem:[#allocation186_spill] sm:$0xff]  ;;  %6836 = vmatpush1.msra.mxu0 %v5148_v43  ;;  %v13439_v48 = vld [vmem:[#allocation195_spill] sm:$0xff]  ;;  %13441 = vst [vmem:[#allocation182_spill] sm:$0xff] %v11716_v39 }
 0x44b   : > { %v6386_v57 = vsel %vm4262_vm9, %v13435_v54, %v13434_v59  ;;  %v5086_v9 = vsel %vm429_vm0, %v13437_v15, %v13436_v30  ;;  %v13438_v62 = vld [vmem:[#allocation201_spill] sm:$0xff]  ;;  %7021 = vmatprep.subr.mxu1 %v13439_v48  ;;  %v13440_v54 = vld [vmem:[#allocation146_spill] sm:$0xff]  ;;  %v4929_v30 = vsel %vm354_vm3, %v11670_v53, %v13404_v20  ;;  %13442 = vst [vmem:[#allocation183_spill] sm:$0xff] %v11718_v19  ;;  %v13443_v15 = vld [vmem:[#allocation196_spill] sm:$0xff] }
 0x44c   : > { %v6382_v28 = vsel %vm4262_vm9, %v13434_v59, %v13438_v62  ;;  %v6479_v37 = vmul.f32 %v6433_v6, %v6383_v40  ;;  %6837 = vmatprep.subr.mxu0 %v13440_v54  ;;  %v6462_v43 = vmul.f32 %v13425_v50, %v6385_v8  ;;  %7022 = vmatpush2.msra.mxu1 %v13443_v15  ;;  %v13445_v20 = vld [vmem:[#allocation138_spill] sm:$0xff]  ;;  %v13446_v59 = vld [vmem:[#allocation43_spill] sm:$0xff]  ;;  %v13447_v62 = vld [vmem:[#allocation192_spill] sm:$0xff] }
 0x44d   : > { %6838 = vmatpush1.msra.mxu0 %v5140_v47  ;;  %v11727_v40 = vsel %vm429_vm0, %v11718_v19, %v11716_v39  ;;  %v6470_v48 = vmul.f32 %v13425_v50, %v6386_v57  ;;  %v6194_v54 = vsel %vm3762_vm8, %v13446_v59, %v13445_v20  ;;  %v6381_v8 = vsel %vm4262_vm9, %v13428_v60, %v13447_v62  ;;  %v13448_v15 = vld [vmem:[#allocation5_spill] sm:$0xff]  ;;  %v13449_v19 = vld [vmem:[#allocation12_spill] sm:$0xff]  ;;  %v13450_v39 = vld [vmem:[#allocation35_spill] sm:$0xff] }
 0x44e   : > { %13444 = vst [vmem:[#allocation178_spill] sm:$0xff] %v11727_v40  ;;  %7024 = vmatmul.mubr.f32.vlgmr.msra.gmra.mxu1 %v13448_v15  ;;  %7196 = vmatprep.subr.mxu1 %v6479_v37  ;;  %v5132_v51 = vmul.f32 %v11587_v36, %v5086_v9  ;;  %v6471_v47 = vmul.f32 %v6433_v6, %v6382_v28  ;;  %v13451_v57 = vld [vmem:[#allocation45_spill] sm:$0xff]  ;;  %v13452_v20 = vld [vmem:[#allocation15_spill] sm:$0xff]  ;;  %v13454_v60 = vld [vmem:[#allocation66_spill] sm:$0xff] }
 0x44f   : > { %v4954_v40 = vmul.f32 %v4929_v30, %v13449_v19  ;;  %6839 = vmatprep.subr.mxu0 %v13450_v39  ;;  %7197 = vmatpush1.msra.mxu1 %v6478_v35  ;;  %v5992_v50 = vsel %vm3262_vm7, %v13451_v57, %v13373_v18  ;;  %v13453_v59 = vld [vmem:[#allocation175_spill] sm:$0xff]  ;;  %v13455_v15 = vld [vmem:[#allocation40_spill] sm:$0xff]  ;;  %v4873_v35 = vpop.permute.xlu0 %4872  ;;  %v6463_v9 = vmul.f32 %v6433_v6, %v6381_v8  ;;  %v13457_v28 = vld [vmem:[#allocation194_spill] sm:$0xff]  ;;  %v11767_v39 = vpop.permute.xlu1 %5048 }
 0x450   : > { %v11748_v53 = vrot.slane %v13453_v59, %v13452_v20  ;;  %v4928_v37 = vsel %vm354_vm3, %v13455_v15, %v13454_v60  ;;  %6368 = vrot.lane.b32.xlu0 %v13311_v22, %s7944_s15  ;;  %6370 = vrot.lane.b32.xlu1 %v13280_v41, %s7944_s15  ;;  %v13456_v36 = vld [vmem:[#allocation179_spill] sm:$0xff]  ;;  %v11765_v30 = vsel %vm354_vm3, %v13457_v28, %v4873_v35  ;;  %v13459_v57 = vld [vmem:[#allocation10_spill] sm:$0xff]  ;;  %v13460_v22 = vld [vmem:[#allocation44_spill] sm:$0xff] }
 0x451   : > { %v6380_v18 = vsel %vm4262_vm9, %v13417_v61, %v13456_v36  ;;  %6840 = vmatpush1.msra.mxu0 %v5132_v51  ;;  %7198 = vmatprep.subr.mxu1 %v6471_v47  ;;  %13458 = vst [vmem:[#allocation167_spill] sm:$0xff] %v11765_v30  ;;  %v5527_v60 = vrot.slane %v13453_v59, %v13459_v57  ;;  %v13461_v41 = vld [vmem:[#allocation58_spill] sm:$0xff]  ;;  %v6804_v61 = vld [vmem:[%s12810_s4] sm:$0xf] }
 0x452   : > { %v4927_v62 = vsel %vm354_vm3, %v13461_v41, %v13460_v22  ;;  %6841 = vmatprep.subr.mxu0 %v4955_v55  ;;  %7199 = vmatpush1.msra.mxu1 %v6470_v48  ;;  %v11779_v8 = vmul.f32 %v11592_v4, %v6194_v54  ;;  %v4946_v51 = vmul.f32 %v4928_v37, %v13449_v19  ;;  %v13462_v47 = vld [vmem:[#allocation42_spill] sm:$0xff]  ;;  %v13464_v48 = vld [vmem:[#allocation53_spill] sm:$0xff] }
 0x453   : > { %v5465_v28 = vsel %vm1791_vm5, %v13462_v47, %v11409_v33  ;;  %6842 = vmatpush1.msra.mxu0 %v4954_v40  ;;  %7200 = vmatprep.subr.mxu1 %v6463_v9  ;;  %v11787_v22 = vmul.f32 %v11646_v16, %v5992_v50  ;;  %v13463_v55 = vld [vmem:[#allocation142_spill] sm:$0xff]  ;;  %v6455_v37 = vmul.f32 %v6433_v6, %v6380_v18  ;;  %v11798_v33 = vpop.permute.xlu0 %5046  ;;  %v13466_v40 = vld [vmem:[#allocation32_spill] sm:$0xff]  ;;  %v13470_v6 = vld [vmem:[#allocation137_spill] sm:$0xff] }
 0x454   : > { %v6195_v36 = vsel %vm3762_vm8, %v13464_v48, %v13463_v55  ;;  %v13465_v30 = vld [vmem:[#allocation170_spill] sm:$0xff]  ;;  %6843 = vmatprep.subr.mxu0 %v11532_v0  ;;  %7201 = vmatpush1.msra.mxu1 %v6462_v43  ;;  %v13467_v9 = vld [vmem:[#allocation188_spill] sm:$0xff]  ;;  %v4938_v59 = vmul.f32 %v4927_v62, %v13449_v19  ;;  %v13469_v0 = vld [vmem:[#allocation133_spill] sm:$0xff]  ;;  %v5567_v18 = vmul.f32 %v5527_v60, %v5465_v28 }
 0x455   : > { %v6197_v54 = vsel %vm3762_vm8, %v13405_v29, %v13465_v30  ;;  %v4926_v50 = vsel %vm354_vm3, %v13467_v9, %v13466_v40  ;;  %v13468_v55 = vld [vmem:[#allocation124_spill] sm:$0xff]  ;;  %6807 = vperm.xlu1 %7896, %v6804_v61   ;;  %6844 = vmatpush1.msra.mxu0 %v4946_v51  ;;  %v11809_v29 = vpop.permute.xlu1 %4880  ;;  %v5464_v43 = vsel %vm1791_vm5, %v13470_v6, %v13469_v0  ;;  %v13471_v30 = vld [vmem:[#allocation203_spill] sm:$0xff]  ;;  %v13473_v40 = vld [vmem:[#allocation145_spill] sm:$0xff] }
 0x456   : > { %v5469_v48 = vsel %vm1791_vm5, %v13468_v55, %v13462_v47  ;;  %7202 = vmatprep.subr.mxu1 %v6455_v37  ;;  %6845 = vmatprep.subr.mxu0 %v13471_v30  ;;  %v11819_v62 = vsel %vm354_vm3, %v4873_v35, %v11809_v29  ;;  %v13474_v47 = vld [vmem:[#allocation56_spill] sm:$0xff]  ;;  %v13475_v51 = vld [vmem:[#allocation114_spill] sm:$0xff]  ;;  %v11831_v28 = vrot.slane %v10928_v34, %v13459_v57  ;;  %v13481_v9 = vld [vmem:[#allocation171_spill] sm:$0xff] }
 0x457   : > { %13472 = vst [vmem:[#allocation147_spill] sm:$0xff] %v11819_v62  ;;  %v5993_v61 = vsel %vm3262_vm7, %v13474_v47, %v13473_v40  ;;  %v5468_v55 = vsel %vm1791_vm5, %v13475_v51, %v13470_v6  ;;  %7203 = vmatpush1.msra.mxu1 %v11673_v38  ;;  %6846 = vmatpush1.msra.mxu0 %v4938_v59  ;;  %v13476_v37 = vld [vmem:[#allocation174_spill] sm:$0xff]  ;;  %v13477_v40 = vmov 0.0   ;;  %v11841_v6 = vpop.permute.xlu0 %4878  ;;  %v13478_v47 = vld [vmem:[#allocation116_spill] sm:$0xff]  ;;  %v13480_v51 = vld [vmem:[#allocation11_spill] sm:$0xff] }
 0x458   : > { %v6196_v35 = vsel %vm3762_vm8, %v13371_v10, %v13476_v37  ;;  %v4930_v0 = vmul.f32 %v4926_v50, %v13449_v19  ;;  %v5566_v30 = vmul.f32 %v11748_v53, %v5469_v48  ;;  %7236 = vmatprep.mubr.f32.mxu1 %v13477_v40  ;;  %7243 = vmatprep.subr.mxu1 %v5567_v18  ;;  %v13479_v62 = vld [vmem:[#allocation104_spill] sm:$0xff] }
 0x459   : > { %v5467_v38 = vsel %vm1791_vm5, %v13479_v62, %v13478_v47  ;;  %v5559_v59 = vmul.f32 %v5527_v60, %v5464_v43  ;;  %6847 = vmatprep.subr.mxu0 %v13480_v51  ;;  %7872 = vmatmul.mubr.msk.f32.vlgmr.msra.gmra.mxu1 %vm6814_vm10, %v13481_v9  ;;  %v6273_v10 = vmul.f32 %v11592_v4, %v6197_v54  ;;  %v11851_v19 = vpop.permute.xlu1 %4870  ;;  %v13482_v50 = vld [vmem:[#allocation180_spill] sm:$0xff]  ;;  %v13483_v9 = vld [vmem:[#allocation95_spill] sm:$0xff] }
 0x45a   : > { %v5462_v48 = vsel %vm1791_vm5, %v13482_v50, %v13379_v24  ;;  %v5558_v18 = vmul.f32 %v11748_v53, %v5468_v55  ;;  %7244 = vmatpush1.msra.mxu1 %v5566_v30  ;;  %6848 = vmatpush1.msra.mxu0 %v4930_v0  ;;  %v11862_v43 = vsel %vm354_vm3, %v11851_v19, %v11841_v6  ;;  %v13484_v51 = vld [vmem:[#allocation84_spill] sm:$0xff] }
 0x45b   : > { %v5466_v54 = vsel %vm1791_vm5, %v13483_v9, %v13482_v50  ;;  %v5551_v37 = vmul.f32 %v5527_v60, %v13484_v51  ;;  %7245 = vmatprep.subr.mxu1 %v5559_v59  ;;  %6849 = vmatprep.subr.mxu0 %v6273_v10  ;;  %v6265_v24 = vmul.f32 %v11592_v4, %v6196_v35  ;;  %v13485_v30 = vld [vmem:[#allocation60_spill] sm:$0xff]  ;;  %v11878_v50 = vpop.permute.xlu0 %4868  ;;  %v13486_v59 = vld [vmem:[#allocation127_spill] sm:$0xff] }
 0x45c   : > { %v5550_v55 = vmul.f32 %v11748_v53, %v5467_v38  ;;  %v5321_v0 = vrot.slane %v10928_v34, %v13452_v20  ;;  %v5263_v47 = vsel %vm1291_vm4, %v13485_v30, %v11487_v52  ;;  %7246 = vmatpush1.msra.mxu1 %v5558_v18  ;;  %6850 = vmatpush2.msra.mxu0 %v11649_v44  ;;  %v13487_v10 = vld [vmem:[#allocation172_spill] sm:$0xff] }
 0x45d   : > { %v5543_v51 = vmul.f32 %v5527_v60, %v5462_v48  ;;  %v5267_v35 = vsel %vm1291_vm4, %v13486_v59, %v13485_v30  ;;  %7247 = vmatprep.subr.mxu1 %v5551_v37  ;;  %6851 = vmatprep.subr.mxu0 %v6265_v24  ;;  %v6257_v34 = vmul.f32 %v11592_v4, %v6195_v36  ;;  %v11885_v38 = vpop.permute.xlu1 %5044  ;;  %v13488_v4 = vld [vmem:[#allocation117_spill] sm:$0xff]  ;;  %v13491_v24 = vld [vmem:[#allocation107_spill] sm:$0xff] }
 0x45e   : > { %v5995_v52 = vsel %vm3262_vm7, %v13411_v32, %v13487_v10  ;;  %v5542_v44 = vmul.f32 %v11748_v53, %v5466_v54  ;;  %v5262_v60 = vsel %vm1291_vm4, %v11526_v63, %v11229_v17  ;;  %7248 = vmatpush1.msra.mxu1 %v5550_v55  ;;  %6852 = vmatpush2.msra.mxu0 %v11543_v23  ;;  %v13489_v53 = vld [vmem:[#allocation176_spill] sm:$0xff]  ;;  %v13490_v54 = vld [vmem:[#allocation17_spill] sm:$0xff] }
 0x45f   : > { %v5365_v48 = vmul.f32 %v11831_v28, %v5263_v47  ;;  %v5266_v36 = vsel %vm1291_vm4, %v13488_v4, %v11526_v63  ;;  %7249 = vmatprep.subr.mxu1 %v5543_v51  ;;  %6853 = vmatprep.subr.mxu0 %v6257_v34  ;;  %v6055_v32 = vmul.f32 %v11646_v16, %v5993_v61  ;;  %v5043_v37 = vpop.permute.xlu0 %5042  ;;  %v13492_v51 = vld [vmem:[#allocation51_spill] sm:$0xff] }
 0x460   : > { %v5994_v18 = vsel %vm3262_vm7, %v13391_v45, %v13489_v53  ;;  %v5364_v17 = vmul.f32 %v5321_v0, %v5267_v35  ;;  %v5261_v23 = vsel %vm1291_vm4, %v11528_v49, %v11181_v21  ;;  %7250 = vmatpush1.msra.mxu1 %v5542_v44  ;;  %6854 = vmatpush2.msra.mxu0 %v13490_v54 }
 0x461   : > { %v5357_v63 = vmul.f32 %v11831_v28, %v5262_v60  ;;  %v5265_v61 = vsel %vm1291_vm4, %v13491_v24, %v11528_v49  ;;  %7251 = vmatprep.subr.mxu1 %v5365_v48  ;;  %6855 = vmatprep.subr.mxu0 %v11779_v8  ;;  %v6071_v45 = vmul.f32 %v11646_v16, %v5995_v52  ;;  %v11919_v55 = vpop.permute.xlu1 %4876  ;;  %v13496_v48 = vld [vmem:[#allocation75_spill] sm:$0xff] }
 0x462   : > { %v5356_v30 = vmul.f32 %v5321_v0, %v5266_v36  ;;  %v5260_v21 = vsel %vm1291_vm4, %v11668_v56, %v13396_v46  ;;  %v5123_v47 = vrot.slane %v13398_v3, %v13459_v57  ;;  %7252 = vmatpush1.msra.mxu1 %v5364_v17  ;;  %6856 = vmatpush2.msra.mxu0 %v13492_v51  ;;  %v13499_v17 = vld [vmem:[#allocation73_spill] sm:$0xff]  ;;  %v13504_v51 = vld [vmem:[#allocation48_spill] sm:$0xff] }
 0x463   : > { %v5349_v49 = vmul.f32 %v11831_v28, %v5261_v23  ;;  %v5264_v8 = vsel %vm1291_vm4, %v11454_v12, %v11668_v56  ;;  %7253 = vmatprep.subr.mxu1 %v5357_v63  ;;  %6857 = vmatprep.subr.mxu0 %v6071_v45  ;;  %v6063_v35 = vmul.f32 %v11646_v16, %v5994_v18  ;;  %v11941_v52 = vpop.permute.xlu0 %4874  ;;  %v13498_v18 = vld [vmem:[#allocation69_spill] sm:$0xff] }
 0x464   : > { %v5348_v34 = vmul.f32 %v5321_v0, %v5265_v61  ;;  %v5119_v46 = vrot.slane %v13398_v3, %v13452_v20  ;;  %v5061_v10 = vsel %vm429_vm0, %v11767_v39, %v11567_v42  ;;  %7254 = vmatpush1.msra.mxu1 %v5356_v30  ;;  %6858 = vmatpush2.msra.mxu0 %v11658_v31  ;;  %v13501_v61 = vld [vmem:[#allocation81_spill] sm:$0xff] }
 0x465   : > { %v5793_v56 = vsel %vm2762_vm6, %v13413_v1, %v13377_v2  ;;  %v5341_v16 = vmul.f32 %v11831_v28, %v5260_v21  ;;  %v5065_v3 = vsel %vm429_vm0, %v11411_v26, %v11767_v39  ;;  %7255 = vmatprep.subr.mxu1 %v5349_v49  ;;  %6859 = vmatprep.subr.mxu0 %v6063_v35  ;;  %v11952_v42 = vpop.permute.xlu1 %4866  ;;  %v13493_v26 = vld [vmem:[#allocation59_spill] sm:$0xff]  ;;  %v13495_v28 = vld [vmem:[#allocation177_spill] sm:$0xff] }
 0x466   : > { %v5792_v31 = vsel %vm2762_vm6, %v13400_v7, %v13382_v14  ;;  %v5340_v44 = vmul.f32 %v5321_v0, %v5264_v8  ;;  %v5060_v2 = vsel %vm429_vm0, %v11798_v33, %v11277_v25  ;;  %7256 = vmatpush1.msra.mxu1 %v5348_v34  ;;  %6860 = vmatpush2.msra.mxu0 %v11583_v5  ;;  %v13494_v5 = vld [vmem:[#allocation135_spill] sm:$0xff]  ;;  %v13502_v45 = vld [vmem:[#allocation193_spill] sm:$0xff] }
 0x467   : > { %v5791_v1 = vsel %vm2762_vm6, %v13493_v26, %v13387_v27  ;;  %v5163_v39 = vmul.f32 %v5123_v47, %v5061_v10  ;;  %v5064_v14 = vsel %vm429_vm0, %v11565_v58, %v11798_v33  ;;  %7257 = vmatprep.subr.mxu1 %v5341_v16  ;;  %6861 = vmatprep.subr.mxu0 %v6055_v32  ;;  %v4887_v27 = vpop.permute.xlu0 %4886  ;;  %v13503_v21 = vld [vmem:[#allocation143_spill] sm:$0xff]  ;;  %v13505_v35 = vld [vmem:[#allocation173_spill] sm:$0xff] }
 0x468   : > { %v5162_v7 = vmul.f32 %v5119_v46, %v5065_v3  ;;  %v5059_v25 = vsel %vm429_vm0, %v11885_v38, %v13422_v13  ;;  %7258 = vmatpush1.msra.mxu1 %v5340_v44  ;;  %6862 = vmatpush2.msra.mxu0 %v13494_v5  ;;  %v5869_v0 = vmul.f32 %v13495_v28, %v5793_v56  ;;  %v13497_v13 = vld [vmem:[#allocation186_spill] sm:$0xff]  ;;  %v13507_v44 = vld [vmem:[#allocation19_spill] sm:$0xff] }
 0x469   : > { %v5155_v60 = vmul.f32 %v5123_v47, %v5060_v2  ;;  %v5063_v58 = vsel %vm429_vm0, %v13496_v48, %v11885_v38  ;;  %7259 = vmatprep.subr.mxu1 %v5163_v39  ;;  %6863 = vmatprep.subr.mxu0 %v11787_v22  ;;  %v5861_v33 = vmul.f32 %v13495_v28, %v5792_v31  ;;  %v4889_v36 = vpop.permute.xlu1 %4888  ;;  %v13500_v38 = vld [vmem:[#allocation182_spill] sm:$0xff]  ;;  %v13511_v5 = vld [vmem:[#allocation27_spill] sm:$0xff] }
 0x46a   : > { %v5154_v32 = vmul.f32 %v5119_v46, %v5064_v14  ;;  %v5058_v53 = vsel %vm429_vm0, %v5043_v37, %v13497_v13  ;;  %7260 = vmatpush1.msra.mxu1 %v5162_v7  ;;  %6864 = vmatpush2.msra.mxu0 %v13498_v18  ;;  %v4901_v23 = vsel %vm354_vm3, %v4889_v36, %v13499_v17  ;;  %v13509_v14 = vld [vmem:[#allocation140_spill] sm:$0xff]  ;;  %v13510_v7 = vld [vmem:[#allocation149_spill] sm:$0xff] }
 0x46b   : > { %v5147_v54 = vmul.f32 %v5123_v47, %v5059_v25  ;;  %v5062_v22 = vsel %vm429_vm0, %v13500_v38, %v5043_v37  ;;  %7261 = vmatprep.subr.mxu1 %v5155_v60  ;;  %6865 = vmatprep.subr.mxu0 %v5869_v0  ;;  %v4905_v63 = vsel %vm354_vm3, %v11809_v29, %v4889_v36  ;;  %v12003_v34 = vpop.permute.xlu0 %6164  ;;  %v13506_v29 = vld [vmem:[#allocation18_spill] sm:$0xff]  ;;  %v13515_v17 = vld [vmem:[#allocation24_spill] sm:$0xff] }
 0x46c   : > { %v5860_v30 = vmul.f32 %v13502_v45, %v13501_v61  ;;  %v5790_v49 = vsel %vm2762_vm6, %v13504_v51, %v13503_v21  ;;  %v5146_v8 = vmul.f32 %v5119_v46, %v5063_v58  ;;  %7262 = vmatpush1.msra.mxu1 %v5154_v32  ;;  %6866 = vmatpush2.msra.mxu0 %v13505_v35  ;;  %v13512_v0 = vld [vmem:[#allocation26_spill] sm:$0xff]  ;;  %v13514_v32 = vld [vmem:[#allocation25_spill] sm:$0xff]  ;;  %v13518_v61 = vld [vmem:[#allocation188_spill] sm:$0xff] }
 0x46d   : > { %v5139_v37 = vmul.f32 %v5123_v47, %v5058_v53  ;;  %7263 = vmatprep.subr.mxu1 %v5147_v54  ;;  %6867 = vmatprep.subr.mxu0 %v5861_v33  ;;  %v5853_v10 = vmul.f32 %v13495_v28, %v5791_v1  ;;  %v4961_v56 = vmul.f32 %v4901_v23, %v13506_v29  ;;  %v12007_v16 = vpop.permute.xlu1 %6156  ;;  %v13508_v1 = vld [vmem:[#allocation4_spill] sm:$0xff]  ;;  %v13516_v54 = vld [vmem:[#allocation22_spill] sm:$0xff]  ;;  %v13519_v51 = vld [vmem:[#allocation119_spill] sm:$0xff] }
 0x46e   : > { %v5138_v3 = vmul.f32 %v5119_v46, %v5062_v22  ;;  %7264 = vmatpush1.msra.mxu1 %v5146_v8  ;;  %6868 = vmatpush2.msra.mxu0 %v5860_v30  ;;  %v4900_v31 = vsel %vm354_vm3, %v4887_v27, %v13455_v15  ;;  %v4960_v2 = vmul.f32 %v4905_v63, %v13507_v44  ;;  %v12020_v46 = vld [vmem:[%s12811_s5 + $0x20] sm:$0xff]  ;;  %v13517_v22 = vld [vmem:[#allocation23_spill] sm:$0xff] }
 0x46f   : > { %7265 = vmatprep.subr.mxu1 %v5139_v37  ;;  %6869 = vmatprep.subr.mxu0 %v5853_v10  ;;  %v4904_v47 = vsel %vm354_vm3, %v11841_v6, %v4887_v27  ;;  %v5845_v26 = vmul.f32 %v13495_v28, %v5790_v49  ;;  %v5609_v39 = vrot.slane %v12020_v46, %v13508_v1  ;;  %v12027_v25 = vpop.permute.xlu0 %6154  ;;  %v13513_v27 = vld [vmem:[#allocation191_spill] sm:$0xff]  ;;  %v13520_v49 = vld [vmem:[#allocation202_spill] sm:$0xff]  ;;  %v12065_v10 = vld [vmem:[%s12811_s5 + $0x40] sm:$0xff] }
 0x470   : > { %v5844_v15 = vmul.f32 %v13502_v45, %v13509_v14  ;;  %7266 = vmatpush1.msra.mxu1 %v5138_v3  ;;  %6870 = vmatpush2.msra.mxu0 %v13510_v7  ;;  %v4953_v6 = vmul.f32 %v4900_v31, %v13506_v29  ;;  %v5666_v60 = vmul.f32 %v13513_v27, %v13512_v0  ;;  %v13522_v31 = vld [vmem:[#allocation164_spill] sm:$0xff]  ;;  %v13529_v0 = vld [vmem:[#allocation169_spill] sm:$0xff] }
 0x471   : > { %6871 = vmatprep.subr.mxu0 %v5845_v26  ;;  %v5667_v28 = vmul.f32 %v5609_v39, %v13511_v5  ;;  %7267 = vmatprep.subr.mxu1 %v4961_v56  ;;  %v4885_v48 = vpop.permute.xlu1 %4884  ;;  %v4952_v58 = vmul.f32 %v4904_v47, %v13507_v44  ;;  %v5659_v13 = vmul.f32 %v5609_v39, %v13514_v32  ;;  %v13521_v56 = vld [vmem:[#allocation6_spill] sm:$0xff]  ;;  %v13523_v47 = vld [vmem:[#allocation21_spill] sm:$0xff]  ;;  %v13526_v14 = vld [vmem:[#allocation112_spill] sm:$0xff] }
 0x472   : > { %6872 = vmatpush2.msra.mxu0 %v5844_v15  ;;  %7268 = vmatpush1.msra.mxu1 %v4960_v2  ;;  %v4899_v33 = vsel %vm354_vm3, %v4885_v48, %v13461_v41  ;;  %v4903_v36 = vsel %vm354_vm3, %v11919_v55, %v4885_v48  ;;  %v5658_v23 = vmul.f32 %v13513_v27, %v13515_v17  ;;  %v13527_v15 = vld [vmem:[#allocation185_spill] sm:$0xff] }
 0x473   : > { %6873 = vmatprep.subr.mxu0 %v5667_v28  ;;  %7269 = vmatprep.subr.mxu1 %v4953_v6  ;;  %v4944_v53 = vmul.f32 %v4903_v36, %v13507_v44  ;;  %v4945_v18 = vmul.f32 %v4899_v33, %v13506_v29  ;;  %v5650_v41 = vmul.f32 %v13513_v27, %v13516_v54  ;;  %v4883_v38 = vpop.permute.xlu0 %4882  ;;  %v13528_v6 = vld [vmem:[#allocation20_spill] sm:$0xff]  ;;  %v13533_v17 = vld [vmem:[#allocation93_spill] sm:$0xff] }
 0x474   : > { %6874 = vmatpush2.msra.mxu0 %v5666_v60  ;;  %7270 = vmatpush1.msra.mxu1 %v4952_v58  ;;  %v5651_v63 = vmul.f32 %v5609_v39, %v13517_v22  ;;  %v4898_v45 = vsel %vm354_vm3, %v4883_v38, %v13518_v61  ;;  %v4902_v30 = vsel %vm354_vm3, %v11941_v52, %v4883_v38  ;;  %v13530_v58 = vld [vmem:[#allocation100_spill] sm:$0xff]  ;;  %v13535_v22 = vld [vmem:[#allocation130_spill] sm:$0xff] }
 0x475   : > { %6875 = vmatprep.subr.mxu0 %v5659_v13  ;;  %7271 = vmatprep.subr.mxu1 %v4945_v18  ;;  %v12054_v21 = vpop.permute.xlu1 %6162  ;;  %v6391_v8 = vsel %vm4262_vm9, %v13520_v49, %v13519_v51  ;;  %v4936_v35 = vmul.f32 %v4902_v30, %v13507_v44  ;;  %v4937_v37 = vmul.f32 %v4898_v45, %v13506_v29  ;;  %v13524_v44 = vld [vmem:[#allocation166_spill] sm:$0xff]  ;;  %v13525_v29 = vld [vmem:[#allocation7_spill] sm:$0xff]  ;;  %v13531_v33 = vld [vmem:[#allocation168_spill] sm:$0xff] }
 0x476   : > { %6876 = vmatpush2.msra.mxu0 %v5658_v23  ;;  %7272 = vmatpush1.msra.mxu1 %v4944_v53  ;;  %v6425_v3 = vrot.slane %v12065_v10, %v13521_v56  ;;  %v6395_v2 = vsel %vm4262_vm9, %v13522_v31, %v13520_v49  ;;  %v5643_v26 = vmul.f32 %v5609_v39, %v13523_v47  ;;  %v12102_v18 = vld [vmem:[%s12809_s3] sm:$0xff]  ;;  %v13534_v23 = vld [vmem:[#allocation153_spill] sm:$0xff]  ;;  %v13537_v51 = vld [vmem:[#allocation122_spill] sm:$0xff] }
 0x477   : > { %6877 = vmatprep.subr.mxu0 %v5651_v63  ;;  %7307 = vmatprep.mubr.f32.mxu1 %v13524_v44  ;;  %v6421_v1 = vrot.slane %v12065_v10, %v13525_v29  ;;  %v6390_v7 = vsel %vm4262_vm9, %v13527_v15, %v13526_v14  ;;  %v5642_v5 = vmul.f32 %v13513_v27, %v13528_v6  ;;  %v12083_v28 = vpop.permute.xlu0 %6160  ;;  %v13532_v27 = vld [vmem:[#allocation155_spill] sm:$0xff]  ;;  %v13536_v30 = vld [vmem:[#allocation124_spill] sm:$0xff]  ;;  %v13542_v29 = vld [vmem:[#allocation109_spill] sm:$0xff] }
 0x478   : > { %6878 = vmatpush2.msra.mxu0 %v5650_v41  ;;  %7273 = vmatprep.subr.mxu1 %v4937_v37  ;;  %v6394_v39 = vsel %vm4262_vm9, %v13529_v0, %v13527_v15  ;;  %v6477_v60 = vmul.f32 %v6425_v3, %v6391_v8  ;;  %v6389_v36 = vsel %vm4262_vm9, %v13531_v33, %v13530_v58  ;;  %v13539_v31 = vld [vmem:[#allocation8_spill] sm:$0xff]  ;;  %v13543_v15 = vld [vmem:[#allocation9_spill] sm:$0xff]  ;;  %v13544_v0 = vld [vmem:[#allocation154_spill] sm:$0xff] }
 0x479   : > { %6879 = vmatprep.subr.mxu0 %v5643_v26  ;;  %v12089_v48 = vpop.permute.xlu1 %6152  ;;  %7274 = vmatpush1.msra.mxu1 %v4936_v35  ;;  %v6476_v32 = vmul.f32 %v6421_v1, %v6395_v2  ;;  %v6393_v13 = vsel %vm4262_vm9, %v13532_v27, %v13531_v33  ;;  %v6469_v53 = vmul.f32 %v6425_v3, %v6390_v7  ;;  %v13538_v35 = vld [vmem:[#allocation187_spill] sm:$0xff]  ;;  %v13541_v26 = vld [vmem:[#allocation114_spill] sm:$0xff]  ;;  %v12153_v27 = vld [vmem:[%s12809_s3 + $0x8] sm:$0xf] }
 0x47a   : > { %6880 = vmatpush2.msra.mxu0 %v5642_v5  ;;  %v6388_v54 = vsel %vm4262_vm9, %v13534_v23, %v13533_v17  ;;  %v6468_v41 = vmul.f32 %v6421_v1, %v6394_v39  ;;  %v6392_v63 = vsel %vm4262_vm9, %v13535_v22, %v13534_v23  ;;  %v6461_v61 = vmul.f32 %v6425_v3, %v6389_v36  ;;  %v13540_v2 = vld [vmem:[#allocation175_spill] sm:$0xff] }
 0x47b   : > { %6882 = vmatmul.mubr.f32.vlgmr.msra.gmra.mxu0 %v12102_v18  ;;  %7054 = vmatprep.subr.mxu0 %v6477_v60  ;;  %v12110_v38 = vpop.permute.xlu0 %6158  ;;  %v5473_v49 = vsel %vm1791_vm5, %v13537_v51, %v13536_v30  ;;  %v6460_v8 = vmul.f32 %v6421_v1, %v6393_v13  ;;  %v5477_v37 = vsel %vm1791_vm5, %v13538_v35, %v13537_v51  ;;  %v13545_v58 = vld [vmem:[#allocation103_spill] sm:$0xff]  ;;  %v13551_v51 = vld [vmem:[#allocation189_spill] sm:$0xff] }
 0x47c   : > { %7055 = vmatpush1.msra.mxu0 %v6476_v32  ;;  %7094 = vmatprep.mubr.f32.mxu0 %v13477_v40  ;;  %v6453_v56 = vmul.f32 %v6425_v3, %v6388_v54  ;;  %v5519_v47 = vrot.slane %v13540_v2, %v13539_v31  ;;  %v5472_v14 = vsel %vm1791_vm5, %v13542_v29, %v13541_v26  ;;  %v13549_v54 = vld [vmem:[#allocation126_spill] sm:$0xff] }
 0x47d   : > { %7056 = vmatprep.subr.mxu0 %v6469_v53  ;;  %v12116_v45 = vpop.permute.xlu1 %6150  ;;  %v5515_v7 = vrot.slane %v13540_v2, %v13543_v15  ;;  %v6452_v6 = vmul.f32 %v6421_v1, %v6392_v63  ;;  %v5476_v3 = vsel %vm1791_vm5, %v13544_v0, %v13542_v29  ;;  %v5471_v33 = vsel %vm1791_vm5, %v13545_v58, %v13479_v62  ;;  %v13546_v1 = vld [vmem:[#allocation158_spill] sm:$0xff]  ;;  %v13548_v53 = vld [vmem:[#allocation92_spill] sm:$0xff]  ;;  %v13553_v29 = vld [vmem:[#allocation157_spill] sm:$0xff] }
 0x47e   : > { %7057 = vmatpush1.msra.mxu0 %v6468_v41  ;;  %v5565_v39 = vmul.f32 %v5519_v47, %v5473_v49  ;;  %v5475_v32 = vsel %vm1791_vm5, %v13546_v1, %v13545_v58  ;;  %13547 = vst [vmem:[#allocation150_spill] sm:$0xff] %v12153_v27  ;;  %v5557_v13 = vmul.f32 %v5519_v47, %v5472_v14  ;;  %v7923_v49 = vld [vmem:[%s12811_s5 + $0x10] sm:$0xff] }
 0x47f   : > { %7058 = vmatprep.subr.mxu0 %v6461_v61  ;;  %v12134_v5 = vpop.permute.xlu0 %5954  ;;  %v5564_v36 = vmul.f32 %v5515_v7, %v5477_v37  ;;  %v5470_v62 = vsel %vm1791_vm5, %v13548_v53, %v13483_v9  ;;  %v5556_v17 = vmul.f32 %v5515_v7, %v5476_v3  ;;  %v5474_v41 = vsel %vm1791_vm5, %v13549_v54, %v13548_v53  ;;  %v13550_v61 = vld [vmem:[#allocation121_spill] sm:$0xff]  ;;  %v13552_v37 = vld [vmem:[#allocation111_spill] sm:$0xff]  ;;  %v13555_v3 = vld [vmem:[#allocation160_spill] sm:$0xff] }
 0x480   : > { %7059 = vmatpush1.msra.mxu0 %v6460_v8  ;;  %v5549_v22 = vmul.f32 %v5519_v47, %v5471_v33  ;;  %v5271_v9 = vsel %vm1291_vm4, %v13550_v61, %v13486_v59  ;;  %v5548_v30 = vmul.f32 %v5515_v7, %v5475_v32  ;;  %v5317_v8 = vrot.slane %v7923_v49, %v13539_v31  ;;  %v7924_v53 = vld [vmem:[%s12811_s5 + $0x8] sm:$0xff] }
 0x481   : > { %7060 = vmatprep.subr.mxu0 %v6453_v56  ;;  %v12140_v60 = vpop.permute.xlu1 %5962  ;;  %v5541_v35 = vmul.f32 %v5519_v47, %v5470_v62  ;;  %v5270_v59 = vsel %vm1291_vm4, %v13552_v37, %v13488_v4  ;;  %v5540_v56 = vmul.f32 %v5515_v7, %v5474_v41  ;;  %v5313_v2 = vrot.slane %v7923_v49, %v13543_v15  ;;  %v13554_v47 = vld [vmem:[#allocation102_spill] sm:$0xff]  ;;  %v13560_v49 = vld [vmem:[#allocation64_spill] sm:$0xff] }
 0x482   : > { %7061 = vmatpush1.msra.mxu0 %v6452_v6  ;;  %v5274_v14 = vsel %vm1291_vm4, %v13553_v29, %v13552_v37  ;;  %v5363_v6 = vmul.f32 %v5317_v8, %v5271_v9  ;;  %v5269_v4 = vsel %vm1291_vm4, %v13554_v47, %v13491_v24  ;;  %v5355_v58 = vmul.f32 %v5317_v8, %v5270_v59  ;;  %v13557_v24 = vld [vmem:[#allocation129_spill] sm:$0xff]  ;;  %v13563_v29 = vld [vmem:[#allocation148_spill] sm:$0xff] }
 0x483   : > { %7871 = vmatmul.mubr.msk.f32.vlgmr.msra.gmra.mxu0 %vm6814_vm10, %v12153_v27  ;;  %7101 = vmatprep.subr.mxu0 %v5565_v39  ;;  %v12161_v23 = vpop.permute.xlu0 %6170  ;;  %v5273_v39 = vsel %vm1291_vm4, %v13555_v3, %v13554_v47  ;;  %v5354_v33 = vmul.f32 %v5313_v2, %v5274_v14  ;;  %v5115_v62 = vrot.slane %v7924_v53, %v13539_v31  ;;  %v13561_v59 = vld [vmem:[#allocation181_spill] sm:$0xff]  ;;  %v13564_v14 = vld [vmem:[#allocation162_spill] sm:$0xff] }
 0x484   : > { %7102 = vmatpush1.msra.mxu0 %v5564_v36  ;;  %7165 = vmatprep.mubr.f32.mxu0 %v13524_v44  ;;  %v5275_v44 = vsel %vm1291_vm4, %v13551_v51, %v13550_v61  ;;  %v13556_v36 = vld [vmem:[#allocation94_spill] sm:$0xff]  ;;  %v5346_v41 = vmul.f32 %v5313_v2, %v5273_v39  ;;  %v5111_v61 = vrot.slane %v7924_v53, %v13543_v15  ;;  %v13559_v51 = vld [vmem:[#allocation159_spill] sm:$0xff] }
 0x485   : > { %7103 = vmatprep.subr.mxu0 %v5557_v13  ;;  %v12168_v63 = vpop.permute.xlu1 %5952  ;;  %v5362_v7 = vmul.f32 %v5313_v2, %v5275_v44  ;;  %v5268_v1 = vsel %vm1291_vm4, %v13556_v36, %v11454_v12  ;;  %v5272_v13 = vsel %vm1291_vm4, %v13557_v24, %v13556_v36  ;;  %v13566_v39 = vld [vmem:[#allocation183_spill] sm:$0xff]  ;;  %v13568_v53 = vld [vmem:[#allocation178_spill] sm:$0xff] }
 0x486   : > { %7104 = vmatpush1.msra.mxu0 %v5556_v17  ;;  %v5347_v17 = vmul.f32 %v5317_v8, %v5269_v4  ;;  %v5339_v12 = vmul.f32 %v5317_v8, %v5268_v1  ;;  %v13562_v8 = vld [vmem:[#allocation152_spill] sm:$0xff]  ;;  %v7925_v24 = vld [vmem:[%s12811_s5 + $0x38] sm:$0xff] }
 0x487   : > { %7105 = vmatprep.subr.mxu0 %v5549_v22  ;;  %v12187_v26 = vpop.permute.xlu0 %5960  ;;  %v5338_v22 = vmul.f32 %v5313_v2, %v5272_v13  ;;  %v5153_v2 = vmul.f32 %v5115_v62, %v13562_v8  ;;  %v6227_v13 = vrot.slane %v7925_v24, %v13543_v15  ;;  %v13570_v8 = vld [vmem:[#allocation147_spill] sm:$0xff] }
 0x488   : > { %7106 = vmatpush1.msra.mxu0 %v5548_v30  ;;  %v13558_v30 = vld [vmem:[#allocation62_spill] sm:$0xff] }
 0x489   : > { %7107 = vmatprep.subr.mxu0 %v5541_v35  ;;  %v12193_v0 = vpop.permute.xlu1 %6168  ;;  %v5072_v44 = vsel %vm429_vm0, %v13559_v51, %v13558_v30  ;;  %v5161_v35 = vmul.f32 %v5115_v62, %v13560_v49  ;;  %v12263_v49 = vrot.slane %v7925_v24, %v13459_v57 }
 0x48a   : > { %7108 = vmatpush1.msra.mxu0 %v5540_v56  ;;  %v5160_v56 = vmul.f32 %v5111_v61, %v13561_v59  ;;  %v5152_v47 = vmul.f32 %v5111_v61, %v5072_v44  ;;  %v12260_v44 = vrot.slane %v7925_v24, %v13452_v20 }
 0x48b   : > { %7109 = vmatprep.subr.mxu0 %v5363_v6  ;;  %v12207_v32 = vpop.permute.xlu0 %5950  ;;  %v5071_v6 = vsel %vm429_vm0, %v13564_v14, %v13563_v29  ;;  %v13572_v14 = vld [vmem:[#allocation165_spill] sm:$0xff] }
 0x48c   : > { %7110 = vmatpush1.msra.mxu0 %v5362_v7  ;;  %v13565_v7 = vld [vmem:[#allocation141_spill] sm:$0xff]  ;;  %v5144_v1 = vmul.f32 %v5111_v61, %v5071_v6  ;;  %v4911_v6 = vsel %vm354_vm3, %v13572_v14, %v11878_v50  ;;  %v13577_v14 = vld [vmem:[#allocation106_spill] sm:$0xff] }
 0x48d   : > { %7111 = vmatprep.subr.mxu0 %v5355_v58  ;;  %v12217_v54 = vpop.permute.xlu1 %5958  ;;  %v5145_v3 = vmul.f32 %v5115_v62, %v13565_v7  ;;  %v13567_v58 = vld [vmem:[#allocation131_spill] sm:$0xff] }
 0x48e   : > { %7112 = vmatpush1.msra.mxu0 %v5354_v33  ;;  %v5070_v33 = vsel %vm429_vm0, %v13567_v58, %v13566_v39  ;;  %v13574_v39 = vld [vmem:[#allocation167_spill] sm:$0xff] }
 0x48f   : > { %7113 = vmatprep.subr.mxu0 %v5347_v17  ;;  %v12220_v9 = vpop.permute.xlu0 %6166  ;;  %v5137_v17 = vmul.f32 %v5115_v62, %v13568_v53  ;;  %v5136_v51 = vmul.f32 %v5111_v61, %v5070_v33  ;;  %v7927_v62 = vld [vmem:[%s12811_s5 + $0x28] sm:$0xff]  ;;  %v4907_v33 = vsel %vm354_vm3, %v11878_v50, %v11919_v55  ;;  %v13575_v53 = vld [vmem:[#allocation132_spill] sm:$0xff] }
 0x490   : > { %7114 = vmatpush1.msra.mxu0 %v5346_v41  ;;  %v6231_v41 = vrot.slane %v7925_v24, %v13539_v31  ;;  %v13571_v61 = vld [vmem:[#allocation161_spill] sm:$0xff]  ;;  %v12310_v50 = vrot.slane %v7927_v62, %v13459_v57 }
 0x491   : > { %7115 = vmatprep.subr.mxu0 %v5339_v12  ;;  %v12227_v37 = vpop.permute.xlu1 %5948  ;;  %v7926_v12 = vld [vmem:[%s12811_s5 + $0x30] sm:$0xff]  ;;  %v4912_v29 = vsel %vm354_vm3, %v13571_v61, %v11851_v19 }
 0x492   : > { %7116 = vmatpush1.msra.mxu0 %v5338_v22  ;;  %v12254_v22 = vrot.slane %v7926_v12, %v13543_v15  ;;  %v12257_v30 = vrot.slane %v7926_v12, %v13539_v31  ;;  %v12295_v19 = vrot.slane %v7926_v12, %v13452_v20 }
 0x493   : > { %7117 = vmatprep.subr.mxu0 %v5161_v35  ;;  %v12235_v4 = vpop.permute.xlu0 %5956  ;;  %v12269_v35 = vrot.slane %v7927_v62, %v13543_v15 }
 0x494   : > { %7118 = vmatpush1.msra.mxu0 %v5160_v56  ;;  %v13569_v56 = vld [vmem:[#allocation14_spill] sm:$0xff] }
 0x495   : > { %7119 = vmatprep.subr.mxu0 %v5153_v2  ;;  %v12242_v36 = vpop.permute.xlu1 %5760  ;;  %v4959_v2 = vmul.f32 %v13570_v8, %v13569_v56  ;;  %v4951_v24 = vmul.f32 %v11862_v43, %v13569_v56  ;;  %v12307_v8 = vrot.slane %v7927_v62, %v13452_v20  ;;  %v4906_v43 = vsel %vm354_vm3, %v11952_v42, %v11941_v52 }
 0x496   : > { %7120 = vmatpush1.msra.mxu0 %v5152_v47  ;;  %v12284_v47 = vrot.slane %v7927_v62, %v13539_v31  ;;  %v4943_v62 = vmul.f32 %v4907_v33, %v13569_v56  ;;  %v6184_v52 = vsel %vm3762_vm8, %v13577_v14, %v12027_v25 }
 0x497   : > { %7121 = vmatprep.subr.mxu0 %v5145_v3  ;;  %v12271_v59 = vpop.permute.xlu0 %5752  ;;  %v13573_v3 = vld [vmem:[#allocation13_spill] sm:$0xff] }
 0x498   : > { %7122 = vmatpush1.msra.mxu0 %v5144_v1  ;;  %v4958_v58 = vmul.f32 %v13574_v39, %v13573_v3  ;;  %v12298_v1 = vrot.slane %v7926_v12, %v13459_v57  ;;  %v4950_v55 = vmul.f32 %v4912_v29, %v13573_v3  ;;  %v4942_v12 = vmul.f32 %v4911_v6, %v13573_v3 }
 0x499   : > { %7123 = vmatprep.subr.mxu0 %v5137_v17  ;;  %v12286_v7 = vpop.permute.xlu1 %5750  ;;  %v4910_v17 = vsel %vm354_vm3, %v13575_v53, %v11952_v42  ;;  %v6181_v29 = vsel %vm3762_vm8, %v12007_v16, %v12003_v34  ;;  %v6180_v42 = vsel %vm3762_vm8, %v12027_v25, %v12054_v21  ;;  %v13579_v53 = vld [vmem:[#allocation87_spill] sm:$0xff] }
 0x49a   : > { %7124 = vmatpush1.msra.mxu0 %v5136_v51  ;;  %v13576_v51 = vld [vmem:[#allocation115_spill] sm:$0xff]  ;;  %v4934_v39 = vmul.f32 %v4910_v17, %v13573_v3  ;;  %v6182_v25 = vsel %vm3762_vm8, %v13579_v53, %v12116_v45  ;;  %v6178_v3 = vsel %vm3762_vm8, %v12116_v45, %v12110_v38  ;;  %v13580_v17 = vld [vmem:[#allocation118_spill] sm:$0xff]  ;;  %v6269_v27 = vmul.f32 %v6231_v41, %v6180_v42  ;;  %v13581_v53 = vld [vmem:[#allocation68_spill] sm:$0xff] }
 0x49b   : > { %7125 = vmatprep.subr.mxu0 %v4959_v2  ;;  %v6185_v2 = vsel %vm3762_vm8, %v13576_v51, %v12007_v16  ;;  %v12322_v61 = vpop.permute.xlu0 %5968  ;;  %v6179_v16 = vsel %vm3762_vm8, %v12089_v48, %v12083_v28  ;;  %v5983_v14 = vsel %vm3262_vm7, %v13580_v17, %v12134_v5  ;;  %v6252_v45 = vmul.f32 %v6227_v13, %v6182_v25 }
 0x49c   : > { %7126 = vmatpush1.msra.mxu0 %v4958_v58  ;;  %v13578_v58 = vld [vmem:[#allocation98_spill] sm:$0xff]  ;;  %v6276_v51 = vmul.f32 %v6227_v13, %v6185_v2  ;;  %v6261_v2 = vmul.f32 %v6231_v41, %v6179_v16  ;;  %v6204_v17 = vsel %vm3762_vm8, %v12161_v23, %v13581_v53  ;;  %v6176_v16 = vsel %vm3762_vm8, %v12054_v21, %v12161_v23 }
 0x49d   : > { %7127 = vmatprep.subr.mxu0 %v4951_v24  ;;  %v12337_v6 = vpop.permute.xlu1 %5966  ;;  %v6183_v33 = vsel %vm3762_vm8, %v13578_v58, %v12089_v48  ;;  %v4935_v24 = vmul.f32 %v4906_v43, %v13569_v56  ;;  %v6277_v48 = vmul.f32 %v6231_v41, %v6181_v29  ;;  %v6268_v58 = vmul.f32 %v6227_v13, %v6184_v52 }
 0x49e   : > { %7128 = vmatpush1.msra.mxu0 %v4950_v55  ;;  %v5979_v56 = vsel %vm3262_vm7, %v12134_v5, %v12140_v60  ;;  %v6260_v43 = vmul.f32 %v6227_v13, %v6183_v33  ;;  %v6253_v29 = vmul.f32 %v6231_v41, %v6178_v3  ;;  %v6074_v52 = vmul.f32 %v12254_v22, %v5983_v14  ;;  %v13584_v3 = vld [vmem:[#allocation46_spill] sm:$0xff] }
 0x49f   : > { %7129 = vmatprep.subr.mxu0 %v4943_v62  ;;  %v12365_v55 = vpop.permute.xlu0 %5758  ;;  %v6075_v13 = vmul.f32 %v12257_v30, %v5979_v56  ;;  %v6271_v33 = vmul.f32 %v12263_v49, %v6204_v17  ;;  %v6203_v21 = vsel %vm3762_vm8, %v12193_v0, %v13584_v3  ;;  %v6175_v14 = vsel %vm3762_vm8, %v12083_v28, %v12193_v0  ;;  %v13586_v0 = vld [vmem:[#allocation34_spill] sm:$0xff]  ;;  %v13591_v3 = vld [vmem:[#allocation49_spill] sm:$0xff] }
 0x4a0   : > { %7130 = vmatpush1.msra.mxu0 %v4942_v12  ;;  %v13582_v12 = vld [vmem:[#allocation78_spill] sm:$0xff]  ;;  %v6270_v53 = vmul.f32 %v12260_v44, %v6176_v16  ;;  %v6174_v28 = vsel %vm3762_vm8, %v12110_v38, %v12220_v9  ;;  %v6202_v17 = vsel %vm3762_vm8, %v12220_v9, %v13586_v0  ;;  %v13587_v16 = vld [vmem:[#allocation89_spill] sm:$0xff] }
 0x4a1   : > { %7131 = vmatprep.subr.mxu0 %v4935_v24  ;;  %v6173_v62 = vpop.permute.xlu1 %6172  ;;  %v5978_v24 = vsel %vm3262_vm7, %v12168_v63, %v12187_v26  ;;  %v6254_v9 = vmul.f32 %v12260_v44, %v6174_v28 }
 0x4a2   : > { %7132 = vmatpush1.msra.mxu0 %v4934_v39  ;;  %v6177_v5 = vsel %vm3762_vm8, %v12003_v34, %v6173_v62  ;;  %v6205_v42 = vsel %vm3762_vm8, %v6173_v62, %v13582_v12  ;;  %v13583_v34 = vld [vmem:[#allocation108_spill] sm:$0xff]  ;;  %v6263_v62 = vmul.f32 %v12263_v49, %v6203_v21  ;;  %v6001_v21 = vsel %vm3262_vm7, %v12337_v6, %v13591_v3  ;;  %v13599_v3 = vld [vmem:[#allocation65_spill] sm:$0xff] }
 0x4a3   : > { %7133 = vmatprep.subr.mxu0 %v6277_v48  ;;  %v6278_v41 = vmul.f32 %v12260_v44, %v6177_v5  ;;  %v6279_v39 = vmul.f32 %v12263_v49, %v6205_v42  ;;  %v5982_v25 = vsel %vm3262_vm7, %v13583_v34, %v12168_v63  ;;  %v12398_v23 = vpop.permute.xlu0 %5748  ;;  %v13585_v48 = vld [vmem:[#allocation101_spill] sm:$0xff]  ;;  %v5977_v63 = vsel %vm3262_vm7, %v12207_v32, %v12217_v54  ;;  %v13590_v34 = vld [vmem:[#allocation70_spill] sm:$0xff] }
 0x4a4   : > { %7134 = vmatpush2.msra.mxu0 %v6276_v51  ;;  %v5981_v56 = vsel %vm3262_vm7, %v13585_v48, %v12207_v32  ;;  %v6066_v32 = vmul.f32 %v12254_v22, %v5982_v25  ;;  %v6262_v5 = vmul.f32 %v12260_v44, %v6175_v14  ;;  %v6059_v38 = vmul.f32 %v12257_v30, %v5977_v63 }
 0x4a5   : > { %7135 = vmatprep.subr.mxu0 %v6269_v27  ;;  %7275 = vmatprep.subr.mxu1 %v6279_v39  ;;  %v12412_v51 = vpop.permute.xlu1 %5756  ;;  %v6067_v27 = vmul.f32 %v12257_v30, %v5978_v24  ;;  %v6058_v12 = vmul.f32 %v12254_v22, %v5981_v56  ;;  %v5976_v39 = vsel %vm3262_vm7, %v12227_v37, %v12235_v4 }
 0x4a6   : > { %7136 = vmatpush2.msra.mxu0 %v6268_v58  ;;  %7276 = vmatpush2.msra.mxu1 %v6278_v41  ;;  %v6255_v58 = vmul.f32 %v12263_v49, %v6202_v17  ;;  %v5980_v41 = vsel %vm3262_vm7, %v13587_v16, %v12227_v37  ;;  %v6002_v25 = vsel %vm3262_vm7, %v12322_v61, %v13590_v34  ;;  %v13595_v16 = vld [vmem:[#allocation91_spill] sm:$0xff] }
 0x4a7   : > { %7137 = vmatprep.subr.mxu0 %v6261_v2  ;;  %7277 = vmatprep.subr.mxu1 %v6271_v33  ;;  %v5965_v42 = vpop.permute.xlu0 %5964  ;;  %v13589_v33 = vld [vmem:[#allocation80_spill] sm:$0xff]  ;;  %v5777_v14 = vsel %vm2762_vm6, %v12271_v59, %v12242_v36  ;;  %v6061_v63 = vmul.f32 %v12298_v1, %v6001_v21  ;;  %v5775_v28 = vsel %vm2762_vm6, %v12398_v23, %v12412_v51 }
 0x4a8   : > { %7138 = vmatpush2.msra.mxu0 %v6260_v43  ;;  %7278 = vmatpush2.msra.mxu1 %v6270_v53  ;;  %v13588_v43 = vld [vmem:[#allocation120_spill] sm:$0xff]  ;;  %v5776_v53 = vsel %vm2762_vm6, %v12286_v7, %v12365_v55  ;;  %v5873_v17 = vmul.f32 %v12284_v47, %v5777_v14 }
 0x4a9   : > { %7139 = vmatprep.subr.mxu0 %v6253_v29  ;;  %7279 = vmatprep.subr.mxu1 %v6263_v62  ;;  %v5971_v2 = vpop.permute.xlu1 %5970  ;;  %v5781_v44 = vsel %vm2762_vm6, %v13588_v43, %v12271_v59  ;;  %v13594_v62 = vld [vmem:[#allocation97_spill] sm:$0xff]  ;;  %v13600_v21 = vld [vmem:[#allocation52_spill] sm:$0xff] }
 0x4aa   : > { %7140 = vmatpush2.msra.mxu0 %v6252_v45  ;;  %v5975_v49 = vsel %vm3262_vm7, %v12140_v60, %v5971_v2  ;;  %v6003_v29 = vsel %vm3262_vm7, %v5971_v2, %v13589_v33  ;;  %7280 = vmatpush2.msra.mxu1 %v6262_v5  ;;  %v6050_v45 = vmul.f32 %v12254_v22, %v5980_v41 }
 0x4ab   : > { %7141 = vmatprep.subr.mxu0 %v6075_v13  ;;  %v6076_v37 = vmul.f32 %v12295_v19, %v5975_v49  ;;  %v6077_v24 = vmul.f32 %v12298_v1, %v6003_v29  ;;  %v5974_v60 = vsel %vm3262_vm7, %v12187_v26, %v12322_v61  ;;  %7281 = vmatprep.subr.mxu1 %v6255_v58  ;;  %v12470_v48 = vpop.permute.xlu0 %5754  ;;  %v13592_v26 = vld [vmem:[#allocation110_spill] sm:$0xff] }
 0x4ac   : > { %7142 = vmatpush2.msra.mxu0 %v6074_v52  ;;  %v6051_v13 = vmul.f32 %v12257_v30, %v5976_v39  ;;  %v5872_v22 = vmul.f32 %v12269_v35, %v5781_v44  ;;  %7282 = vmatpush2.msra.mxu1 %v6254_v9  ;;  %v5780_v61 = vsel %vm2762_vm6, %v13592_v26, %v12286_v7  ;;  %v13596_v39 = vld [vmem:[#allocation82_spill] sm:$0xff] }
 0x4ad   : > { %7143 = vmatprep.subr.mxu0 %v6067_v27  ;;  %v6069_v52 = vmul.f32 %v12298_v1, %v6002_v25  ;;  %v5973_v30 = vsel %vm3262_vm7, %v12217_v54, %v12337_v6  ;;  %7283 = vmatprep.subr.mxu1 %v6077_v24  ;;  %v5747_v59 = vpop.permute.xlu1 %5746  ;;  %v6068_v56 = vmul.f32 %v12295_v19, %v5974_v60  ;;  %v13593_v6 = vld [vmem:[#allocation36_spill] sm:$0xff] }
 0x4ae   : > { %7144 = vmatpush2.msra.mxu0 %v6066_v32  ;;  %7284 = vmatpush2.msra.mxu1 %v6076_v37  ;;  %v5972_v54 = vsel %vm3262_vm7, %v12235_v4, %v5965_v42  ;;  %v6000_v0 = vsel %vm3262_vm7, %v5965_v42, %v13593_v6  ;;  %v6060_v7 = vmul.f32 %v12295_v19, %v5973_v30 }
 0x4af   : > { %7145 = vmatprep.subr.mxu0 %v6059_v38  ;;  %7285 = vmatprep.subr.mxu1 %v6069_v52  ;;  %v5774_v32 = vsel %vm2762_vm6, %v5747_v59, %v12470_v48  ;;  %v5864_v27 = vmul.f32 %v12269_v35, %v5780_v61  ;;  %v5865_v4 = vmul.f32 %v12284_v47, %v5776_v53 }
 0x4b0   : > { %7146 = vmatpush2.msra.mxu0 %v6058_v12  ;;  %7286 = vmatpush2.msra.mxu1 %v6068_v56  ;;  %v5779_v5 = vsel %vm2762_vm6, %v13594_v62, %v12398_v23  ;;  %v5767_v12 = vpop.permute.xlu0 %5766  ;;  %v5857_v38 = vmul.f32 %v12284_v47, %v5775_v28  ;;  %v6052_v42 = vmul.f32 %v12295_v19, %v5972_v54  ;;  %v13608_v62 = vld [vmem:[#allocation38_spill] sm:$0xff] }
 0x4b1   : > { %7147 = vmatprep.subr.mxu0 %v6051_v13  ;;  %7287 = vmatprep.subr.mxu1 %v6061_v63  ;;  %v6053_v9 = vmul.f32 %v12298_v1, %v6000_v0  ;;  %v5769_v58 = vpop.permute.xlu1 %5768  ;;  %v5778_v41 = vsel %vm2762_vm6, %v13595_v16, %v5747_v59  ;;  %v5849_v2 = vmul.f32 %v12284_v47, %v5774_v32  ;;  %v13597_v1 = vld [vmem:[#allocation72_spill] sm:$0xff]  ;;  %v13601_v13 = vld [vmem:[#allocation39_spill] sm:$0xff]  ;;  %v13603_v59 = vld [vmem:[#allocation50_spill] sm:$0xff] }
 0x4b2   : > { %7148 = vmatpush2.msra.mxu0 %v6050_v45  ;;  %7288 = vmatpush2.msra.mxu1 %v6060_v7  ;;  %v5773_v23 = vsel %vm2762_vm6, %v12242_v36, %v5769_v58  ;;  %v5801_v19 = vsel %vm2762_vm6, %v5769_v58, %v13596_v39  ;;  %v5800_v43 = vsel %vm2762_vm6, %v5767_v12, %v13597_v1  ;;  %v13598_v45 = vld [vmem:[#allocation57_spill] sm:$0xff]  ;;  %v13605_v32 = vld [vmem:[#allocation63_spill] sm:$0xff]  ;;  %v13614_v1 = vld [vmem:[#allocation192_spill] sm:$0xff] }
 0x4b3   : > { %7149 = vmatprep.subr.mxu0 %v5873_v17  ;;  %v5874_v44 = vmul.f32 %v12307_v8, %v5773_v23  ;;  %v5875_v49 = vmul.f32 %v12310_v50, %v5801_v19  ;;  %7289 = vmatprep.subr.mxu1 %v6053_v9  ;;  %v5856_v47 = vmul.f32 %v12269_v35, %v5779_v5  ;;  %v13612_v58 = vld [vmem:[#allocation61_spill] sm:$0xff] }
 0x4b4   : > { %7150 = vmatpush2.msra.mxu0 %v5872_v22  ;;  %v5772_v36 = vsel %vm2762_vm6, %v12365_v55, %v5767_v12  ;;  %7290 = vmatpush2.msra.mxu1 %v6052_v42  ;;  %v5621_v33 = vrot.slane %v12020_v46, %v13543_v15  ;;  %v5625_v29 = vrot.slane %v12020_v46, %v13539_v31  ;;  %v13611_v42 = vld [vmem:[#allocation151_spill] sm:$0xff] }
 0x4b5   : > { %7151 = vmatprep.subr.mxu0 %v5865_v4  ;;  %v5763_v34 = vpop.permute.xlu0 %5762  ;;  %7291 = vmatprep.subr.mxu1 %v5875_v49  ;;  %v5848_v25 = vmul.f32 %v12269_v35, %v5778_v41  ;;  %v5867_v37 = vmul.f32 %v12310_v50, %v5800_v43  ;;  %v5866_v55 = vmul.f32 %v12307_v8, %v5772_v36  ;;  %v13606_v4 = vld [vmem:[#allocation71_spill] sm:$0xff] }
 0x4b6   : > { %7152 = vmatpush2.msra.mxu0 %v5864_v27  ;;  %v5765_v24 = vpop.permute.xlu1 %5764  ;;  %v5670_v60 = vmul.f32 %v5621_v33, %v13598_v45  ;;  %7292 = vmatpush2.msra.mxu1 %v5874_v44  ;;  %v5671_v15 = vmul.f32 %v5625_v29, %v13599_v3  ;;  %v5798_v14 = vsel %vm2762_vm6, %v5763_v34, %v13601_v13  ;;  %v13615_v44 = vld [vmem:[#allocation37_spill] sm:$0xff]  ;;  %v13622_v13 = vld [vmem:[#allocation128_spill] sm:$0xff] }
 0x4b7   : > { %7153 = vmatprep.subr.mxu0 %v5857_v38  ;;  %v5771_v31 = vsel %vm2762_vm6, %v12412_v51, %v5765_v24  ;;  %v5799_v35 = vsel %vm2762_vm6, %v5765_v24, %v13600_v21  ;;  %7293 = vmatprep.subr.mxu1 %v5867_v37  ;;  %v5770_v61 = vsel %vm2762_vm6, %v12470_v48, %v5763_v34  ;;  %v13602_v51 = vld [vmem:[#allocation54_spill] sm:$0xff]  ;;  %v13604_v48 = vld [vmem:[#allocation47_spill] sm:$0xff]  ;;  %v13618_v37 = vld [vmem:[#allocation136_spill] sm:$0xff] }
 0x4b8   : > { %7154 = vmatpush2.msra.mxu0 %v5856_v47  ;;  %v5858_v22 = vmul.f32 %v12307_v8, %v5771_v31  ;;  %v5859_v26 = vmul.f32 %v12310_v50, %v5799_v35  ;;  %v5663_v52 = vmul.f32 %v5625_v29, %v13602_v51  ;;  %7294 = vmatpush2.msra.mxu1 %v5866_v55  ;;  %v13616_v47 = vld [vmem:[#allocation144_spill] sm:$0xff]  ;;  %v13617_v34 = vld [vmem:[#allocation139_spill] sm:$0xff]  ;;  %v13621_v21 = vld [vmem:[#allocation134_spill] sm:$0xff] }
 0x4b9   : > { %7155 = vmatprep.subr.mxu0 %v5849_v2  ;;  %v5629_v30 = vrot.slane %v12020_v46, %v13452_v20  ;;  %v5662_v56 = vmul.f32 %v5621_v33, %v13603_v59  ;;  %v6441_v63 = vrot.slane %v12065_v10, %v13459_v57  ;;  %v5633_v28 = vrot.slane %v12020_v46, %v13459_v57  ;;  %v13607_v46 = vld [vmem:[#allocation41_spill] sm:$0xff]  ;;  %v13624_v59 = vld [vmem:[#allocation150_spill] sm:$0xff] }
 0x4ba   : > { %7156 = vmatpush2.msra.mxu0 %v5848_v25  ;;  %v6373_v53 = vpop.permute.xlu0 %6372  ;;  %7295 = vmatprep.subr.mxu1 %v5859_v26  ;;  %v5851_v54 = vmul.f32 %v12310_v50, %v5798_v14  ;;  %v5655_v6 = vmul.f32 %v5625_v29, %v13604_v48  ;;  %v6437_v0 = vrot.slane %v12065_v10, %v13452_v20  ;;  %v13609_v20 = vld [vmem:[#allocation156_spill] sm:$0xff]  ;;  %v13613_v2 = vld [vmem:[#allocation201_spill] sm:$0xff]  ;;  %v13623_v26 = vld [vmem:[#allocation123_spill] sm:$0xff] }
 0x4bb   : > { %7157 = vmatprep.subr.mxu0 %v5671_v15  ;;  %v6375_v17 = vpop.permute.xlu1 %6374  ;;  %7296 = vmatpush2.msra.mxu1 %v5858_v22  ;;  %v5850_v7 = vmul.f32 %v12307_v8, %v5770_v61  ;;  %v5654_v50 = vmul.f32 %v5621_v33, %v13607_v46  ;;  %v5647_v5 = vmul.f32 %v5625_v29, %v13608_v62  ;;  %v13610_v8 = vld [vmem:[#allocation30_spill] sm:$0xff]  ;;  %v13620_v15 = vld [vmem:[#allocation179_spill] sm:$0xff]  ;;  %v7446_v48 = vld [vmem:[%s12812_s6 + $0xa8] sm:$0xff] }
 0x4bc   : > { %7158 = vmatpush2.msra.mxu0 %v5670_v60  ;;  %v6379_v27 = vsel %vm4262_vm9, %v13605_v32, %v6375_v17  ;;  %v6407_v57 = vsel %vm4262_vm9, %v6375_v17, %v13606_v4  ;;  %7297 = vmatprep.subr.mxu1 %v5851_v54  ;;  %v5673_v10 = vmul.f32 %v5633_v28, %v13609_v20  ;;  %v13619_v60 = vld [vmem:[#allocation28_spill] sm:$0xff]  ;;  %v7447_v54 = vld [vmem:[%s12812_s6 + $0xb0] sm:$0xff] }
 0x4bd   : > { %7159 = vmatprep.subr.mxu0 %v5663_v52  ;;  %v6481_v12 = vmul.f32 %v6441_v63, %v6407_v57  ;;  %v5646_v38 = vmul.f32 %v5621_v33, %v13610_v8  ;;  %7298 = vmatpush2.msra.mxu1 %v5850_v7  ;;  %v5672_v9 = vmul.f32 %v5629_v30, %v13611_v42  ;;  %v7455_v52 = vld [vmem:[%s12812_s6 + $0xf0] sm:$0xff]  ;;  %v7442_v7 = vld [vmem:[%s12812_s6 + $0x88] sm:$0xff]  ;;  %v7441_v32 = vld [vmem:[%s12812_s6 + $0x80] sm:$0xff] }
 0x4be   : > { %7160 = vmatpush2.msra.mxu0 %v5662_v56  ;;  %v6406_v16 = vsel %vm4262_vm9, %v6373_v53, %v13612_v58  ;;  %v6480_v41 = vmul.f32 %v6437_v0, %v6379_v27  ;;  %7299 = vmatprep.subr.mxu1 %v5673_v10  ;;  %v6378_v23 = vsel %vm4262_vm9, %v13613_v2, %v6373_v53  ;;  %v7453_v56 = vld [vmem:[%s12812_s6 + $0xe0] sm:$0xff]  ;;  %v7443_v17 = vld [vmem:[%s12812_s6 + $0x90] sm:$0xff]  ;;  %v7440_v27 = vld [vmem:[%s12812_s6 + $0x78] sm:$0xff] }
 0x4bf   : > { %7161 = vmatprep.subr.mxu0 %v5655_v6  ;;  %7300 = vmatpush2.msra.mxu1 %v5672_v9  ;;  %v5665_v36 = vmul.f32 %v5633_v28, %v13616_v47  ;;  %v6473_v33 = vmul.f32 %v6441_v63, %v6406_v16  ;;  %v5664_v25 = vmul.f32 %v5629_v30, %v13617_v34  ;;  %v7449_v53 = vld [vmem:[%s12812_s6 + $0xc0] sm:$0xff]  ;;  %v7439_v4 = vld [vmem:[%s12812_s6 + $0x70] sm:$0xff]  ;;  %v7438_v57 = vld [vmem:[%s12812_s6 + $0x68] sm:$0xff] }
 0x4c0   : > { %7162 = vmatpush2.msra.mxu0 %v5654_v50  ;;  %v5657_v24 = vmul.f32 %v5633_v28, %v13618_v37  ;;  %v6472_v45 = vmul.f32 %v6437_v0, %v6378_v23  ;;  %v5656_v35 = vmul.f32 %v5629_v30, %v13621_v21  ;;  %v5649_v14 = vmul.f32 %v5633_v28, %v13622_v13  ;;  %v7448_v28 = vld [vmem:[%s12812_s6 + $0xb8] sm:$0xff]  ;;  %v7445_v6 = vld [vmem:[%s12812_s6 + $0xa0] sm:$0xff]  ;;  %v7435_v62 = vld [vmem:[%s12812_s6 + $0x50] sm:$0xff] }
 0x4c1   : > { %7163 = vmatprep.subr.mxu0 %v5647_v5  ;;  %7301 = vmatprep.subr.mxu1 %v5665_v36  ;;  %v5648_v61 = vmul.f32 %v5629_v30, %v13623_v26  ;;  %v7454_v30 = vld [vmem:[%s12812_s6 + $0xe8] sm:$0xff]  ;;  %v7437_v46 = vld [vmem:[%s12812_s6 + $0x60] sm:$0xff]  ;;  %v7436_v50 = vld [vmem:[%s12812_s6 + $0x58] sm:$0xff] }
 0x4c2   : > { %7164 = vmatpush2.msra.mxu0 %v5646_v38  ;;  %v6369_v39 = vpop.permute.xlu0 %6368  ;;  %v6371_v19 = vpop.permute.xlu1 %6370  ;;  %7302 = vmatpush2.msra.mxu1 %v5664_v25  ;;  %v7434_v5 = vld [vmem:[%s12812_s6 + $0x48] sm:$0xff]  ;;  %v7433_v20 = vld [vmem:[%s12812_s6 + $0x40] sm:$0xff]  ;;  %v7432_v10 = vld [vmem:[%s12812_s6 + $0x38] sm:$0xff] }
 0x4c3   : > { %7166 = vmatmul.mubr.f32.vlgmr.msra.gmra.mxu0 %v12102_v18  ;;  %v6377_v43 = vsel %vm4262_vm9, %v13614_v1, %v6371_v19  ;;  %v6405_v49 = vsel %vm4262_vm9, %v6371_v19, %v13615_v44  ;;  %7338 = vmatprep.subr.mxu0 %v6481_v12  ;;  %v6404_v55 = vsel %vm4262_vm9, %v6369_v39, %v13619_v60  ;;  %v7431_v12 = vld [vmem:[%s12812_s6 + $0x30] sm:$0xff]  ;;  %v7430_v8 = vld [vmem:[%s12812_s6 + $0x28] sm:$0xff]  ;;  %v7429_v38 = vld [vmem:[%s12812_s6 + $0x20] sm:$0xff] }
 0x4c4   : > { %v6465_v29 = vmul.f32 %v6441_v63, %v6405_v49  ;;  %v6464_v3 = vmul.f32 %v6437_v0, %v6377_v43  ;;  %7339 = vmatpush1.msra.mxu0 %v6480_v41  ;;  %v6376_v31 = vsel %vm4262_vm9, %v13620_v15, %v6369_v39  ;;  %7303 = vmatprep.subr.mxu1 %v5657_v24  ;;  %v7428_v42 = vld [vmem:[%s12812_s6 + $0x18] sm:$0xff]  ;;  %v7427_v9 = vld [vmem:[%s12812_s6 + $0x10] sm:$0xff]  ;;  %v7426_v58 = vld [vmem:[%s12812_s6 + $0x8] sm:$0xff] }
 0x4c5   : > { %7340 = vmatprep.subr.mxu0 %v6473_v33  ;;  %v6457_v22 = vmul.f32 %v6441_v63, %v6404_v55  ;;  %7304 = vmatpush2.msra.mxu1 %v5656_v35  ;;  %v6456_v51 = vmul.f32 %v6437_v0, %v6376_v31  ;;  %v7450_v63 = vld [vmem:[%s12812_s6 + $0xc8] sm:$0xff]  ;;  %v7444_v0 = vld [vmem:[%s12812_s6 + $0x98] sm:$0xff]  ;;  %v7425_v16 = vld [vmem:[%s12812_s6] sm:$0xff] }
 0x4c6   : > { %7341 = vmatpush1.msra.mxu0 %v6472_v45  ;;  %7305 = vmatprep.subr.mxu1 %v5649_v14  ;;  %v7488_v41 = vld [vmem:[%s12812_s6 + $0x1f8] sm:$0xff]  ;;  %v7487_v2 = vld [vmem:[%s12812_s6 + $0x1f0] sm:$0xff]  ;;  %v7486_v23 = vld [vmem:[%s12812_s6 + $0x1e8] sm:$0xff] }
 0x4c7   : > { %7342 = vmatprep.subr.mxu0 %v6465_v29  ;;  %7306 = vmatpush2.msra.mxu1 %v5648_v61  ;;  %v7485_v39 = vld [vmem:[%s12812_s6 + $0x1e0] sm:$0xff]  ;;  %v7484_v19 = vld [vmem:[%s12812_s6 + $0x1d8] sm:$0xff]  ;;  %v7483_v1 = vld [vmem:[%s12812_s6 + $0x1d0] sm:$0xff] }
 0x4c8   : > { %7343 = vmatpush1.msra.mxu0 %v6464_v3  ;;  %7308 = vmatmul.mubr.f32.vlgmr.msra.gmra.mxu1 %v12102_v18  ;;  %v7452_v18 = vld [vmem:[%s12812_s6 + $0xd8] sm:$0xff]  ;;  %v7482_v43 = vld [vmem:[%s12812_s6 + $0x1c8] sm:$0xff]  ;;  %v7481_v44 = vld [vmem:[%s12812_s6 + $0x1c0] sm:$0xff] }
 0x4c9   : > { %7344 = vmatprep.subr.mxu0 %v6457_v22  ;;  %7378 = vmatprep.mubr.f32.mxu0 %v13477_v40  ;;  %v7451_v40 = vld [vmem:[%s12812_s6 + $0xd0] sm:$0xff]  ;;  %v7480_v49 = vld [vmem:[%s12812_s6 + $0x1b8] sm:$0xff]  ;;  %v7478_v36 = vld [vmem:[%s12812_s6 + $0x1a8] sm:$0xff] }
 0x4ca   : > { %7345 = vmatpush1.msra.mxu0 %v6456_v51  ;;  %v7479_v47 = vld [vmem:[%s12812_s6 + $0x1b0] sm:$0xff]  ;;  %v7477_v33 = vld [vmem:[%s12812_s6 + $0x1a0] sm:$0xff]  ;;  %v7476_v29 = vld [vmem:[%s12812_s6 + $0x198] sm:$0xff] }
 0x4cb   : > { %7489 = vmatprep.subr.mxu0 %v7456_v11  ;;  %7873 = vmatmul.mubr.msk.f32.vlgmr.msra.gmra.mxu0 %vm6814_vm10, %v13624_v59  ;;  %v7475_v34 = vld [vmem:[%s12812_s6 + $0x190] sm:$0xff]  ;;  %v7474_v25 = vld [vmem:[%s12812_s6 + $0x188] sm:$0xff]  ;;  %v7473_v37 = vld [vmem:[%s12812_s6 + $0x180] sm:$0xff] }
 0x4cc   : > { %7490 = vmatpush1.msra.mxu0 %v7455_v52  ;;  %v7472_v24 = vld [vmem:[%s12812_s6 + $0x178] sm:$0xff]  ;;  %v7471_v45 = vld [vmem:[%s12812_s6 + $0x170] sm:$0xff]  ;;  %v7470_v60 = vld [vmem:[%s12812_s6 + $0x168] sm:$0xff]  ;;  %v6954_v52 = vpop.f32.mrf.mxu1 }
 0x4cd   : > { %7491 = vmatprep.subr.mxu0 %v7454_v30  ;;  %v7469_v55 = vld [vmem:[%s12812_s6 + $0x160] sm:$0xff]  ;;  %v7468_v3 = vld [vmem:[%s12812_s6 + $0x158] sm:$0xff]  ;;  %v7467_v15 = vld [vmem:[%s12812_s6 + $0x150] sm:$0xff] }
 0x4ce   : > { %7492 = vmatpush1.msra.mxu0 %v7453_v56  ;;  %v7466_v31 = vld [vmem:[%s12812_s6 + $0x148] sm:$0xff]  ;;  %v7465_v21 = vld [vmem:[%s12812_s6 + $0x140] sm:$0xff]  ;;  %v7464_v35 = vld [vmem:[%s12812_s6 + $0x138] sm:$0xff]  ;;  %v6956_v30 = vpop.f32.mrf.mxu1 }
 0x4cf   : > { %7493 = vmatprep.subr.mxu0 %v7452_v18  ;;  %v7463_v13 = vld [vmem:[%s12812_s6 + $0x130] sm:$0xff]  ;;  %v7462_v14 = vld [vmem:[%s12812_s6 + $0x128] sm:$0xff]  ;;  %v7461_v22 = vld [vmem:[%s12812_s6 + $0x120] sm:$0xff] }
 0x4d0   : > { %7494 = vmatpush1.msra.mxu0 %v7451_v40  ;;  %v7460_v26 = vld [vmem:[%s12812_s6 + $0x118] sm:$0xff]  ;;  %v7459_v61 = vld [vmem:[%s12812_s6 + $0x110] sm:$0xff]  ;;  %v7458_v51 = vld [vmem:[%s12812_s6 + $0x108] sm:$0xff]  ;;  %v6808_v59 = vpop.permute.xlu1 %6807 }
 0x4d1   : > { %7495 = vmatprep.subr.mxu0 %v7450_v63  ;;  %v7457_v11 = vld [vmem:[%s12812_s6 + $0x100] sm:$0xff] }
 0x4d2   : > { %7496 = vmatpush1.msra.mxu0 %v7449_v53 }
 0x4d3   : > { %7497 = vmatprep.subr.mxu0 %v7448_v28 }
 0x4d4   : > { %7498 = vmatpush1.msra.mxu0 %v7447_v54 }
 0x4d5   : > { %7499 = vmatprep.subr.mxu0 %v7446_v48 }
 0x4d6   : > { %7500 = vmatpush1.msra.mxu0 %v7445_v6 }
 0x4d7   : > { %7501 = vmatprep.subr.mxu0 %v7444_v0 }
 0x4d8   : > { %7502 = vmatpush1.msra.mxu0 %v7443_v17 }
 0x4d9   : > { %7503 = vmatprep.subr.mxu0 %v7442_v7 }
 0x4da   : > { %7504 = vmatpush1.msra.mxu0 %v7441_v32 }
 0x4db   : > { %7505 = vmatprep.subr.mxu0 %v7440_v27 }
 0x4dc   : > { %7506 = vmatpush1.msra.mxu0 %v7439_v4 }
 0x4dd   : > { %7507 = vmatprep.subr.mxu0 %v7438_v57 }
 0x4de   : > { %7508 = vmatpush1.msra.mxu0 %v7437_v46 }
 0x4df   : > { %7509 = vmatprep.subr.mxu0 %v7436_v50 }
 0x4e0   : > { %7510 = vmatpush1.msra.mxu0 %v7435_v62 }
 0x4e1   : > { %7511 = vmatprep.subr.mxu0 %v7434_v5 }
 0x4e2   : > { %7512 = vmatpush1.msra.mxu0 %v7433_v20 }
 0x4e3   : > { %7513 = vmatprep.subr.mxu0 %v7432_v10 }
 0x4e4   : > { %7514 = vmatpush1.msra.mxu0 %v7431_v12 }
 0x4e5   : > { %7515 = vmatprep.subr.mxu0 %v7430_v8 }
 0x4e6   : > { %7516 = vmatpush1.msra.mxu0 %v7429_v38 }
 0x4e7   : > { %7517 = vmatprep.subr.mxu0 %v7428_v42 }
 0x4e8   : > { %7518 = vmatpush1.msra.mxu0 %v7427_v9 }
 0x4e9   : > { %7519 = vmatprep.subr.mxu0 %v7426_v58 }
 0x4ea   : > { %7520 = vmatpush1.msra.mxu0 %v7425_v16 }
 0x4eb   : > { %7521 = vmatprep.subr.mxu0 %v7488_v41 }
 0x4ec   : > { %7522 = vmatpush2.msra.mxu0 %v7487_v2 }
 0x4ed   : > { %7523 = vmatprep.subr.mxu0 %v7486_v23 }
 0x4ee   : > { %7524 = vmatpush2.msra.mxu0 %v7485_v39 }
 0x4ef   : > { %7525 = vmatprep.subr.mxu0 %v7484_v19 }
 0x4f0   : > { %7526 = vmatpush2.msra.mxu0 %v7483_v1 }
 0x4f1   : > { %7527 = vmatprep.subr.mxu0 %v7482_v43 }
 0x4f2   : > { %7528 = vmatpush2.msra.mxu0 %v7481_v44 }
 0x4f3   : > { %7529 = vmatprep.subr.mxu0 %v7480_v49 }
 0x4f4   : > { %7530 = vmatpush2.msra.mxu0 %v7479_v47 }
 0x4f5   : > { %7531 = vmatprep.subr.mxu0 %v7478_v36 }
 0x4f6   : > { %7532 = vmatpush2.msra.mxu0 %v7477_v33 }
 0x4f7   : > { %7533 = vmatprep.subr.mxu0 %v7476_v29 }
 0x4f8   : > { %7534 = vmatpush2.msra.mxu0 %v7475_v34 }
 0x4f9   : > { %7535 = vmatprep.subr.mxu0 %v7474_v25 }
 0x4fa   : > { %7536 = vmatpush2.msra.mxu0 %v7473_v37 }
 0x4fb   : > { %7537 = vmatprep.subr.mxu0 %v7472_v24 }
 0x4fc   : > { %7538 = vmatpush2.msra.mxu0 %v7471_v45 }
 0x4fd   : > { %7539 = vmatprep.subr.mxu0 %v7470_v60 }
 0x4fe   : > { %7540 = vmatpush2.msra.mxu0 %v7469_v55 }
 0x4ff   : > { %7541 = vmatprep.subr.mxu0 %v7468_v3 }
 0x500   : > { %7542 = vmatpush2.msra.mxu0 %v7467_v15 }
 0x501   : > { %7543 = vmatprep.subr.mxu0 %v7466_v31 }
 0x502   : > { %7544 = vmatpush2.msra.mxu0 %v7465_v21 }
 0x503   : > { %7545 = vmatprep.subr.mxu0 %v7464_v35 }
 0x504   : > { %7546 = vmatpush2.msra.mxu0 %v7463_v13 }
 0x505   : > { %7547 = vmatprep.subr.mxu0 %v7462_v14 }
 0x506   : > { %7548 = vmatpush2.msra.mxu0 %v7461_v22 }
 0x507   : > { %7549 = vmatprep.subr.mxu0 %v7460_v26 }
 0x508   : > { %7550 = vmatpush2.msra.mxu0 %v7459_v61 }
 0x509   : > { %7551 = vmatprep.subr.mxu0 %v7458_v51 }
 0x50a   : > { %7552 = vmatpush2.msra.mxu0 %v7457_v11 }
 0x50e   : > { %v7025_v40 = vpop.f32.mrf.mxu1 }
 0x50f   : > { %v7026_v0 = vadd.f32 %v7025_v40, %v6808_v59 }
 0x510   : > { %v7027_v6 = vpop.f32.mrf.mxu1 }
 0x511   : > { %v7028_v32 = vadd.f32 %v7027_v6, %v6808_v59 }
 0x519   : > { %v7238_v9 = vpop.f32.mrf.mxu1 }
 0x51b   : > { %v7240_v39 = vpop.f32.mrf.mxu1 }
 0x53b   : > { %v6883_v56 = vpop.f32.mrf.mxu0 }
 0x53c   : > { %v6884_v18 = vadd.f32 %v6883_v56, %v6808_v59 }
 0x53d   : > { %v6885_v63 = vpop.f32.mrf.mxu0 }
 0x53e   : > { %v6955_v53 = vadd.f32 %v6954_v52, %v6884_v18  ;;  %v6886_v28 = vadd.f32 %v6885_v63, %v6808_v59 }
 0x540   : > { %v7385_v54 = vmul.f32 1.442695, %v6955_v53  ;;  %v6957_v48 = vadd.f32 %v6956_v30, %v6886_v28 }
 0x542   : > { %7902 = vpow2.f32 %v7385_v54  ;;  %v7387_v17 = vmul.f32 1.442695, %v6957_v48 }
 0x543   : > { %v7096_v7 = vpop.f32.mrf.mxu0 }
 0x544   : > { %7904 = vpow2.f32 %v7387_v17  ;;  %v7097_v27 = vadd.f32 %v7096_v7, %v7026_v0 }
 0x545   : > { %v7098_v4 = vpop.f32.mrf.mxu0 }
 0x546   : > { %v7389_v57 = vmul.f32 1.442695, %v7097_v27  ;;  %v7099_v46 = vadd.f32 %v7098_v4, %v7028_v32 }
 0x548   : > { %7906 = vpow2.f32 %v7389_v57  ;;  %v7391_v50 = vmul.f32 1.442695, %v7099_v46 }
 0x54a   : > { %7908 = vpow2.f32 %v7391_v50 }
 0x54f   : > { %v7903_v62 = vpop.eup %7902 }
 0x550   : > { %7401 = vst [vmem:[#allocation3 + $0x10] sm:$0xf] %v7903_v62 }
 0x551   : > { %v7905_v5 = vpop.eup %7904 }
 0x552   : > { %7402 = vst [vmem:[#allocation3] sm:$0xf] %v7905_v5 }
 0x555   : > { %v7907_v20 = vpop.eup %7906 }
 0x556   : > { %v7405_v10 = vrot.slane %v7907_v20, 4 }
 0x557   : > { %v7909_v12 = vpop.eup %7908 }
 0x558   : > { %7409 = vst [vmem:[#allocation3 + $0x10] sm:$0xf0] %v7405_v10  ;;  %v7406_v8 = vrot.slane %v7909_v12, 4 }
 0x55a   : > { %7410 = vst [vmem:[#allocation3] sm:$0xf0] %v7406_v8 }
 0x55f   : > { %v7421_v42 = vld [vmem:[#allocation3 + $0x10] sm:$0xff] }
 0x561   : > { %v7422_v38 = vld [vmem:[#allocation3] sm:$0xff] }
 0x562   : > { %7553 = vmatprep.mubr.f32.mxu0 %v7422_v38 }
 0x563   : > { %7554 = vmatmul.mubr.f32.vlgmr.msra.gmra.mxu0 %v7421_v42 }
 0x583   : > { %v7167_v58 = vpop.f32.mrf.mxu0 }
 0x584   : > { %v7168_v16 = vadd.f32 %v7167_v58, %v6808_v59 }
 0x585   : > { %v7169_v41 = vpop.f32.mrf.mxu0 }
 0x586   : > { %v7239_v2 = vadd.f32 %v7238_v9, %v7168_v16  ;;  %v7170_v23 = vadd.f32 %v7169_v41, %v6808_v59 }
 0x588   : > { %v7393_v19 = vmul.f32 1.442695, %v7239_v2  ;;  %v7241_v1 = vadd.f32 %v7240_v39, %v7170_v23  ;;  %v7309_v44 = vpop.f32.mrf.mxu1 }
 0x589   : > { %v7310_v49 = vadd.f32 %v7309_v44, %v6808_v59 }
 0x58a   : > { %7910 = vpow2.f32 %v7393_v19  ;;  %v7395_v43 = vmul.f32 1.442695, %v7241_v1  ;;  %v7311_v47 = vpop.f32.mrf.mxu1 }
 0x58b   : > { %v7380_v36 = vpop.f32.mrf.mxu0  ;;  %v7312_v33 = vadd.f32 %v7311_v47, %v6808_v59 }
 0x58c   : > { %7912 = vpow2.f32 %v7395_v43  ;;  %v7381_v29 = vadd.f32 %v7380_v36, %v7310_v49 }
 0x58d   : > { %v7382_v34 = vpop.f32.mrf.mxu0 }
 0x58e   : > { %v7397_v25 = vmul.f32 1.442695, %v7381_v29  ;;  %v7383_v37 = vadd.f32 %v7382_v34, %v7312_v33 }
 0x590   : > { %7914 = vpow2.f32 %v7397_v25  ;;  %v7399_v24 = vmul.f32 1.442695, %v7383_v37 }
 0x592   : > { %7916 = vpow2.f32 %v7399_v24 }
 0x597   : > { %v7911_v45 = vpop.eup %7910 }
 0x598   : > { %7411 = vst [vmem:[#allocation3 + $0x18] sm:$0xf] %v7911_v45 }
 0x599   : > { %v7913_v60 = vpop.eup %7912 }
 0x59a   : > { %7412 = vst [vmem:[#allocation3 + $0x8] sm:$0xf] %v7913_v60 }
 0x59d   : > { %v7915_v55 = vpop.eup %7914 }
 0x59e   : > { %v7415_v3 = vrot.slane %v7915_v55, 4 }
 0x59f   : > { %v7917_v15 = vpop.eup %7916 }
 0x5a0   : > { %7419 = vst [vmem:[#allocation3 + $0x18] sm:$0xf0] %v7415_v3  ;;  %v7416_v31 = vrot.slane %v7917_v15, 4 }
 0x5a2   : > { %7420 = vst [vmem:[#allocation3 + $0x8] sm:$0xf0] %v7416_v31 }
 0x5a7   : > { %v7423_v35 = vld [vmem:[#allocation3 + $0x18] sm:$0xff] }
 0x5a9   : > { %v7424_v21 = vld [vmem:[#allocation3 + $0x8] sm:$0xff] }
 0x5aa   : > { %7559 = vmatprep.mubr.f32.mxu0 %v7424_v21 }
 0x5ab   : > { %7560 = vmatmul.mubr.f32.gmra.mxu0 %v7423_v35 }
 0x623   : > { %v7555_v13 = vpop.f32.mrf.mxu0 }
 0x624   : > { %7566 = vst [vmem:[%s282_s10] sm:$0xff] %v7555_v13 }
 0x625   : > { %v7557_v14 = vpop.f32.mrf.mxu0 }
 0x626   : > { %7567 = vst [vmem:[%s282_s10 + $0x8] sm:$0xff] %v7557_v14 }
 0x66b   : > { %v7561_v22 = vpop.f32.mrf.mxu0 }
 0x66c   : > { %7568 = vst [vmem:[%s282_s10 + $0x10] sm:$0xff] %v7561_v22 }
 0x66d   : > { %v7563_v26 = vpop.f32.mrf.mxu0 }
 0x66e   : > { %7569 = vst [vmem:[%s282_s10 + $0x18] sm:$0xff] %v7563_v26 }
 0x66f PF: > { %s17_s24 = sadd.s32 1, %s7934_s24  }
 0x670   : > { %p14_p5 = scmp.ge.s32.totalorder %s17_s24, 4  }
 0x672   :  { %16 = sbr.rel (!%p14_p5) target bundleno = 1 (0x1), region = 86 }

</bundles_post_ra>
